<compile_context>
chip_gen: v5e
topology: v5e:2x2
jax: 0.10.0
libtpu: 0.0.40
codegen_flags: <defaults>
</compile_context>

<pallas_src>
import functools

import jax
import jax.numpy as jnp
from jax.experimental import pallas as pl
from jax.experimental.pallas import tpu as pltpu

_VMEM_LIMIT = 32 * 1024 * 1024
_ROW_TILE = 4096          # multiple of 8; ~1-2 MiB input blocks for these widths
_TAG_K = 3                # torch_geometric TAGConv default K
_BN_EPS = 1e-5


def _gelu(x):
    # TODO(synk): PyTorch nn.GELU() defaults to the exact erf form; the tanh
    # approximation is used here to guarantee Mosaic lowering (diff ~1e-3).
    c = 0.7978845608028654  # sqrt(2/pi)
    return 0.5 * x * (1.0 + jnp.tanh(c * (x + 0.044715 * x * x * x)))


# ----------------------- fused (affine) + matmul + activation -----------------------
def _linear_act_kernel(x_ref, s_ref, t_ref, w_ref, b_ref, o_ref, *, act):
    x = x_ref[...].astype(jnp.float32)
    x = x * s_ref[...].astype(jnp.float32) + t_ref[...].astype(jnp.float32)
    y = jnp.dot(x, w_ref[...].astype(jnp.float32),
                preferred_element_type=jnp.float32)
    y = y + b_ref[...].astype(jnp.float32)
    if act == "gelu":
        y = _gelu(y)
    elif act == "sigmoid":
        y = 1.0 / (1.0 + jnp.exp(-y))
    elif act == "softmax":
        y = y - jnp.max(y, axis=-1, keepdims=True)
        e = jnp.exp(y)
        y = e / jnp.sum(e, axis=-1, keepdims=True)
    o_ref[...] = y.astype(o_ref.dtype)


def linear_act(x, w, b=None, act="none", pre_scale=None, pre_shift=None,
               row_tile=_ROW_TILE):
    """act( (x * pre_scale + pre_shift) @ w + b ), rows tiled on a 1-D parallel grid."""
    rows, cin = x.shape
    cout = w.shape[-1]
    s = (jnp.ones((1, cin), jnp.float32) if pre_scale is None
         else pre_scale.reshape(1, cin).astype(jnp.float32))
    t = (jnp.zeros((1, cin), jnp.float32) if pre_shift is None
         else pre_shift.reshape(1, cin).astype(jnp.float32))
    bias = (jnp.zeros((1, cout), jnp.float32) if b is None
            else b.reshape(1, cout).astype(jnp.float32))
    tr = rows if rows <= row_tile else row_tile   # row_tile is a multiple of 8
    return pl.pallas_call(
        functools.partial(_linear_act_kernel, act=act),
        out_shape=jax.ShapeDtypeStruct((rows, cout), jnp.float32),
        grid_spec=pltpu.PrefetchScalarGridSpec(
            num_scalar_prefetch=0,
            grid=(pl.cdiv(rows, tr),),
            in_specs=[
                pl.BlockSpec((tr, cin), lambda i: (i, 0)),      # x row tile
                pl.BlockSpec((1, cin), lambda i: (0, 0)),       # fused pre-scale
                pl.BlockSpec((1, cin), lambda i: (0, 0)),       # fused pre-shift
                pl.BlockSpec((cin, cout), lambda i: (0, 0)),    # weights (resident)
                pl.BlockSpec((1, cout), lambda i: (0, 0)),      # bias (resident)
            ],
            out_specs=pl.BlockSpec((tr, cout), lambda i: (i, 0)),
        ),
        compiler_params=pltpu.CompilerParams(
            dimension_semantics=("parallel",),
            vmem_limit_bytes=_VMEM_LIMIT),
    )(x, s, t, w.astype(jnp.float32), bias)


# ------------------------------- batch-norm statistics ------------------------------
def _bn_stats_kernel(x_ref, stats_ref, sum_acc, sq_acc, *, n_rows, tile_rows, eps):
    i = pl.program_id(0)

    @pl.when(i == 0)
    def _init():
        sum_acc[...] = jnp.zeros_like(sum_acc)
        sq_acc[...] = jnp.zeros_like(sq_acc)

    x = x_ref[...].astype(jnp.float32)
    row = i * tile_rows + jax.lax.broadcasted_iota(jnp.int32, x.shape, 0)
    xm = jnp.where(row < n_rows, x, 0.0)        # mask ragged boundary rows
    sum_acc[...] += jnp.sum(xm, axis=0, keepdims=True)
    sq_acc[...] += jnp.sum(xm * xm, axis=0, keepdims=True)

    @pl.when(i == pl.num_programs(0) - 1)
    def _finalize():
        inv_n = 1.0 / float(n_rows)
        mean = sum_acc[...] * inv_n
        var = sq_acc[...] * inv_n - mean * mean   # biased var (torch BN forward)
        stats_ref[0:1, :] = mean
        stats_ref[1:2, :] = jax.lax.rsqrt(var + eps)


def batchnorm_affine(x, gamma, beta, eps=_BN_EPS, row_tile=_ROW_TILE):
    """BatchNorm forward (batch statistics) folded into a per-feature affine:
    returns (scale, shift) such that bn(x) == x * scale + shift."""
    rows, c = x.shape
    tr = rows if rows <= row_tile else row_tile
    stats = pl.pallas_call(
        functools.partial(_bn_stats_kernel, n_rows=rows, tile_rows=tr, eps=eps),
        out_shape=jax.ShapeDtypeStruct((2, c), jnp.float32),
        grid_spec=pltpu.PrefetchScalarGridSpec(
            num_scalar_prefetch=0,
            grid=(pl.cdiv(rows, tr),),
            in_specs=[pl.BlockSpec((tr, c), lambda i: (i, 0))],
            out_specs=pl.BlockSpec((2, c), lambda i: (0, 0)),
            scratch_shapes=[pltpu.VMEM((1, c), jnp.float32),
                            pltpu.VMEM((1, c), jnp.float32)],
        ),
        compiler_params=pltpu.CompilerParams(
            dimension_semantics=("arbitrary",),
            vmem_limit_bytes=_VMEM_LIMIT),
    )(x)
    mean, rstd = stats[0], stats[1]
    scale = gamma.astype(jnp.float32) * rstd
    shift = beta.astype(jnp.float32) - mean * scale
    return scale, shift


# --------------------------------- TAGConv (K = 3) ----------------------------------
def normalized_adjacency(edge_index, n):
    # TODO(synk): dense D^-1/2 A D^-1/2 built with XLA scatter; for large graphs
    # this should become a sparse Pallas gather/scatter (scalar-prefetch) kernel.
    src, dst = edge_index[0], edge_index[1]
    a = jnp.zeros((n, n), jnp.float32).at[dst, src].add(1.0)
    deg = jnp.sum(a, axis=1)                      # in-degree (gcn_norm, no self-loops)
    dinv = jnp.where(deg > 0, jax.lax.rsqrt(deg), 0.0)
    return a * dinv[:, None] * dinv[None, :]


def tagconv_act(a_hat, x, w_cat, b, act, k=_TAG_K):
    """TAGConv: sum_{j=0..K} (A_hat^j x) W_j + b, followed by `act` (fused)."""
    xs = [x]
    for _ in range(k):
        xs.append(linear_act(a_hat, xs[-1]))      # x_{j+1} = A_hat @ x_j (Pallas matmul)
    x_cat = jnp.concatenate(xs, axis=1)           # (N, (K+1)*Cin)
    return linear_act(x_cat, w_cat, b, act)       # single fused matmul for all K+1 terms


# ------------------------------------ full model ------------------------------------
def torch_model_forward(params, node_x, edge_raw, edge_index):
    n_nodes = node_x.shape[0]
    a_hat = normalized_adjacency(edge_index, n_nodes)

    # NodeGLAM
    np_ = params["node"]
    s, t = batchnorm_affine(node_x, np_["bn_gamma"], np_["bn_beta"])
    h = linear_act(node_x, np_["lin1"]["w"], np_["lin1"]["b"], "gelu",
                   pre_scale=s, pre_shift=t)
    h = tagconv_act(a_hat, h, np_["tag1"]["w"], np_["tag1"]["b"], "gelu")
    h = linear_act(h, np_["lin2"]["w"], np_["lin2"]["b"], "gelu")
    h = tagconv_act(a_hat, h, np_["tag2"]["w"], np_["tag2"]["b"], "gelu")
    a = jnp.concatenate([node_x.astype(jnp.float32), h], axis=1)
    a = linear_act(a, np_["lin3"]["w"], np_["lin3"]["b"], "gelu")
    node_emb = linear_act(a, np_["lin4"]["w"], np_["lin4"]["b"], "none")

    # edge inputs (gather done with XLA take; TODO(synk): pl.Element gather kernel)
    src, dst = edge_index[0], edge_index[1]
    emb_src = jnp.take(node_emb, src, axis=0)
    emb_dst = jnp.take(node_emb, dst, axis=0)
    edge_raw_f = edge_raw.astype(jnp.float32)

    # EdgeGLAM
    ep = params["edge"]
    eg_in = jnp.concatenate([emb_src, emb_dst, edge_raw_f], axis=1)
    s2, t2 = batchnorm_affine(eg_in, ep["bn_gamma"], ep["bn_beta"])
    he = linear_act(eg_in, ep["lin1"]["w"], ep["lin1"]["b"], "gelu",
                    pre_scale=s2, pre_shift=t2)
    edge_emb = linear_act(he, ep["lin2"]["w"], ep["lin2"]["b"], "none")

    # EdgeCategoryClass
    cp = params["cat"]
    cat_in = jnp.concatenate([emb_src, emb_dst, edge_emb, edge_raw_f], axis=1)
    hc = linear_act(cat_in, cp["lin1"]["w"], cp["lin1"]["b"], "gelu")
    hc = linear_act(hc, cp["lin2"]["w"], cp["lin2"]["b"], "gelu")
    edge_multi_class = linear_act(hc, cp["cls"]["w"], cp["cls"]["b"], "softmax")

    # EdgeBinaryClass
    bp = params["bin"]
    hb = linear_act(edge_emb, bp["lin1"]["w"], bp["lin1"]["b"], "gelu")
    edge_bin_class = linear_act(hb, bp["lin2"]["w"], bp["lin2"]["b"], "sigmoid")[:, 0]

    return {"node_emb": node_emb, "edge_emb": edge_emb,
            "edge_multi_class": edge_multi_class, "edge_bin_class": edge_bin_class}


# ----------------------------------- parameter init ---------------------------------
def init_params(key, PARAMS):
    node_in = PARAMS["node_featch"]
    h1 = PARAMS["H1"]
    node_emb_dim = h1[-1]
    edge_raw_dim = PARAMS["edge_featch"]
    h2 = PARAMS["H2"]
    edge_emb_dim = h2[-1]
    n_cls = PARAMS["num_edge_classes"]
    cat_h, bin_h = [64, 32], [64, 32]

    keys = list(jax.random.split(key, 64))
    key_it = iter(keys)

    def lin(cin, cout):
        k1, k2 = jax.random.split(next(key_it))
        lim = 1.0 / (cin ** 0.5)
        return {"w": jax.random.uniform(k1, (cin, cout), jnp.float32, -lim, lim),
                "b": jax.random.uniform(k2, (cout,), jnp.float32, -lim, lim)}

    def tag(cin, cout):
        lim = 1.0 / (cin ** 0.5)
        ws = [jax.random.uniform(next(key_it), (cin, cout), jnp.float32, -lim, lim)
              for _ in range(_TAG_K + 1)]
        return {"w": jnp.concatenate(ws, axis=0),            # ((K+1)*cin, cout)
                "b": jnp.zeros((cout,), jnp.float32)}

    params = {
        "node": {
            "bn_gamma": jnp.ones((node_in,), jnp.float32),
            "bn_beta": jnp.zeros((node_in,), jnp.float32),
            "lin1": lin(node_in, h1[0]),
            "tag1": tag(h1[0], h1[1]),
            "lin2": lin(h1[1], h1[2]),
            "tag2": tag(h1[2], h1[3]),
            "lin3": lin(h1[3] + node_in, h1[4]),
            "lin4": lin(h1[4], node_emb_dim),
        },
    }
    eg_in = 2 * node_emb_dim + edge_raw_dim
    params["edge"] = {
        # TODO(synk): EdgeGLAM passes output_ as BatchNorm's 2nd arg (eps) in the
        # original code; standard eps=1e-5 affine BatchNorm is used here.
        "bn_gamma": jnp.ones((eg_in,), jnp.float32),
        "bn_beta": jnp.zeros((eg_in,), jnp.float32),
        "lin1": lin(eg_in, h2[0]),
        "lin2": lin(h2[0], edge_emb_dim),
    }
    cat_in = 2 * node_emb_dim + edge_emb_dim + edge_raw_dim
    params["cat"] = {"lin1": lin(cat_in, cat_h[0]),
                     "lin2": lin(cat_h[0], cat_h[1]),
                     "cls": lin(cat_h[1], n_cls)}
    params["bin"] = {"lin1": lin(edge_emb_dim, bin_h[0]),
                     "lin2": lin(bin_h[0], 1)}
    return params


if __name__ == "__main__":
    PARAMS = {
        "node_featch": 16,
        "H1": [32, 32, 32, 32, 16],   # node hidden dims; node_emb_dim = 16
        "edge_featch": 8,
        "H2": [32, 16],               # edge hidden dims; edge_emb_dim = 16
        "num_edge_classes": 4,
    }
    n_nodes, n_edges = 32, 64

    key = jax.random.PRNGKey(0)
    k_param, k_x, k_e, k_idx = jax.random.split(key, 4)
    params = init_params(k_param, PARAMS)
    node_x = jax.random.normal(k_x, (n_nodes, PARAMS["node_featch"]), jnp.float32)
    edge_raw = jax.random.normal(k_e, (n_edges, PARAMS["edge_featch"]), jnp.float32)
    edge_index = jax.random.randint(k_idx, (2, n_edges), 0, n_nodes, jnp.int32)

    forward = jax.jit(torch_model_forward)
    out = forward(params, node_x, edge_raw, edge_index)
    jax.block_until_ready(out)
    assert out["node_emb"].shape == (n_nodes, PARAMS["H1"][-1])
    assert out["edge_emb"].shape == (n_edges, PARAMS["H2"][-1])
    assert out["edge_multi_class"].shape == (n_edges, PARAMS["num_edge_classes"])
    assert out["edge_bin_class"].shape == (n_edges,)
    print("KERNEL_OK")
</pallas_src>

<mosaic_0001>
module attributes {stable_mosaic.version = 11 : i64} {
  func.func @_bn_stats_kernel(%arg0: i32, %arg1: memref<32x16xf32, #tpu.memory_space<vmem>>, %arg2: memref<2x16xf32, #tpu.memory_space<vmem>>, %arg3: memref<1x16xf32, #tpu.memory_space<vmem>>, %arg4: memref<1x16xf32, #tpu.memory_space<vmem>>) attributes {dimension_semantics = [#tpu.dimension_semantics<arbitrary>], iteration_bounds = array<i64: 1>, scalar_prefetch = 0 : i64, scratch_operands = 2 : i64, tpu.core_type = #tpu.core_type<tc>, window_params = [{transform_indices = @transform_0, window_bounds = array<i64: 32, 16>}, {pipeline_mode = #tpu.pipeline_mode<synchronous>, transform_indices = @transform_1, window_bounds = array<i64: 2, 16>}]} {
    %c0_i32 = arith.constant 0 : i32
    %0 = arith.cmpi eq, %arg0, %c0_i32 : i32
    %1 = arith.extui %0 : i1 to i32
    %c0_i32_0 = arith.constant 0 : i32
    %2 = arith.cmpi ne, %1, %c0_i32_0 : i32
    scf.if %2 {
      %cst_15 = arith.constant 0.000000e+00 : f32
      %26 = vector.broadcast %cst_15 : f32 to vector<1x16xf32>
      %c0_16 = arith.constant 0 : index
      %c0_17 = arith.constant 0 : index
      %27 = vector.load %arg3[%c0_16, %c0_17] : memref<1x16xf32, #tpu.memory_space<vmem>>, vector<1x16xf32>
      tpu.vector_store %arg3[%c0_16, %c0_17], %26 {strides = array<i32>} : memref<1x16xf32, #tpu.memory_space<vmem>>, vector<1x16xf32>,
      %cst_18 = arith.constant 0.000000e+00 : f32
      %28 = vector.broadcast %cst_18 : f32 to vector<1x16xf32>
      %c0_19 = arith.constant 0 : index
      %c0_20 = arith.constant 0 : index
      %29 = vector.load %arg4[%c0_19, %c0_20] : memref<1x16xf32, #tpu.memory_space<vmem>>, vector<1x16xf32>
      tpu.vector_store %arg4[%c0_19, %c0_20], %28 {strides = array<i32>} : memref<1x16xf32, #tpu.memory_space<vmem>>, vector<1x16xf32>,
    } else {
    }
    %c0 = arith.constant 0 : index
    %c0_1 = arith.constant 0 : index
    %3 = vector.load %arg1[%c0, %c0_1] : memref<32x16xf32, #tpu.memory_space<vmem>>, vector<32x16xf32>
    %c32_i32 = arith.constant 32 : i32
    %4 = arith.muli %arg0, %c32_i32 : i32
    %5 = tpu.iota {dimensions = array<i32: 0>} : vector<32x16xi32>
    %6 = vector.broadcast %4 : i32 to vector<32x16xi32>
    %7 = arith.addi %6, %5 : vector<32x16xi32>
    %c32_i32_2 = arith.constant 32 : i32
    %8 = vector.broadcast %c32_i32_2 : i32 to vector<32x16xi32>
    %9 = arith.cmpi slt, %7, %8 : vector<32x16xi32>
    %cst = arith.constant 0.000000e+00 : f32
    %10 = vector.broadcast %cst : f32 to vector<32x16xf32>
    %11 = arith.select %9, %3, %10 : vector<32x16xi1>, vector<32x16xf32>
    %c0_3 = arith.constant 0 : index
    %c0_4 = arith.constant 0 : index
    %12 = vector.load %arg3[%c0_3, %c0_4] : memref<1x16xf32, #tpu.memory_space<vmem>>, vector<1x16xf32>
    %cst_5 = arith.constant dense<0.000000e+00> : vector<16xf32>
    %13 = vector.multi_reduction <add>, %11, %cst_5 [0] : vector<32x16xf32> to vector<16xf32>
    %14 = vector.shape_cast %13 : vector<16xf32> to vector<1x16xf32>
    %15 = arith.addf %12, %14 : vector<1x16xf32>
    %c0_6 = arith.constant 0 : index
    %c0_7 = arith.constant 0 : index
    %16 = vector.load %arg3[%c0_6, %c0_7] : memref<1x16xf32, #tpu.memory_space<vmem>>, vector<1x16xf32>
    tpu.vector_store %arg3[%c0_6, %c0_7], %15 {strides = array<i32>} : memref<1x16xf32, #tpu.memory_space<vmem>>, vector<1x16xf32>,
    %c0_8 = arith.constant 0 : index
    %c0_9 = arith.constant 0 : index
    %17 = vector.load %arg4[%c0_8, %c0_9] : memref<1x16xf32, #tpu.memory_space<vmem>>, vector<1x16xf32>
    %18 = arith.mulf %11, %11 : vector<32x16xf32>
    %cst_10 = arith.constant dense<0.000000e+00> : vector<16xf32>
    %19 = vector.multi_reduction <add>, %18, %cst_10 [0] : vector<32x16xf32> to vector<16xf32>
    %20 = vector.shape_cast %19 : vector<16xf32> to vector<1x16xf32>
    %21 = arith.addf %17, %20 : vector<1x16xf32>
    %c0_11 = arith.constant 0 : index
    %c0_12 = arith.constant 0 : index
    %22 = vector.load %arg4[%c0_11, %c0_12] : memref<1x16xf32, #tpu.memory_space<vmem>>, vector<1x16xf32>
    tpu.vector_store %arg4[%c0_11, %c0_12], %21 {strides = array<i32>} : memref<1x16xf32, #tpu.memory_space<vmem>>, vector<1x16xf32>,
    %c0_i32_13 = arith.constant 0 : i32
    %23 = arith.cmpi eq, %arg0, %c0_i32_13 : i32
    %24 = arith.extui %23 : i1 to i32
    %c0_i32_14 = arith.constant 0 : i32
    %25 = arith.cmpi ne, %24, %c0_i32_14 : i32
    scf.if %25 {
      %c0_15 = arith.constant 0 : index
      %c0_16 = arith.constant 0 : index
      %26 = vector.load %arg3[%c0_15, %c0_16] : memref<1x16xf32, #tpu.memory_space<vmem>>, vector<1x16xf32>
      %cst_17 = arith.constant 3.125000e-02 : f32
      %27 = vector.broadcast %cst_17 : f32 to vector<1x16xf32>
      %28 = arith.mulf %26, %27 : vector<1x16xf32>
      %c0_18 = arith.constant 0 : index
      %c0_19 = arith.constant 0 : index
      %29 = vector.load %arg4[%c0_18, %c0_19] : memref<1x16xf32, #tpu.memory_space<vmem>>, vector<1x16xf32>
      %cst_20 = arith.constant 3.125000e-02 : f32
      %30 = vector.broadcast %cst_20 : f32 to vector<1x16xf32>
      %31 = arith.mulf %29, %30 : vector<1x16xf32>
      %32 = arith.mulf %28, %28 : vector<1x16xf32>
      %33 = arith.subf %31, %32 : vector<1x16xf32>
      %c0_21 = arith.constant 0 : index
      %c0_22 = arith.constant 0 : index
      %34 = vector.load %arg2[%c0_21, %c0_22] : memref<2x16xf32, #tpu.memory_space<vmem>>, vector<1x16xf32>
      tpu.vector_store %arg2[%c0_21, %c0_22], %28 {strides = array<i32>} : memref<2x16xf32, #tpu.memory_space<vmem>>, vector<1x16xf32>,
      %cst_23 = arith.constant 9.99999974E-6 : f32
      %35 = vector.broadcast %cst_23 : f32 to vector<1x16xf32>
      %36 = arith.addf %33, %35 : vector<1x16xf32>
      %37 = math.rsqrt %36 : vector<1x16xf32>
      %c1 = arith.constant 1 : index
      %c0_24 = arith.constant 0 : index
      %38 = vector.load %arg2[%c1, %c0_24] : memref<2x16xf32, #tpu.memory_space<vmem>>, vector<1x16xf32>
      tpu.vector_store %arg2[%c1, %c0_24], %37 {strides = array<i32>} : memref<2x16xf32, #tpu.memory_space<vmem>>, vector<1x16xf32>,
    } else {
    }
    return
  }
  func.func @transform_0(%arg0: i32) -> (i32, i32) {
    %c0_i32 = arith.constant 0 : i32
    %c0_i32_0 = arith.constant 0 : i32
    return %arg0, %c0_i32 : i32, i32
  }
  func.func @transform_1(%arg0: i32) -> (i32, i32) {
    %c0_i32 = arith.constant 0 : i32
    %c0_i32_0 = arith.constant 0 : i32
    %c0_i32_1 = arith.constant 0 : i32
    return %c0_i32, %c0_i32_0 : i32, i32
  }
}

module attributes {stable_mosaic.version = 11 : i64} {
  func.func @_linear_act_kernel(%arg0: i32, %arg1: memref<32x16xf32, #tpu.memory_space<vmem>>, %arg2: memref<1x16xf32, #tpu.memory_space<vmem>>, %arg3: memref<1x16xf32, #tpu.memory_space<vmem>>, %arg4: memref<16x32xf32, #tpu.memory_space<vmem>>, %arg5: memref<1x32xf32, #tpu.memory_space<vmem>>, %arg6: memref<32x32xf32, #tpu.memory_space<vmem>>) attributes {dimension_semantics = [#tpu.dimension_semantics<parallel>], iteration_bounds = array<i64: 1>, scalar_prefetch = 0 : i64, scratch_operands = 0 : i64, tpu.core_type = #tpu.core_type<tc>, window_params = [{transform_indices = @transform_0, window_bounds = array<i64: 32, 16>}, {pipeline_mode = #tpu.pipeline_mode<synchronous>, transform_indices = @transform_1, window_bounds = array<i64: 1, 16>}, {pipeline_mode = #tpu.pipeline_mode<synchronous>, transform_indices = @transform_2, window_bounds = array<i64: 1, 16>}, {pipeline_mode = #tpu.pipeline_mode<synchronous>, transform_indices = @transform_3, window_bounds = array<i64: 16, 32>}, {pipeline_mode = #tpu.pipeline_mode<synchronous>, transform_indices = @transform_4, window_bounds = array<i64: 1, 32>}, {transform_indices = @transform_5, window_bounds = array<i64: 32, 32>}]} {
    %c0 = arith.constant 0 : index
    %c0_0 = arith.constant 0 : index
    %0 = vector.load %arg1[%c0, %c0_0] : memref<32x16xf32, #tpu.memory_space<vmem>>, vector<32x16xf32>
    %c0_1 = arith.constant 0 : index
    %c0_2 = arith.constant 0 : index
    %1 = vector.load %arg2[%c0_1, %c0_2] : memref<1x16xf32, #tpu.memory_space<vmem>>, vector<1x16xf32>
    %2 = vector.broadcast %1 : vector<1x16xf32> to vector<32x16xf32>
    %3 = arith.mulf %0, %2 : vector<32x16xf32>
    %c0_3 = arith.constant 0 : index
    %c0_4 = arith.constant 0 : index
    %4 = vector.load %arg3[%c0_3, %c0_4] : memref<1x16xf32, #tpu.memory_space<vmem>>, vector<1x16xf32>
    %5 = vector.broadcast %4 : vector<1x16xf32> to vector<32x16xf32>
    %6 = arith.addf %3, %5 : vector<32x16xf32>
    %c0_5 = arith.constant 0 : index
    %c0_6 = arith.constant 0 : index
    %7 = vector.load %arg4[%c0_5, %c0_6] : memref<16x32xf32, #tpu.memory_space<vmem>>, vector<16x32xf32>
    %cst = arith.constant dense<0.000000e+00> : vector<32x32xf32>
    %8 = tpu.matmul %6, %7, %cst {dimension_numbers = #tpu.dot_dimension_numbers<[1], [0], [0], [1], [0, 0, 1, 1], [], []>} : vector<32x16xf32>, vector<16x32xf32>, vector<32x32xf32> -> vector<32x32xf32>
    %c0_7 = arith.constant 0 : index
    %c0_8 = arith.constant 0 : index
    %9 = vector.load %arg5[%c0_7, %c0_8] : memref<1x32xf32, #tpu.memory_space<vmem>>, vector<1x32xf32>
    %10 = vector.broadcast %9 : vector<1x32xf32> to vector<32x32xf32>
    %11 = arith.addf %8, %10 : vector<32x32xf32>
    %cst_9 = arith.constant 5.000000e-01 : f32
    %12 = vector.broadcast %cst_9 : f32 to vector<32x32xf32>
    %13 = arith.mulf %12, %11 : vector<32x32xf32>
    %cst_10 = arith.constant 4.471500e-02 : f32
    %14 = vector.broadcast %cst_10 : f32 to vector<32x32xf32>
    %15 = arith.mulf %14, %11 : vector<32x32xf32>
    %16 = arith.mulf %15, %11 : vector<32x32xf32>
    %17 = arith.mulf %16, %11 : vector<32x32xf32>
    %18 = arith.addf %11, %17 : vector<32x32xf32>
    %cst_11 = arith.constant 0.797884583 : f32
    %19 = vector.broadcast %cst_11 : f32 to vector<32x32xf32>
    %20 = arith.mulf %19, %18 : vector<32x32xf32>
    %21 = math.tanh %20 : vector<32x32xf32>
    %cst_12 = arith.constant 1.000000e+00 : f32
    %22 = vector.broadcast %cst_12 : f32 to vector<32x32xf32>
    %23 = arith.addf %22, %21 : vector<32x32xf32>
    %24 = arith.mulf %13, %23 : vector<32x32xf32>
    %c0_13 = arith.constant 0 : index
    %c0_14 = arith.constant 0 : index
    %25 = vector.load %arg6[%c0_13, %c0_14] : memref<32x32xf32, #tpu.memory_space<vmem>>, vector<32x32xf32>
    tpu.vector_store %arg6[%c0_13, %c0_14], %24 {strides = array<i32>} : memref<32x32xf32, #tpu.memory_space<vmem>>, vector<32x32xf32>,
    return
  }
  func.func @transform_0(%arg0: i32) -> (i32, i32) {
    %c0_i32 = arith.constant 0 : i32
    %c0_i32_0 = arith.constant 0 : i32
    return %arg0, %c0_i32 : i32, i32
  }
  func.func @transform_1(%arg0: i32) -> (i32, i32) {
    %c0_i32 = arith.constant 0 : i32
    %c0_i32_0 = arith.constant 0 : i32
    %c0_i32_1 = arith.constant 0 : i32
    return %c0_i32, %c0_i32_0 : i32, i32
  }
  func.func @transform_2(%arg0: i32) -> (i32, i32) {
    %c0_i32 = arith.constant 0 : i32
    %c0_i32_0 = arith.constant 0 : i32
    %c0_i32_1 = arith.constant 0 : i32
    return %c0_i32, %c0_i32_0 : i32, i32
  }
  func.func @transform_3(%arg0: i32) -> (i32, i32) {
    %c0_i32 = arith.constant 0 : i32
    %c0_i32_0 = arith.constant 0 : i32
    %c0_i32_1 = arith.constant 0 : i32
    return %c0_i32, %c0_i32_0 : i32, i32
  }
  func.func @transform_4(%arg0: i32) -> (i32, i32) {
    %c0_i32 = arith.constant 0 : i32
    %c0_i32_0 = arith.constant 0 : i32
    %c0_i32_1 = arith.constant 0 : i32
    return %c0_i32, %c0_i32_0 : i32, i32
  }
  func.func @transform_5(%arg0: i32) -> (i32, i32) {
    %c0_i32 = arith.constant 0 : i32
    %c0_i32_0 = arith.constant 0 : i32
    return %arg0, %c0_i32 : i32, i32
  }
}

module attributes {stable_mosaic.version = 11 : i64} {
  func.func @_linear_act_kernel(%arg0: i32, %arg1: memref<32x32xf32, #tpu.memory_space<vmem>>, %arg2: memref<1x32xf32, #tpu.memory_space<vmem>>, %arg3: memref<1x32xf32, #tpu.memory_space<vmem>>, %arg4: memref<32x32xf32, #tpu.memory_space<vmem>>, %arg5: memref<1x32xf32, #tpu.memory_space<vmem>>, %arg6: memref<32x32xf32, #tpu.memory_space<vmem>>) attributes {dimension_semantics = [#tpu.dimension_semantics<parallel>], iteration_bounds = array<i64: 1>, scalar_prefetch = 0 : i64, scratch_operands = 0 : i64, tpu.core_type = #tpu.core_type<tc>, window_params = [{transform_indices = @transform_0, window_bounds = array<i64: 32, 32>}, {pipeline_mode = #tpu.pipeline_mode<synchronous>, transform_indices = @transform_1, window_bounds = array<i64: 1, 32>}, {pipeline_mode = #tpu.pipeline_mode<synchronous>, transform_indices = @transform_2, window_bounds = array<i64: 1, 32>}, {pipeline_mode = #tpu.pipeline_mode<synchronous>, transform_indices = @transform_3, window_bounds = array<i64: 32, 32>}, {pipeline_mode = #tpu.pipeline_mode<synchronous>, transform_indices = @transform_4, window_bounds = array<i64: 1, 32>}, {transform_indices = @transform_5, window_bounds = array<i64: 32, 32>}]} {
    %c0 = arith.constant 0 : index
    %c0_0 = arith.constant 0 : index
    %0 = vector.load %arg1[%c0, %c0_0] : memref<32x32xf32, #tpu.memory_space<vmem>>, vector<32x32xf32>
    %c0_1 = arith.constant 0 : index
    %c0_2 = arith.constant 0 : index
    %1 = vector.load %arg2[%c0_1, %c0_2] : memref<1x32xf32, #tpu.memory_space<vmem>>, vector<1x32xf32>
    %2 = vector.broadcast %1 : vector<1x32xf32> to vector<32x32xf32>
    %3 = arith.mulf %0, %2 : vector<32x32xf32>
    %c0_3 = arith.constant 0 : index
    %c0_4 = arith.constant 0 : index
    %4 = vector.load %arg3[%c0_3, %c0_4] : memref<1x32xf32, #tpu.memory_space<vmem>>, vector<1x32xf32>
    %5 = vector.broadcast %4 : vector<1x32xf32> to vector<32x32xf32>
    %6 = arith.addf %3, %5 : vector<32x32xf32>
    %c0_5 = arith.constant 0 : index
    %c0_6 = arith.constant 0 : index
    %7 = vector.load %arg4[%c0_5, %c0_6] : memref<32x32xf32, #tpu.memory_space<vmem>>, vector<32x32xf32>
    %cst = arith.constant dense<0.000000e+00> : vector<32x32xf32>
    %8 = tpu.matmul %6, %7, %cst {dimension_numbers = #tpu.dot_dimension_numbers<[1], [0], [0], [1], [0, 0, 1, 1], [], []>} : vector<32x32xf32>, vector<32x32xf32>, vector<32x32xf32> -> vector<32x32xf32>
    %c0_7 = arith.constant 0 : index
    %c0_8 = arith.constant 0 : index
    %9 = vector.load %arg5[%c0_7, %c0_8] : memref<1x32xf32, #tpu.memory_space<vmem>>, vector<1x32xf32>
    %10 = vector.broadcast %9 : vector<1x32xf32> to vector<32x32xf32>
    %11 = arith.addf %8, %10 : vector<32x32xf32>
    %c0_9 = arith.constant 0 : index
    %c0_10 = arith.constant 0 : index
    %12 = vector.load %arg6[%c0_9, %c0_10] : memref<32x32xf32, #tpu.memory_space<vmem>>, vector<32x32xf32>
    tpu.vector_store %arg6[%c0_9, %c0_10], %11 {strides = array<i32>} : memref<32x32xf32, #tpu.memory_space<vmem>>, vector<32x32xf32>,
    return
  }
  func.func @transform_0(%arg0: i32) -> (i32, i32) {
    %c0_i32 = arith.constant 0 : i32
    %c0_i32_0 = arith.constant 0 : i32
    return %arg0, %c0_i32 : i32, i32
  }
  func.func @transform_1(%arg0: i32) -> (i32, i32) {
    %c0_i32 = arith.constant 0 : i32
    %c0_i32_0 = arith.constant 0 : i32
    %c0_i32_1 = arith.constant 0 : i32
    return %c0_i32, %c0_i32_0 : i32, i32
  }
  func.func @transform_2(%arg0: i32) -> (i32, i32) {
    %c0_i32 = arith.constant 0 : i32
    %c0_i32_0 = arith.constant 0 : i32
    %c0_i32_1 = arith.constant 0 : i32
    return %c0_i32, %c0_i32_0 : i32, i32
  }
  func.func @transform_3(%arg0: i32) -> (i32, i32) {
    %c0_i32 = arith.constant 0 : i32
    %c0_i32_0 = arith.constant 0 : i32
    %c0_i32_1 = arith.constant 0 : i32
    return %c0_i32, %c0_i32_0 : i32, i32
  }
  func.func @transform_4(%arg0: i32) -> (i32, i32) {
    %c0_i32 = arith.constant 0 : i32
    %c0_i32_0 = arith.constant 0 : i32
    %c0_i32_1 = arith.constant 0 : i32
    return %c0_i32, %c0_i32_0 : i32, i32
  }
  func.func @transform_5(%arg0: i32) -> (i32, i32) {
    %c0_i32 = arith.constant 0 : i32
    %c0_i32_0 = arith.constant 0 : i32
    return %arg0, %c0_i32 : i32, i32
  }
}

module attributes {stable_mosaic.version = 11 : i64} {
  func.func @_linear_act_kernel(%arg0: i32, %arg1: memref<32x128xf32, #tpu.memory_space<vmem>>, %arg2: memref<1x128xf32, #tpu.memory_space<vmem>>, %arg3: memref<1x128xf32, #tpu.memory_space<vmem>>, %arg4: memref<128x32xf32, #tpu.memory_space<vmem>>, %arg5: memref<1x32xf32, #tpu.memory_space<vmem>>, %arg6: memref<32x32xf32, #tpu.memory_space<vmem>>) attributes {dimension_semantics = [#tpu.dimension_semantics<parallel>], iteration_bounds = array<i64: 1>, scalar_prefetch = 0 : i64, scratch_operands = 0 : i64, tpu.core_type = #tpu.core_type<tc>, window_params = [{transform_indices = @transform_0, window_bounds = array<i64: 32, 128>}, {pipeline_mode = #tpu.pipeline_mode<synchronous>, transform_indices = @transform_1, window_bounds = array<i64: 1, 128>}, {pipeline_mode = #tpu.pipeline_mode<synchronous>, transform_indices = @transform_2, window_bounds = array<i64: 1, 128>}, {pipeline_mode = #tpu.pipeline_mode<synchronous>, transform_indices = @transform_3, window_bounds = array<i64: 128, 32>}, {pipeline_mode = #tpu.pipeline_mode<synchronous>, transform_indices = @transform_4, window_bounds = array<i64: 1, 32>}, {transform_indices = @transform_5, window_bounds = array<i64: 32, 32>}]} {
    %c0 = arith.constant 0 : index
    %c0_0 = arith.constant 0 : index
    %0 = vector.load %arg1[%c0, %c0_0] : memref<32x128xf32, #tpu.memory_space<vmem>>, vector<32x128xf32>
    %c0_1 = arith.constant 0 : index
    %c0_2 = arith.constant 0 : index
    %1 = vector.load %arg2[%c0_1, %c0_2] : memref<1x128xf32, #tpu.memory_space<vmem>>, vector<1x128xf32>
    %2 = vector.broadcast %1 : vector<1x128xf32> to vector<32x128xf32>
    %3 = arith.mulf %0, %2 : vector<32x128xf32>
    %c0_3 = arith.constant 0 : index
    %c0_4 = arith.constant 0 : index
    %4 = vector.load %arg3[%c0_3, %c0_4] : memref<1x128xf32, #tpu.memory_space<vmem>>, vector<1x128xf32>
    %5 = vector.broadcast %4 : vector<1x128xf32> to vector<32x128xf32>
    %6 = arith.addf %3, %5 : vector<32x128xf32>
    %c0_5 = arith.constant 0 : index
    %c0_6 = arith.constant 0 : index
    %7 = vector.load %arg4[%c0_5, %c0_6] : memref<128x32xf32, #tpu.memory_space<vmem>>, vector<128x32xf32>
    %cst = arith.constant dense<0.000000e+00> : vector<32x32xf32>
    %8 = tpu.matmul %6, %7, %cst {dimension_numbers = #tpu.dot_dimension_numbers<[1], [0], [0], [1], [0, 0, 1, 1], [], []>} : vector<32x128xf32>, vector<128x32xf32>, vector<32x32xf32> -> vector<32x32xf32>
    %c0_7 = arith.constant 0 : index
    %c0_8 = arith.constant 0 : index
    %9 = vector.load %arg5[%c0_7, %c0_8] : memref<1x32xf32, #tpu.memory_space<vmem>>, vector<1x32xf32>
    %10 = vector.broadcast %9 : vector<1x32xf32> to vector<32x32xf32>
    %11 = arith.addf %8, %10 : vector<32x32xf32>
    %cst_9 = arith.constant 5.000000e-01 : f32
    %12 = vector.broadcast %cst_9 : f32 to vector<32x32xf32>
    %13 = arith.mulf %12, %11 : vector<32x32xf32>
    %cst_10 = arith.constant 4.471500e-02 : f32
    %14 = vector.broadcast %cst_10 : f32 to vector<32x32xf32>
    %15 = arith.mulf %14, %11 : vector<32x32xf32>
    %16 = arith.mulf %15, %11 : vector<32x32xf32>
    %17 = arith.mulf %16, %11 : vector<32x32xf32>
    %18 = arith.addf %11, %17 : vector<32x32xf32>
    %cst_11 = arith.constant 0.797884583 : f32
    %19 = vector.broadcast %cst_11 : f32 to vector<32x32xf32>
    %20 = arith.mulf %19, %18 : vector<32x32xf32>
    %21 = math.tanh %20 : vector<32x32xf32>
    %cst_12 = arith.constant 1.000000e+00 : f32
    %22 = vector.broadcast %cst_12 : f32 to vector<32x32xf32>
    %23 = arith.addf %22, %21 : vector<32x32xf32>
    %24 = arith.mulf %13, %23 : vector<32x32xf32>
    %c0_13 = arith.constant 0 : index
    %c0_14 = arith.constant 0 : index
    %25 = vector.load %arg6[%c0_13, %c0_14] : memref<32x32xf32, #tpu.memory_space<vmem>>, vector<32x32xf32>
    tpu.vector_store %arg6[%c0_13, %c0_14], %24 {strides = array<i32>} : memref<32x32xf32, #tpu.memory_space<vmem>>, vector<32x32xf32>,
    return
  }
  func.func @transform_0(%arg0: i32) -> (i32, i32) {
    %c0_i32 = arith.constant 0 : i32
    %c0_i32_0 = arith.constant 0 : i32
    return %arg0, %c0_i32 : i32, i32
  }
  func.func @transform_1(%arg0: i32) -> (i32, i32) {
    %c0_i32 = arith.constant 0 : i32
    %c0_i32_0 = arith.constant 0 : i32
    %c0_i32_1 = arith.constant 0 : i32
    return %c0_i32, %c0_i32_0 : i32, i32
  }
  func.func @transform_2(%arg0: i32) -> (i32, i32) {
    %c0_i32 = arith.constant 0 : i32
    %c0_i32_0 = arith.constant 0 : i32
    %c0_i32_1 = arith.constant 0 : i32
    return %c0_i32, %c0_i32_0 : i32, i32
  }
  func.func @transform_3(%arg0: i32) -> (i32, i32) {
    %c0_i32 = arith.constant 0 : i32
    %c0_i32_0 = arith.constant 0 : i32
    %c0_i32_1 = arith.constant 0 : i32
    return %c0_i32, %c0_i32_0 : i32, i32
  }
  func.func @transform_4(%arg0: i32) -> (i32, i32) {
    %c0_i32 = arith.constant 0 : i32
    %c0_i32_0 = arith.constant 0 : i32
    %c0_i32_1 = arith.constant 0 : i32
    return %c0_i32, %c0_i32_0 : i32, i32
  }
  func.func @transform_5(%arg0: i32) -> (i32, i32) {
    %c0_i32 = arith.constant 0 : i32
    %c0_i32_0 = arith.constant 0 : i32
    return %arg0, %c0_i32 : i32, i32
  }
}

module attributes {stable_mosaic.version = 11 : i64} {
  func.func @_linear_act_kernel(%arg0: i32, %arg1: memref<32x32xf32, #tpu.memory_space<vmem>>, %arg2: memref<1x32xf32, #tpu.memory_space<vmem>>, %arg3: memref<1x32xf32, #tpu.memory_space<vmem>>, %arg4: memref<32x32xf32, #tpu.memory_space<vmem>>, %arg5: memref<1x32xf32, #tpu.memory_space<vmem>>, %arg6: memref<32x32xf32, #tpu.memory_space<vmem>>) attributes {dimension_semantics = [#tpu.dimension_semantics<parallel>], iteration_bounds = array<i64: 1>, scalar_prefetch = 0 : i64, scratch_operands = 0 : i64, tpu.core_type = #tpu.core_type<tc>, window_params = [{transform_indices = @transform_0, window_bounds = array<i64: 32, 32>}, {pipeline_mode = #tpu.pipeline_mode<synchronous>, transform_indices = @transform_1, window_bounds = array<i64: 1, 32>}, {pipeline_mode = #tpu.pipeline_mode<synchronous>, transform_indices = @transform_2, window_bounds = array<i64: 1, 32>}, {pipeline_mode = #tpu.pipeline_mode<synchronous>, transform_indices = @transform_3, window_bounds = array<i64: 32, 32>}, {pipeline_mode = #tpu.pipeline_mode<synchronous>, transform_indices = @transform_4, window_bounds = array<i64: 1, 32>}, {transform_indices = @transform_5, window_bounds = array<i64: 32, 32>}]} {
    %c0 = arith.constant 0 : index
    %c0_0 = arith.constant 0 : index
    %0 = vector.load %arg1[%c0, %c0_0] : memref<32x32xf32, #tpu.memory_space<vmem>>, vector<32x32xf32>
    %c0_1 = arith.constant 0 : index
    %c0_2 = arith.constant 0 : index
    %1 = vector.load %arg2[%c0_1, %c0_2] : memref<1x32xf32, #tpu.memory_space<vmem>>, vector<1x32xf32>
    %2 = vector.broadcast %1 : vector<1x32xf32> to vector<32x32xf32>
    %3 = arith.mulf %0, %2 : vector<32x32xf32>
    %c0_3 = arith.constant 0 : index
    %c0_4 = arith.constant 0 : index
    %4 = vector.load %arg3[%c0_3, %c0_4] : memref<1x32xf32, #tpu.memory_space<vmem>>, vector<1x32xf32>
    %5 = vector.broadcast %4 : vector<1x32xf32> to vector<32x32xf32>
    %6 = arith.addf %3, %5 : vector<32x32xf32>
    %c0_5 = arith.constant 0 : index
    %c0_6 = arith.constant 0 : index
    %7 = vector.load %arg4[%c0_5, %c0_6] : memref<32x32xf32, #tpu.memory_space<vmem>>, vector<32x32xf32>
    %cst = arith.constant dense<0.000000e+00> : vector<32x32xf32>
    %8 = tpu.matmul %6, %7, %cst {dimension_numbers = #tpu.dot_dimension_numbers<[1], [0], [0], [1], [0, 0, 1, 1], [], []>} : vector<32x32xf32>, vector<32x32xf32>, vector<32x32xf32> -> vector<32x32xf32>
    %c0_7 = arith.constant 0 : index
    %c0_8 = arith.constant 0 : index
    %9 = vector.load %arg5[%c0_7, %c0_8] : memref<1x32xf32, #tpu.memory_space<vmem>>, vector<1x32xf32>
    %10 = vector.broadcast %9 : vector<1x32xf32> to vector<32x32xf32>
    %11 = arith.addf %8, %10 : vector<32x32xf32>
    %cst_9 = arith.constant 5.000000e-01 : f32
    %12 = vector.broadcast %cst_9 : f32 to vector<32x32xf32>
    %13 = arith.mulf %12, %11 : vector<32x32xf32>
    %cst_10 = arith.constant 4.471500e-02 : f32
    %14 = vector.broadcast %cst_10 : f32 to vector<32x32xf32>
    %15 = arith.mulf %14, %11 : vector<32x32xf32>
    %16 = arith.mulf %15, %11 : vector<32x32xf32>
    %17 = arith.mulf %16, %11 : vector<32x32xf32>
    %18 = arith.addf %11, %17 : vector<32x32xf32>
    %cst_11 = arith.constant 0.797884583 : f32
    %19 = vector.broadcast %cst_11 : f32 to vector<32x32xf32>
    %20 = arith.mulf %19, %18 : vector<32x32xf32>
    %21 = math.tanh %20 : vector<32x32xf32>
    %cst_12 = arith.constant 1.000000e+00 : f32
    %22 = vector.broadcast %cst_12 : f32 to vector<32x32xf32>
    %23 = arith.addf %22, %21 : vector<32x32xf32>
    %24 = arith.mulf %13, %23 : vector<32x32xf32>
    %c0_13 = arith.constant 0 : index
    %c0_14 = arith.constant 0 : index
    %25 = vector.load %arg6[%c0_13, %c0_14] : memref<32x32xf32, #tpu.memory_space<vmem>>, vector<32x32xf32>
    tpu.vector_store %arg6[%c0_13, %c0_14], %24 {strides = array<i32>} : memref<32x32xf32, #tpu.memory_space<vmem>>, vector<32x32xf32>,
    return
  }
  func.func @transform_0(%arg0: i32) -> (i32, i32) {
    %c0_i32 = arith.constant 0 : i32
    %c0_i32_0 = arith.constant 0 : i32
    return %arg0, %c0_i32 : i32, i32
  }
  func.func @transform_1(%arg0: i32) -> (i32, i32) {
    %c0_i32 = arith.constant 0 : i32
    %c0_i32_0 = arith.constant 0 : i32
    %c0_i32_1 = arith.constant 0 : i32
    return %c0_i32, %c0_i32_0 : i32, i32
  }
  func.func @transform_2(%arg0: i32) -> (i32, i32) {
    %c0_i32 = arith.constant 0 : i32
    %c0_i32_0 = arith.constant 0 : i32
    %c0_i32_1 = arith.constant 0 : i32
    return %c0_i32, %c0_i32_0 : i32, i32
  }
  func.func @transform_3(%arg0: i32) -> (i32, i32) {
    %c0_i32 = arith.constant 0 : i32
    %c0_i32_0 = arith.constant 0 : i32
    %c0_i32_1 = arith.constant 0 : i32
    return %c0_i32, %c0_i32_0 : i32, i32
  }
  func.func @transform_4(%arg0: i32) -> (i32, i32) {
    %c0_i32 = arith.constant 0 : i32
    %c0_i32_0 = arith.constant 0 : i32
    %c0_i32_1 = arith.constant 0 : i32
    return %c0_i32, %c0_i32_0 : i32, i32
  }
  func.func @transform_5(%arg0: i32) -> (i32, i32) {
    %c0_i32 = arith.constant 0 : i32
    %c0_i32_0 = arith.constant 0 : i32
    return %arg0, %c0_i32 : i32, i32
  }
}

module attributes {stable_mosaic.version = 11 : i64} {
  func.func @_linear_act_kernel(%arg0: i32, %arg1: memref<32x48xf32, #tpu.memory_space<vmem>>, %arg2: memref<1x48xf32, #tpu.memory_space<vmem>>, %arg3: memref<1x48xf32, #tpu.memory_space<vmem>>, %arg4: memref<48x16xf32, #tpu.memory_space<vmem>>, %arg5: memref<1x16xf32, #tpu.memory_space<vmem>>, %arg6: memref<32x16xf32, #tpu.memory_space<vmem>>) attributes {dimension_semantics = [#tpu.dimension_semantics<parallel>], iteration_bounds = array<i64: 1>, scalar_prefetch = 0 : i64, scratch_operands = 0 : i64, tpu.core_type = #tpu.core_type<tc>, window_params = [{transform_indices = @transform_0, window_bounds = array<i64: 32, 48>}, {pipeline_mode = #tpu.pipeline_mode<synchronous>, transform_indices = @transform_1, window_bounds = array<i64: 1, 48>}, {pipeline_mode = #tpu.pipeline_mode<synchronous>, transform_indices = @transform_2, window_bounds = array<i64: 1, 48>}, {pipeline_mode = #tpu.pipeline_mode<synchronous>, transform_indices = @transform_3, window_bounds = array<i64: 48, 16>}, {pipeline_mode = #tpu.pipeline_mode<synchronous>, transform_indices = @transform_4, window_bounds = array<i64: 1, 16>}, {transform_indices = @transform_5, window_bounds = array<i64: 32, 16>}]} {
    %c0 = arith.constant 0 : index
    %c0_0 = arith.constant 0 : index
    %0 = vector.load %arg1[%c0, %c0_0] : memref<32x48xf32, #tpu.memory_space<vmem>>, vector<32x48xf32>
    %c0_1 = arith.constant 0 : index
    %c0_2 = arith.constant 0 : index
    %1 = vector.load %arg2[%c0_1, %c0_2] : memref<1x48xf32, #tpu.memory_space<vmem>>, vector<1x48xf32>
    %2 = vector.broadcast %1 : vector<1x48xf32> to vector<32x48xf32>
    %3 = arith.mulf %0, %2 : vector<32x48xf32>
    %c0_3 = arith.constant 0 : index
    %c0_4 = arith.constant 0 : index
    %4 = vector.load %arg3[%c0_3, %c0_4] : memref<1x48xf32, #tpu.memory_space<vmem>>, vector<1x48xf32>
    %5 = vector.broadcast %4 : vector<1x48xf32> to vector<32x48xf32>
    %6 = arith.addf %3, %5 : vector<32x48xf32>
    %c0_5 = arith.constant 0 : index
    %c0_6 = arith.constant 0 : index
    %7 = vector.load %arg4[%c0_5, %c0_6] : memref<48x16xf32, #tpu.memory_space<vmem>>, vector<48x16xf32>
    %cst = arith.constant dense<0.000000e+00> : vector<32x16xf32>
    %8 = tpu.matmul %6, %7, %cst {dimension_numbers = #tpu.dot_dimension_numbers<[1], [0], [0], [1], [0, 0, 1, 1], [], []>} : vector<32x48xf32>, vector<48x16xf32>, vector<32x16xf32> -> vector<32x16xf32>
    %c0_7 = arith.constant 0 : index
    %c0_8 = arith.constant 0 : index
    %9 = vector.load %arg5[%c0_7, %c0_8] : memref<1x16xf32, #tpu.memory_space<vmem>>, vector<1x16xf32>
    %10 = vector.broadcast %9 : vector<1x16xf32> to vector<32x16xf32>
    %11 = arith.addf %8, %10 : vector<32x16xf32>
    %cst_9 = arith.constant 5.000000e-01 : f32
    %12 = vector.broadcast %cst_9 : f32 to vector<32x16xf32>
    %13 = arith.mulf %12, %11 : vector<32x16xf32>
    %cst_10 = arith.constant 4.471500e-02 : f32
    %14 = vector.broadcast %cst_10 : f32 to vector<32x16xf32>
    %15 = arith.mulf %14, %11 : vector<32x16xf32>
    %16 = arith.mulf %15, %11 : vector<32x16xf32>
    %17 = arith.mulf %16, %11 : vector<32x16xf32>
    %18 = arith.addf %11, %17 : vector<32x16xf32>
    %cst_11 = arith.constant 0.797884583 : f32
    %19 = vector.broadcast %cst_11 : f32 to vector<32x16xf32>
    %20 = arith.mulf %19, %18 : vector<32x16xf32>
    %21 = math.tanh %20 : vector<32x16xf32>
    %cst_12 = arith.constant 1.000000e+00 : f32
    %22 = vector.broadcast %cst_12 : f32 to vector<32x16xf32>
    %23 = arith.addf %22, %21 : vector<32x16xf32>
    %24 = arith.mulf %13, %23 : vector<32x16xf32>
    %c0_13 = arith.constant 0 : index
    %c0_14 = arith.constant 0 : index
    %25 = vector.load %arg6[%c0_13, %c0_14] : memref<32x16xf32, #tpu.memory_space<vmem>>, vector<32x16xf32>
    tpu.vector_store %arg6[%c0_13, %c0_14], %24 {strides = array<i32>} : memref<32x16xf32, #tpu.memory_space<vmem>>, vector<32x16xf32>,
    return
  }
  func.func @transform_0(%arg0: i32) -> (i32, i32) {
    %c0_i32 = arith.constant 0 : i32
    %c0_i32_0 = arith.constant 0 : i32
    return %arg0, %c0_i32 : i32, i32
  }
  func.func @transform_1(%arg0: i32) -> (i32, i32) {
    %c0_i32 = arith.constant 0 : i32
    %c0_i32_0 = arith.constant 0 : i32
    %c0_i32_1 = arith.constant 0 : i32
    return %c0_i32, %c0_i32_0 : i32, i32
  }
  func.func @transform_2(%arg0: i32) -> (i32, i32) {
    %c0_i32 = arith.constant 0 : i32
    %c0_i32_0 = arith.constant 0 : i32
    %c0_i32_1 = arith.constant 0 : i32
    return %c0_i32, %c0_i32_0 : i32, i32
  }
  func.func @transform_3(%arg0: i32) -> (i32, i32) {
    %c0_i32 = arith.constant 0 : i32
    %c0_i32_0 = arith.constant 0 : i32
    %c0_i32_1 = arith.constant 0 : i32
    return %c0_i32, %c0_i32_0 : i32, i32
  }
  func.func @transform_4(%arg0: i32) -> (i32, i32) {
    %c0_i32 = arith.constant 0 : i32
    %c0_i32_0 = arith.constant 0 : i32
    %c0_i32_1 = arith.constant 0 : i32
    return %c0_i32, %c0_i32_0 : i32, i32
  }
  func.func @transform_5(%arg0: i32) -> (i32, i32) {
    %c0_i32 = arith.constant 0 : i32
    %c0_i32_0 = arith.constant 0 : i32
    return %arg0, %c0_i32 : i32, i32
  }
}

module attributes {stable_mosaic.version = 11 : i64} {
  func.func @_linear_act_kernel(%arg0: i32, %arg1: memref<32x16xf32, #tpu.memory_space<vmem>>, %arg2: memref<1x16xf32, #tpu.memory_space<vmem>>, %arg3: memref<1x16xf32, #tpu.memory_space<vmem>>, %arg4: memref<16x16xf32, #tpu.memory_space<vmem>>, %arg5: memref<1x16xf32, #tpu.memory_space<vmem>>, %arg6: memref<32x16xf32, #tpu.memory_space<vmem>>) attributes {dimension_semantics = [#tpu.dimension_semantics<parallel>], iteration_bounds = array<i64: 1>, scalar_prefetch = 0 : i64, scratch_operands = 0 : i64, tpu.core_type = #tpu.core_type<tc>, window_params = [{transform_indices = @transform_0, window_bounds = array<i64: 32, 16>}, {pipeline_mode = #tpu.pipeline_mode<synchronous>, transform_indices = @transform_1, window_bounds = array<i64: 1, 16>}, {pipeline_mode = #tpu.pipeline_mode<synchronous>, transform_indices = @transform_2, window_bounds = array<i64: 1, 16>}, {pipeline_mode = #tpu.pipeline_mode<synchronous>, transform_indices = @transform_3, window_bounds = array<i64: 16, 16>}, {pipeline_mode = #tpu.pipeline_mode<synchronous>, transform_indices = @transform_4, window_bounds = array<i64: 1, 16>}, {transform_indices = @transform_5, window_bounds = array<i64: 32, 16>}]} {
    %c0 = arith.constant 0 : index
    %c0_0 = arith.constant 0 : index
    %0 = vector.load %arg1[%c0, %c0_0] : memref<32x16xf32, #tpu.memory_space<vmem>>, vector<32x16xf32>
    %c0_1 = arith.constant 0 : index
    %c0_2 = arith.constant 0 : index
    %1 = vector.load %arg2[%c0_1, %c0_2] : memref<1x16xf32, #tpu.memory_space<vmem>>, vector<1x16xf32>
    %2 = vector.broadcast %1 : vector<1x16xf32> to vector<32x16xf32>
    %3 = arith.mulf %0, %2 : vector<32x16xf32>
    %c0_3 = arith.constant 0 : index
    %c0_4 = arith.constant 0 : index
    %4 = vector.load %arg3[%c0_3, %c0_4] : memref<1x16xf32, #tpu.memory_space<vmem>>, vector<1x16xf32>
    %5 = vector.broadcast %4 : vector<1x16xf32> to vector<32x16xf32>
    %6 = arith.addf %3, %5 : vector<32x16xf32>
    %c0_5 = arith.constant 0 : index
    %c0_6 = arith.constant 0 : index
    %7 = vector.load %arg4[%c0_5, %c0_6] : memref<16x16xf32, #tpu.memory_space<vmem>>, vector<16x16xf32>
    %cst = arith.constant dense<0.000000e+00> : vector<32x16xf32>
    %8 = tpu.matmul %6, %7, %cst {dimension_numbers = #tpu.dot_dimension_numbers<[1], [0], [0], [1], [0, 0, 1, 1], [], []>} : vector<32x16xf32>, vector<16x16xf32>, vector<32x16xf32> -> vector<32x16xf32>
    %c0_7 = arith.constant 0 : index
    %c0_8 = arith.constant 0 : index
    %9 = vector.load %arg5[%c0_7, %c0_8] : memref<1x16xf32, #tpu.memory_space<vmem>>, vector<1x16xf32>
    %10 = vector.broadcast %9 : vector<1x16xf32> to vector<32x16xf32>
    %11 = arith.addf %8, %10 : vector<32x16xf32>
    %c0_9 = arith.constant 0 : index
    %c0_10 = arith.constant 0 : index
    %12 = vector.load %arg6[%c0_9, %c0_10] : memref<32x16xf32, #tpu.memory_space<vmem>>, vector<32x16xf32>
    tpu.vector_store %arg6[%c0_9, %c0_10], %11 {strides = array<i32>} : memref<32x16xf32, #tpu.memory_space<vmem>>, vector<32x16xf32>,
    return
  }
  func.func @transform_0(%arg0: i32) -> (i32, i32) {
    %c0_i32 = arith.constant 0 : i32
    %c0_i32_0 = arith.constant 0 : i32
    return %arg0, %c0_i32 : i32, i32
  }
  func.func @transform_1(%arg0: i32) -> (i32, i32) {
    %c0_i32 = arith.constant 0 : i32
    %c0_i32_0 = arith.constant 0 : i32
    %c0_i32_1 = arith.constant 0 : i32
    return %c0_i32, %c0_i32_0 : i32, i32
  }
  func.func @transform_2(%arg0: i32) -> (i32, i32) {
    %c0_i32 = arith.constant 0 : i32
    %c0_i32_0 = arith.constant 0 : i32
    %c0_i32_1 = arith.constant 0 : i32
    return %c0_i32, %c0_i32_0 : i32, i32
  }
  func.func @transform_3(%arg0: i32) -> (i32, i32) {
    %c0_i32 = arith.constant 0 : i32
    %c0_i32_0 = arith.constant 0 : i32
    %c0_i32_1 = arith.constant 0 : i32
    return %c0_i32, %c0_i32_0 : i32, i32
  }
  func.func @transform_4(%arg0: i32) -> (i32, i32) {
    %c0_i32 = arith.constant 0 : i32
    %c0_i32_0 = arith.constant 0 : i32
    %c0_i32_1 = arith.constant 0 : i32
    return %c0_i32, %c0_i32_0 : i32, i32
  }
  func.func @transform_5(%arg0: i32) -> (i32, i32) {
    %c0_i32 = arith.constant 0 : i32
    %c0_i32_0 = arith.constant 0 : i32
    return %arg0, %c0_i32 : i32, i32
  }
}

module attributes {stable_mosaic.version = 11 : i64} {
  func.func @_bn_stats_kernel(%arg0: i32, %arg1: memref<64x40xf32, #tpu.memory_space<vmem>>, %arg2: memref<2x40xf32, #tpu.memory_space<vmem>>, %arg3: memref<1x40xf32, #tpu.memory_space<vmem>>, %arg4: memref<1x40xf32, #tpu.memory_space<vmem>>) attributes {dimension_semantics = [#tpu.dimension_semantics<arbitrary>], iteration_bounds = array<i64: 1>, scalar_prefetch = 0 : i64, scratch_operands = 2 : i64, tpu.core_type = #tpu.core_type<tc>, window_params = [{transform_indices = @transform_0, window_bounds = array<i64: 64, 40>}, {pipeline_mode = #tpu.pipeline_mode<synchronous>, transform_indices = @transform_1, window_bounds = array<i64: 2, 40>}]} {
    %c0_i32 = arith.constant 0 : i32
    %0 = arith.cmpi eq, %arg0, %c0_i32 : i32
    %1 = arith.extui %0 : i1 to i32
    %c0_i32_0 = arith.constant 0 : i32
    %2 = arith.cmpi ne, %1, %c0_i32_0 : i32
    scf.if %2 {
      %cst_15 = arith.constant 0.000000e+00 : f32
      %26 = vector.broadcast %cst_15 : f32 to vector<1x40xf32>
      %c0_16 = arith.constant 0 : index
      %c0_17 = arith.constant 0 : index
      %27 = vector.load %arg3[%c0_16, %c0_17] : memref<1x40xf32, #tpu.memory_space<vmem>>, vector<1x40xf32>
      tpu.vector_store %arg3[%c0_16, %c0_17], %26 {strides = array<i32>} : memref<1x40xf32, #tpu.memory_space<vmem>>, vector<1x40xf32>,
      %cst_18 = arith.constant 0.000000e+00 : f32
      %28 = vector.broadcast %cst_18 : f32 to vector<1x40xf32>
      %c0_19 = arith.constant 0 : index
      %c0_20 = arith.constant 0 : index
      %29 = vector.load %arg4[%c0_19, %c0_20] : memref<1x40xf32, #tpu.memory_space<vmem>>, vector<1x40xf32>
      tpu.vector_store %arg4[%c0_19, %c0_20], %28 {strides = array<i32>} : memref<1x40xf32, #tpu.memory_space<vmem>>, vector<1x40xf32>,
    } else {
    }
    %c0 = arith.constant 0 : index
    %c0_1 = arith.constant 0 : index
    %3 = vector.load %arg1[%c0, %c0_1] : memref<64x40xf32, #tpu.memory_space<vmem>>, vector<64x40xf32>
    %c64_i32 = arith.constant 64 : i32
    %4 = arith.muli %arg0, %c64_i32 : i32
    %5 = tpu.iota {dimensions = array<i32: 0>} : vector<64x40xi32>
    %6 = vector.broadcast %4 : i32 to vector<64x40xi32>
    %7 = arith.addi %6, %5 : vector<64x40xi32>
    %c64_i32_2 = arith.constant 64 : i32
    %8 = vector.broadcast %c64_i32_2 : i32 to vector<64x40xi32>
    %9 = arith.cmpi slt, %7, %8 : vector<64x40xi32>
    %cst = arith.constant 0.000000e+00 : f32
    %10 = vector.broadcast %cst : f32 to vector<64x40xf32>
    %11 = arith.select %9, %3, %10 : vector<64x40xi1>, vector<64x40xf32>
    %c0_3 = arith.constant 0 : index
    %c0_4 = arith.constant 0 : index
    %12 = vector.load %arg3[%c0_3, %c0_4] : memref<1x40xf32, #tpu.memory_space<vmem>>, vector<1x40xf32>
    %cst_5 = arith.constant dense<0.000000e+00> : vector<40xf32>
    %13 = vector.multi_reduction <add>, %11, %cst_5 [0] : vector<64x40xf32> to vector<40xf32>
    %14 = vector.shape_cast %13 : vector<40xf32> to vector<1x40xf32>
    %15 = arith.addf %12, %14 : vector<1x40xf32>
    %c0_6 = arith.constant 0 : index
    %c0_7 = arith.constant 0 : index
    %16 = vector.load %arg3[%c0_6, %c0_7] : memref<1x40xf32, #tpu.memory_space<vmem>>, vector<1x40xf32>
    tpu.vector_store %arg3[%c0_6, %c0_7], %15 {strides = array<i32>} : memref<1x40xf32, #tpu.memory_space<vmem>>, vector<1x40xf32>,
    %c0_8 = arith.constant 0 : index
    %c0_9 = arith.constant 0 : index
    %17 = vector.load %arg4[%c0_8, %c0_9] : memref<1x40xf32, #tpu.memory_space<vmem>>, vector<1x40xf32>
    %18 = arith.mulf %11, %11 : vector<64x40xf32>
    %cst_10 = arith.constant dense<0.000000e+00> : vector<40xf32>
    %19 = vector.multi_reduction <add>, %18, %cst_10 [0] : vector<64x40xf32> to vector<40xf32>
    %20 = vector.shape_cast %19 : vector<40xf32> to vector<1x40xf32>
    %21 = arith.addf %17, %20 : vector<1x40xf32>
    %c0_11 = arith.constant 0 : index
    %c0_12 = arith.constant 0 : index
    %22 = vector.load %arg4[%c0_11, %c0_12] : memref<1x40xf32, #tpu.memory_space<vmem>>, vector<1x40xf32>
    tpu.vector_store %arg4[%c0_11, %c0_12], %21 {strides = array<i32>} : memref<1x40xf32, #tpu.memory_space<vmem>>, vector<1x40xf32>,
    %c0_i32_13 = arith.constant 0 : i32
    %23 = arith.cmpi eq, %arg0, %c0_i32_13 : i32
    %24 = arith.extui %23 : i1 to i32
    %c0_i32_14 = arith.constant 0 : i32
    %25 = arith.cmpi ne, %24, %c0_i32_14 : i32
    scf.if %25 {
      %c0_15 = arith.constant 0 : index
      %c0_16 = arith.constant 0 : index
      %26 = vector.load %arg3[%c0_15, %c0_16] : memref<1x40xf32, #tpu.memory_space<vmem>>, vector<1x40xf32>
      %cst_17 = arith.constant 1.562500e-02 : f32
      %27 = vector.broadcast %cst_17 : f32 to vector<1x40xf32>
      %28 = arith.mulf %26, %27 : vector<1x40xf32>
      %c0_18 = arith.constant 0 : index
      %c0_19 = arith.constant 0 : index
      %29 = vector.load %arg4[%c0_18, %c0_19] : memref<1x40xf32, #tpu.memory_space<vmem>>, vector<1x40xf32>
      %cst_20 = arith.constant 1.562500e-02 : f32
      %30 = vector.broadcast %cst_20 : f32 to vector<1x40xf32>
      %31 = arith.mulf %29, %30 : vector<1x40xf32>
      %32 = arith.mulf %28, %28 : vector<1x40xf32>
      %33 = arith.subf %31, %32 : vector<1x40xf32>
      %c0_21 = arith.constant 0 : index
      %c0_22 = arith.constant 0 : index
      %34 = vector.load %arg2[%c0_21, %c0_22] : memref<2x40xf32, #tpu.memory_space<vmem>>, vector<1x40xf32>
      tpu.vector_store %arg2[%c0_21, %c0_22], %28 {strides = array<i32>} : memref<2x40xf32, #tpu.memory_space<vmem>>, vector<1x40xf32>,
      %cst_23 = arith.constant 9.99999974E-6 : f32
      %35 = vector.broadcast %cst_23 : f32 to vector<1x40xf32>
      %36 = arith.addf %33, %35 : vector<1x40xf32>
      %37 = math.rsqrt %36 : vector<1x40xf32>
      %c1 = arith.constant 1 : index
      %c0_24 = arith.constant 0 : index
      %38 = vector.load %arg2[%c1, %c0_24] : memref<2x40xf32, #tpu.memory_space<vmem>>, vector<1x40xf32>
      tpu.vector_store %arg2[%c1, %c0_24], %37 {strides = array<i32>} : memref<2x40xf32, #tpu.memory_space<vmem>>, vector<1x40xf32>,
    } else {
    }
    return
  }
  func.func @transform_0(%arg0: i32) -> (i32, i32) {
    %c0_i32 = arith.constant 0 : i32
    %c0_i32_0 = arith.constant 0 : i32
    return %arg0, %c0_i32 : i32, i32
  }
  func.func @transform_1(%arg0: i32) -> (i32, i32) {
    %c0_i32 = arith.constant 0 : i32
    %c0_i32_0 = arith.constant 0 : i32
    %c0_i32_1 = arith.constant 0 : i32
    return %c0_i32, %c0_i32_0 : i32, i32
  }
}

module attributes {stable_mosaic.version = 11 : i64} {
  func.func @_linear_act_kernel(%arg0: i32, %arg1: memref<64x32xf32, #tpu.memory_space<vmem>>, %arg2: memref<1x32xf32, #tpu.memory_space<vmem>>, %arg3: memref<1x32xf32, #tpu.memory_space<vmem>>, %arg4: memref<32x16xf32, #tpu.memory_space<vmem>>, %arg5: memref<1x16xf32, #tpu.memory_space<vmem>>, %arg6: memref<64x16xf32, #tpu.memory_space<vmem>>) attributes {dimension_semantics = [#tpu.dimension_semantics<parallel>], iteration_bounds = array<i64: 1>, scalar_prefetch = 0 : i64, scratch_operands = 0 : i64, tpu.core_type = #tpu.core_type<tc>, window_params = [{transform_indices = @transform_0, window_bounds = array<i64: 64, 32>}, {pipeline_mode = #tpu.pipeline_mode<synchronous>, transform_indices = @transform_1, window_bounds = array<i64: 1, 32>}, {pipeline_mode = #tpu.pipeline_mode<synchronous>, transform_indices = @transform_2, window_bounds = array<i64: 1, 32>}, {pipeline_mode = #tpu.pipeline_mode<synchronous>, transform_indices = @transform_3, window_bounds = array<i64: 32, 16>}, {pipeline_mode = #tpu.pipeline_mode<synchronous>, transform_indices = @transform_4, window_bounds = array<i64: 1, 16>}, {transform_indices = @transform_5, window_bounds = array<i64: 64, 16>}]} {
    %c0 = arith.constant 0 : index
    %c0_0 = arith.constant 0 : index
    %0 = vector.load %arg1[%c0, %c0_0] : memref<64x32xf32, #tpu.memory_space<vmem>>, vector<64x32xf32>
    %c0_1 = arith.constant 0 : index
    %c0_2 = arith.constant 0 : index
    %1 = vector.load %arg2[%c0_1, %c0_2] : memref<1x32xf32, #tpu.memory_space<vmem>>, vector<1x32xf32>
    %2 = vector.broadcast %1 : vector<1x32xf32> to vector<64x32xf32>
    %3 = arith.mulf %0, %2 : vector<64x32xf32>
    %c0_3 = arith.constant 0 : index
    %c0_4 = arith.constant 0 : index
    %4 = vector.load %arg3[%c0_3, %c0_4] : memref<1x32xf32, #tpu.memory_space<vmem>>, vector<1x32xf32>
    %5 = vector.broadcast %4 : vector<1x32xf32> to vector<64x32xf32>
    %6 = arith.addf %3, %5 : vector<64x32xf32>
    %c0_5 = arith.constant 0 : index
    %c0_6 = arith.constant 0 : index
    %7 = vector.load %arg4[%c0_5, %c0_6] : memref<32x16xf32, #tpu.memory_space<vmem>>, vector<32x16xf32>
    %cst = arith.constant dense<0.000000e+00> : vector<64x16xf32>
    %8 = tpu.matmul %6, %7, %cst {dimension_numbers = #tpu.dot_dimension_numbers<[1], [0], [0], [1], [0, 0, 1, 1], [], []>} : vector<64x32xf32>, vector<32x16xf32>, vector<64x16xf32> -> vector<64x16xf32>
    %c0_7 = arith.constant 0 : index
    %c0_8 = arith.constant 0 : index
    %9 = vector.load %arg5[%c0_7, %c0_8] : memref<1x16xf32, #tpu.memory_space<vmem>>, vector<1x16xf32>
    %10 = vector.broadcast %9 : vector<1x16xf32> to vector<64x16xf32>
    %11 = arith.addf %8, %10 : vector<64x16xf32>
    %c0_9 = arith.constant 0 : index
    %c0_10 = arith.constant 0 : index
    %12 = vector.load %arg6[%c0_9, %c0_10] : memref<64x16xf32, #tpu.memory_space<vmem>>, vector<64x16xf32>
    tpu.vector_store %arg6[%c0_9, %c0_10], %11 {strides = array<i32>} : memref<64x16xf32, #tpu.memory_space<vmem>>, vector<64x16xf32>,
    return
  }
  func.func @transform_0(%arg0: i32) -> (i32, i32) {
    %c0_i32 = arith.constant 0 : i32
    %c0_i32_0 = arith.constant 0 : i32
    return %arg0, %c0_i32 : i32, i32
  }
  func.func @transform_1(%arg0: i32) -> (i32, i32) {
    %c0_i32 = arith.constant 0 : i32
    %c0_i32_0 = arith.constant 0 : i32
    %c0_i32_1 = arith.constant 0 : i32
    return %c0_i32, %c0_i32_0 : i32, i32
  }
  func.func @transform_2(%arg0: i32) -> (i32, i32) {
    %c0_i32 = arith.constant 0 : i32
    %c0_i32_0 = arith.constant 0 : i32
    %c0_i32_1 = arith.constant 0 : i32
    return %c0_i32, %c0_i32_0 : i32, i32
  }
  func.func @transform_3(%arg0: i32) -> (i32, i32) {
    %c0_i32 = arith.constant 0 : i32
    %c0_i32_0 = arith.constant 0 : i32
    %c0_i32_1 = arith.constant 0 : i32
    return %c0_i32, %c0_i32_0 : i32, i32
  }
  func.func @transform_4(%arg0: i32) -> (i32, i32) {
    %c0_i32 = arith.constant 0 : i32
    %c0_i32_0 = arith.constant 0 : i32
    %c0_i32_1 = arith.constant 0 : i32
    return %c0_i32, %c0_i32_0 : i32, i32
  }
  func.func @transform_5(%arg0: i32) -> (i32, i32) {
    %c0_i32 = arith.constant 0 : i32
    %c0_i32_0 = arith.constant 0 : i32
    return %arg0, %c0_i32 : i32, i32
  }
}

module attributes {stable_mosaic.version = 11 : i64} {
  func.func @_linear_act_kernel(%arg0: i32, %arg1: memref<64x40xf32, #tpu.memory_space<vmem>>, %arg2: memref<1x40xf32, #tpu.memory_space<vmem>>, %arg3: memref<1x40xf32, #tpu.memory_space<vmem>>, %arg4: memref<40x32xf32, #tpu.memory_space<vmem>>, %arg5: memref<1x32xf32, #tpu.memory_space<vmem>>, %arg6: memref<64x32xf32, #tpu.memory_space<vmem>>) attributes {dimension_semantics = [#tpu.dimension_semantics<parallel>], iteration_bounds = array<i64: 1>, scalar_prefetch = 0 : i64, scratch_operands = 0 : i64, tpu.core_type = #tpu.core_type<tc>, window_params = [{transform_indices = @transform_0, window_bounds = array<i64: 64, 40>}, {pipeline_mode = #tpu.pipeline_mode<synchronous>, transform_indices = @transform_1, window_bounds = array<i64: 1, 40>}, {pipeline_mode = #tpu.pipeline_mode<synchronous>, transform_indices = @transform_2, window_bounds = array<i64: 1, 40>}, {pipeline_mode = #tpu.pipeline_mode<synchronous>, transform_indices = @transform_3, window_bounds = array<i64: 40, 32>}, {pipeline_mode = #tpu.pipeline_mode<synchronous>, transform_indices = @transform_4, window_bounds = array<i64: 1, 32>}, {transform_indices = @transform_5, window_bounds = array<i64: 64, 32>}]} {
    %c0 = arith.constant 0 : index
    %c0_0 = arith.constant 0 : index
    %0 = vector.load %arg1[%c0, %c0_0] : memref<64x40xf32, #tpu.memory_space<vmem>>, vector<64x40xf32>
    %c0_1 = arith.constant 0 : index
    %c0_2 = arith.constant 0 : index
    %1 = vector.load %arg2[%c0_1, %c0_2] : memref<1x40xf32, #tpu.memory_space<vmem>>, vector<1x40xf32>
    %2 = vector.broadcast %1 : vector<1x40xf32> to vector<64x40xf32>
    %3 = arith.mulf %0, %2 : vector<64x40xf32>
    %c0_3 = arith.constant 0 : index
    %c0_4 = arith.constant 0 : index
    %4 = vector.load %arg3[%c0_3, %c0_4] : memref<1x40xf32, #tpu.memory_space<vmem>>, vector<1x40xf32>
    %5 = vector.broadcast %4 : vector<1x40xf32> to vector<64x40xf32>
    %6 = arith.addf %3, %5 : vector<64x40xf32>
    %c0_5 = arith.constant 0 : index
    %c0_6 = arith.constant 0 : index
    %7 = vector.load %arg4[%c0_5, %c0_6] : memref<40x32xf32, #tpu.memory_space<vmem>>, vector<40x32xf32>
    %cst = arith.constant dense<0.000000e+00> : vector<64x32xf32>
    %8 = tpu.matmul %6, %7, %cst {dimension_numbers = #tpu.dot_dimension_numbers<[1], [0], [0], [1], [0, 0, 1, 1], [], []>} : vector<64x40xf32>, vector<40x32xf32>, vector<64x32xf32> -> vector<64x32xf32>
    %c0_7 = arith.constant 0 : index
    %c0_8 = arith.constant 0 : index
    %9 = vector.load %arg5[%c0_7, %c0_8] : memref<1x32xf32, #tpu.memory_space<vmem>>, vector<1x32xf32>
    %10 = vector.broadcast %9 : vector<1x32xf32> to vector<64x32xf32>
    %11 = arith.addf %8, %10 : vector<64x32xf32>
    %cst_9 = arith.constant 5.000000e-01 : f32
    %12 = vector.broadcast %cst_9 : f32 to vector<64x32xf32>
    %13 = arith.mulf %12, %11 : vector<64x32xf32>
    %cst_10 = arith.constant 4.471500e-02 : f32
    %14 = vector.broadcast %cst_10 : f32 to vector<64x32xf32>
    %15 = arith.mulf %14, %11 : vector<64x32xf32>
    %16 = arith.mulf %15, %11 : vector<64x32xf32>
    %17 = arith.mulf %16, %11 : vector<64x32xf32>
    %18 = arith.addf %11, %17 : vector<64x32xf32>
    %cst_11 = arith.constant 0.797884583 : f32
    %19 = vector.broadcast %cst_11 : f32 to vector<64x32xf32>
    %20 = arith.mulf %19, %18 : vector<64x32xf32>
    %21 = math.tanh %20 : vector<64x32xf32>
    %cst_12 = arith.constant 1.000000e+00 : f32
    %22 = vector.broadcast %cst_12 : f32 to vector<64x32xf32>
    %23 = arith.addf %22, %21 : vector<64x32xf32>
    %24 = arith.mulf %13, %23 : vector<64x32xf32>
    %c0_13 = arith.constant 0 : index
    %c0_14 = arith.constant 0 : index
    %25 = vector.load %arg6[%c0_13, %c0_14] : memref<64x32xf32, #tpu.memory_space<vmem>>, vector<64x32xf32>
    tpu.vector_store %arg6[%c0_13, %c0_14], %24 {strides = array<i32>} : memref<64x32xf32, #tpu.memory_space<vmem>>, vector<64x32xf32>,
    return
  }
  func.func @transform_0(%arg0: i32) -> (i32, i32) {
    %c0_i32 = arith.constant 0 : i32
    %c0_i32_0 = arith.constant 0 : i32
    return %arg0, %c0_i32 : i32, i32
  }
  func.func @transform_1(%arg0: i32) -> (i32, i32) {
    %c0_i32 = arith.constant 0 : i32
    %c0_i32_0 = arith.constant 0 : i32
    %c0_i32_1 = arith.constant 0 : i32
    return %c0_i32, %c0_i32_0 : i32, i32
  }
  func.func @transform_2(%arg0: i32) -> (i32, i32) {
    %c0_i32 = arith.constant 0 : i32
    %c0_i32_0 = arith.constant 0 : i32
    %c0_i32_1 = arith.constant 0 : i32
    return %c0_i32, %c0_i32_0 : i32, i32
  }
  func.func @transform_3(%arg0: i32) -> (i32, i32) {
    %c0_i32 = arith.constant 0 : i32
    %c0_i32_0 = arith.constant 0 : i32
    %c0_i32_1 = arith.constant 0 : i32
    return %c0_i32, %c0_i32_0 : i32, i32
  }
  func.func @transform_4(%arg0: i32) -> (i32, i32) {
    %c0_i32 = arith.constant 0 : i32
    %c0_i32_0 = arith.constant 0 : i32
    %c0_i32_1 = arith.constant 0 : i32
    return %c0_i32, %c0_i32_0 : i32, i32
  }
  func.func @transform_5(%arg0: i32) -> (i32, i32) {
    %c0_i32 = arith.constant 0 : i32
    %c0_i32_0 = arith.constant 0 : i32
    return %arg0, %c0_i32 : i32, i32
  }
}

module attributes {stable_mosaic.version = 11 : i64} {
  func.func @_linear_act_kernel(%arg0: i32, %arg1: memref<64x56xf32, #tpu.memory_space<vmem>>, %arg2: memref<1x56xf32, #tpu.memory_space<vmem>>, %arg3: memref<1x56xf32, #tpu.memory_space<vmem>>, %arg4: memref<56x64xf32, #tpu.memory_space<vmem>>, %arg5: memref<1x64xf32, #tpu.memory_space<vmem>>, %arg6: memref<64x64xf32, #tpu.memory_space<vmem>>) attributes {dimension_semantics = [#tpu.dimension_semantics<parallel>], iteration_bounds = array<i64: 1>, scalar_prefetch = 0 : i64, scratch_operands = 0 : i64, tpu.core_type = #tpu.core_type<tc>, window_params = [{transform_indices = @transform_0, window_bounds = array<i64: 64, 56>}, {pipeline_mode = #tpu.pipeline_mode<synchronous>, transform_indices = @transform_1, window_bounds = array<i64: 1, 56>}, {pipeline_mode = #tpu.pipeline_mode<synchronous>, transform_indices = @transform_2, window_bounds = array<i64: 1, 56>}, {pipeline_mode = #tpu.pipeline_mode<synchronous>, transform_indices = @transform_3, window_bounds = array<i64: 56, 64>}, {pipeline_mode = #tpu.pipeline_mode<synchronous>, transform_indices = @transform_4, window_bounds = array<i64: 1, 64>}, {transform_indices = @transform_5, window_bounds = array<i64: 64, 64>}]} {
    %c0 = arith.constant 0 : index
    %c0_0 = arith.constant 0 : index
    %0 = vector.load %arg1[%c0, %c0_0] : memref<64x56xf32, #tpu.memory_space<vmem>>, vector<64x56xf32>
    %c0_1 = arith.constant 0 : index
    %c0_2 = arith.constant 0 : index
    %1 = vector.load %arg2[%c0_1, %c0_2] : memref<1x56xf32, #tpu.memory_space<vmem>>, vector<1x56xf32>
    %2 = vector.broadcast %1 : vector<1x56xf32> to vector<64x56xf32>
    %3 = arith.mulf %0, %2 : vector<64x56xf32>
    %c0_3 = arith.constant 0 : index
    %c0_4 = arith.constant 0 : index
    %4 = vector.load %arg3[%c0_3, %c0_4] : memref<1x56xf32, #tpu.memory_space<vmem>>, vector<1x56xf32>
    %5 = vector.broadcast %4 : vector<1x56xf32> to vector<64x56xf32>
    %6 = arith.addf %3, %5 : vector<64x56xf32>
    %c0_5 = arith.constant 0 : index
    %c0_6 = arith.constant 0 : index
    %7 = vector.load %arg4[%c0_5, %c0_6] : memref<56x64xf32, #tpu.memory_space<vmem>>, vector<56x64xf32>
    %cst = arith.constant dense<0.000000e+00> : vector<64x64xf32>
    %8 = tpu.matmul %6, %7, %cst {dimension_numbers = #tpu.dot_dimension_numbers<[1], [0], [0], [1], [0, 0, 1, 1], [], []>} : vector<64x56xf32>, vector<56x64xf32>, vector<64x64xf32> -> vector<64x64xf32>
    %c0_7 = arith.constant 0 : index
    %c0_8 = arith.constant 0 : index
    %9 = vector.load %arg5[%c0_7, %c0_8] : memref<1x64xf32, #tpu.memory_space<vmem>>, vector<1x64xf32>
    %10 = vector.broadcast %9 : vector<1x64xf32> to vector<64x64xf32>
    %11 = arith.addf %8, %10 : vector<64x64xf32>
    %cst_9 = arith.constant 5.000000e-01 : f32
    %12 = vector.broadcast %cst_9 : f32 to vector<64x64xf32>
    %13 = arith.mulf %12, %11 : vector<64x64xf32>
    %cst_10 = arith.constant 4.471500e-02 : f32
    %14 = vector.broadcast %cst_10 : f32 to vector<64x64xf32>
    %15 = arith.mulf %14, %11 : vector<64x64xf32>
    %16 = arith.mulf %15, %11 : vector<64x64xf32>
    %17 = arith.mulf %16, %11 : vector<64x64xf32>
    %18 = arith.addf %11, %17 : vector<64x64xf32>
    %cst_11 = arith.constant 0.797884583 : f32
    %19 = vector.broadcast %cst_11 : f32 to vector<64x64xf32>
    %20 = arith.mulf %19, %18 : vector<64x64xf32>
    %21 = math.tanh %20 : vector<64x64xf32>
    %cst_12 = arith.constant 1.000000e+00 : f32
    %22 = vector.broadcast %cst_12 : f32 to vector<64x64xf32>
    %23 = arith.addf %22, %21 : vector<64x64xf32>
    %24 = arith.mulf %13, %23 : vector<64x64xf32>
    %c0_13 = arith.constant 0 : index
    %c0_14 = arith.constant 0 : index
    %25 = vector.load %arg6[%c0_13, %c0_14] : memref<64x64xf32, #tpu.memory_space<vmem>>, vector<64x64xf32>
    tpu.vector_store %arg6[%c0_13, %c0_14], %24 {strides = array<i32>} : memref<64x64xf32, #tpu.memory_space<vmem>>, vector<64x64xf32>,
    return
  }
  func.func @transform_0(%arg0: i32) -> (i32, i32) {
    %c0_i32 = arith.constant 0 : i32
    %c0_i32_0 = arith.constant 0 : i32
    return %arg0, %c0_i32 : i32, i32
  }
  func.func @transform_1(%arg0: i32) -> (i32, i32) {
    %c0_i32 = arith.constant 0 : i32
    %c0_i32_0 = arith.constant 0 : i32
    %c0_i32_1 = arith.constant 0 : i32
    return %c0_i32, %c0_i32_0 : i32, i32
  }
  func.func @transform_2(%arg0: i32) -> (i32, i32) {
    %c0_i32 = arith.constant 0 : i32
    %c0_i32_0 = arith.constant 0 : i32
    %c0_i32_1 = arith.constant 0 : i32
    return %c0_i32, %c0_i32_0 : i32, i32
  }
  func.func @transform_3(%arg0: i32) -> (i32, i32) {
    %c0_i32 = arith.constant 0 : i32
    %c0_i32_0 = arith.constant 0 : i32
    %c0_i32_1 = arith.constant 0 : i32
    return %c0_i32, %c0_i32_0 : i32, i32
  }
  func.func @transform_4(%arg0: i32) -> (i32, i32) {
    %c0_i32 = arith.constant 0 : i32
    %c0_i32_0 = arith.constant 0 : i32
    %c0_i32_1 = arith.constant 0 : i32
    return %c0_i32, %c0_i32_0 : i32, i32
  }
  func.func @transform_5(%arg0: i32) -> (i32, i32) {
    %c0_i32 = arith.constant 0 : i32
    %c0_i32_0 = arith.constant 0 : i32
    return %arg0, %c0_i32 : i32, i32
  }
}

module attributes {stable_mosaic.version = 11 : i64} {
  func.func @_linear_act_kernel(%arg0: i32, %arg1: memref<64x64xf32, #tpu.memory_space<vmem>>, %arg2: memref<1x64xf32, #tpu.memory_space<vmem>>, %arg3: memref<1x64xf32, #tpu.memory_space<vmem>>, %arg4: memref<64x32xf32, #tpu.memory_space<vmem>>, %arg5: memref<1x32xf32, #tpu.memory_space<vmem>>, %arg6: memref<64x32xf32, #tpu.memory_space<vmem>>) attributes {dimension_semantics = [#tpu.dimension_semantics<parallel>], iteration_bounds = array<i64: 1>, scalar_prefetch = 0 : i64, scratch_operands = 0 : i64, tpu.core_type = #tpu.core_type<tc>, window_params = [{transform_indices = @transform_0, window_bounds = array<i64: 64, 64>}, {pipeline_mode = #tpu.pipeline_mode<synchronous>, transform_indices = @transform_1, window_bounds = array<i64: 1, 64>}, {pipeline_mode = #tpu.pipeline_mode<synchronous>, transform_indices = @transform_2, window_bounds = array<i64: 1, 64>}, {pipeline_mode = #tpu.pipeline_mode<synchronous>, transform_indices = @transform_3, window_bounds = array<i64: 64, 32>}, {pipeline_mode = #tpu.pipeline_mode<synchronous>, transform_indices = @transform_4, window_bounds = array<i64: 1, 32>}, {transform_indices = @transform_5, window_bounds = array<i64: 64, 32>}]} {
    %c0 = arith.constant 0 : index
    %c0_0 = arith.constant 0 : index
    %0 = vector.load %arg1[%c0, %c0_0] : memref<64x64xf32, #tpu.memory_space<vmem>>, vector<64x64xf32>
    %c0_1 = arith.constant 0 : index
    %c0_2 = arith.constant 0 : index
    %1 = vector.load %arg2[%c0_1, %c0_2] : memref<1x64xf32, #tpu.memory_space<vmem>>, vector<1x64xf32>
    %2 = vector.broadcast %1 : vector<1x64xf32> to vector<64x64xf32>
    %3 = arith.mulf %0, %2 : vector<64x64xf32>
    %c0_3 = arith.constant 0 : index
    %c0_4 = arith.constant 0 : index
    %4 = vector.load %arg3[%c0_3, %c0_4] : memref<1x64xf32, #tpu.memory_space<vmem>>, vector<1x64xf32>
    %5 = vector.broadcast %4 : vector<1x64xf32> to vector<64x64xf32>
    %6 = arith.addf %3, %5 : vector<64x64xf32>
    %c0_5 = arith.constant 0 : index
    %c0_6 = arith.constant 0 : index
    %7 = vector.load %arg4[%c0_5, %c0_6] : memref<64x32xf32, #tpu.memory_space<vmem>>, vector<64x32xf32>
    %cst = arith.constant dense<0.000000e+00> : vector<64x32xf32>
    %8 = tpu.matmul %6, %7, %cst {dimension_numbers = #tpu.dot_dimension_numbers<[1], [0], [0], [1], [0, 0, 1, 1], [], []>} : vector<64x64xf32>, vector<64x32xf32>, vector<64x32xf32> -> vector<64x32xf32>
    %c0_7 = arith.constant 0 : index
    %c0_8 = arith.constant 0 : index
    %9 = vector.load %arg5[%c0_7, %c0_8] : memref<1x32xf32, #tpu.memory_space<vmem>>, vector<1x32xf32>
    %10 = vector.broadcast %9 : vector<1x32xf32> to vector<64x32xf32>
    %11 = arith.addf %8, %10 : vector<64x32xf32>
    %cst_9 = arith.constant 5.000000e-01 : f32
    %12 = vector.broadcast %cst_9 : f32 to vector<64x32xf32>
    %13 = arith.mulf %12, %11 : vector<64x32xf32>
    %cst_10 = arith.constant 4.471500e-02 : f32
    %14 = vector.broadcast %cst_10 : f32 to vector<64x32xf32>
    %15 = arith.mulf %14, %11 : vector<64x32xf32>
    %16 = arith.mulf %15, %11 : vector<64x32xf32>
    %17 = arith.mulf %16, %11 : vector<64x32xf32>
    %18 = arith.addf %11, %17 : vector<64x32xf32>
    %cst_11 = arith.constant 0.797884583 : f32
    %19 = vector.broadcast %cst_11 : f32 to vector<64x32xf32>
    %20 = arith.mulf %19, %18 : vector<64x32xf32>
    %21 = math.tanh %20 : vector<64x32xf32>
    %cst_12 = arith.constant 1.000000e+00 : f32
    %22 = vector.broadcast %cst_12 : f32 to vector<64x32xf32>
    %23 = arith.addf %22, %21 : vector<64x32xf32>
    %24 = arith.mulf %13, %23 : vector<64x32xf32>
    %c0_13 = arith.constant 0 : index
    %c0_14 = arith.constant 0 : index
    %25 = vector.load %arg6[%c0_13, %c0_14] : memref<64x32xf32, #tpu.memory_space<vmem>>, vector<64x32xf32>
    tpu.vector_store %arg6[%c0_13, %c0_14], %24 {strides = array<i32>} : memref<64x32xf32, #tpu.memory_space<vmem>>, vector<64x32xf32>,
    return
  }
  func.func @transform_0(%arg0: i32) -> (i32, i32) {
    %c0_i32 = arith.constant 0 : i32
    %c0_i32_0 = arith.constant 0 : i32
    return %arg0, %c0_i32 : i32, i32
  }
  func.func @transform_1(%arg0: i32) -> (i32, i32) {
    %c0_i32 = arith.constant 0 : i32
    %c0_i32_0 = arith.constant 0 : i32
    %c0_i32_1 = arith.constant 0 : i32
    return %c0_i32, %c0_i32_0 : i32, i32
  }
  func.func @transform_2(%arg0: i32) -> (i32, i32) {
    %c0_i32 = arith.constant 0 : i32
    %c0_i32_0 = arith.constant 0 : i32
    %c0_i32_1 = arith.constant 0 : i32
    return %c0_i32, %c0_i32_0 : i32, i32
  }
  func.func @transform_3(%arg0: i32) -> (i32, i32) {
    %c0_i32 = arith.constant 0 : i32
    %c0_i32_0 = arith.constant 0 : i32
    %c0_i32_1 = arith.constant 0 : i32
    return %c0_i32, %c0_i32_0 : i32, i32
  }
  func.func @transform_4(%arg0: i32) -> (i32, i32) {
    %c0_i32 = arith.constant 0 : i32
    %c0_i32_0 = arith.constant 0 : i32
    %c0_i32_1 = arith.constant 0 : i32
    return %c0_i32, %c0_i32_0 : i32, i32
  }
  func.func @transform_5(%arg0: i32) -> (i32, i32) {
    %c0_i32 = arith.constant 0 : i32
    %c0_i32_0 = arith.constant 0 : i32
    return %arg0, %c0_i32 : i32, i32
  }
}

module attributes {stable_mosaic.version = 11 : i64} {
  func.func @_linear_act_kernel(%arg0: i32, %arg1: memref<64x32xf32, #tpu.memory_space<vmem>>, %arg2: memref<1x32xf32, #tpu.memory_space<vmem>>, %arg3: memref<1x32xf32, #tpu.memory_space<vmem>>, %arg4: memref<32x4xf32, #tpu.memory_space<vmem>>, %arg5: memref<1x4xf32, #tpu.memory_space<vmem>>, %arg6: memref<64x4xf32, #tpu.memory_space<vmem>>) attributes {dimension_semantics = [#tpu.dimension_semantics<parallel>], iteration_bounds = array<i64: 1>, scalar_prefetch = 0 : i64, scratch_operands = 0 : i64, tpu.core_type = #tpu.core_type<tc>, window_params = [{transform_indices = @transform_0, window_bounds = array<i64: 64, 32>}, {pipeline_mode = #tpu.pipeline_mode<synchronous>, transform_indices = @transform_1, window_bounds = array<i64: 1, 32>}, {pipeline_mode = #tpu.pipeline_mode<synchronous>, transform_indices = @transform_2, window_bounds = array<i64: 1, 32>}, {pipeline_mode = #tpu.pipeline_mode<synchronous>, transform_indices = @transform_3, window_bounds = array<i64: 32, 4>}, {pipeline_mode = #tpu.pipeline_mode<synchronous>, transform_indices = @transform_4, window_bounds = array<i64: 1, 4>}, {transform_indices = @transform_5, window_bounds = array<i64: 64, 4>}]} {
    %c0 = arith.constant 0 : index
    %c0_0 = arith.constant 0 : index
    %0 = vector.load %arg1[%c0, %c0_0] : memref<64x32xf32, #tpu.memory_space<vmem>>, vector<64x32xf32>
    %c0_1 = arith.constant 0 : index
    %c0_2 = arith.constant 0 : index
    %1 = vector.load %arg2[%c0_1, %c0_2] : memref<1x32xf32, #tpu.memory_space<vmem>>, vector<1x32xf32>
    %2 = vector.broadcast %1 : vector<1x32xf32> to vector<64x32xf32>
    %3 = arith.mulf %0, %2 : vector<64x32xf32>
    %c0_3 = arith.constant 0 : index
    %c0_4 = arith.constant 0 : index
    %4 = vector.load %arg3[%c0_3, %c0_4] : memref<1x32xf32, #tpu.memory_space<vmem>>, vector<1x32xf32>
    %5 = vector.broadcast %4 : vector<1x32xf32> to vector<64x32xf32>
    %6 = arith.addf %3, %5 : vector<64x32xf32>
    %c0_5 = arith.constant 0 : index
    %c0_6 = arith.constant 0 : index
    %7 = vector.load %arg4[%c0_5, %c0_6] : memref<32x4xf32, #tpu.memory_space<vmem>>, vector<32x4xf32>
    %cst = arith.constant dense<0.000000e+00> : vector<64x4xf32>
    %8 = tpu.matmul %6, %7, %cst {dimension_numbers = #tpu.dot_dimension_numbers<[1], [0], [0], [1], [0, 0, 1, 1], [], []>} : vector<64x32xf32>, vector<32x4xf32>, vector<64x4xf32> -> vector<64x4xf32>
    %c0_7 = arith.constant 0 : index
    %c0_8 = arith.constant 0 : index
    %9 = vector.load %arg5[%c0_7, %c0_8] : memref<1x4xf32, #tpu.memory_space<vmem>>, vector<1x4xf32>
    %10 = vector.broadcast %9 : vector<1x4xf32> to vector<64x4xf32>
    %11 = arith.addf %8, %10 : vector<64x4xf32>
    %cst_9 = arith.constant dense<0xFF800000> : vector<64xf32>
    %12 = vector.multi_reduction <maximumf>, %11, %cst_9 [1] : vector<64x4xf32> to vector<64xf32>
    %13 = vector.shape_cast %12 : vector<64xf32> to vector<64x1xf32>
    %14 = vector.broadcast %13 : vector<64x1xf32> to vector<64x4xf32>
    %15 = arith.subf %11, %14 : vector<64x4xf32>
    %16 = math.exp %15 : vector<64x4xf32>
    %cst_10 = arith.constant dense<0.000000e+00> : vector<64xf32>
    %17 = vector.multi_reduction <add>, %16, %cst_10 [1] : vector<64x4xf32> to vector<64xf32>
    %18 = vector.shape_cast %17 : vector<64xf32> to vector<64x1xf32>
    %19 = vector.broadcast %18 : vector<64x1xf32> to vector<64x4xf32>
    %20 = arith.divf %16, %19 : vector<64x4xf32>
    %c0_11 = arith.constant 0 : index
    %c0_12 = arith.constant 0 : index
    %21 = vector.load %arg6[%c0_11, %c0_12] : memref<64x4xf32, #tpu.memory_space<vmem>>, vector<64x4xf32>
    tpu.vector_store %arg6[%c0_11, %c0_12], %20 {strides = array<i32>} : memref<64x4xf32, #tpu.memory_space<vmem>>, vector<64x4xf32>,
    return
  }
  func.func @transform_0(%arg0: i32) -> (i32, i32) {
    %c0_i32 = arith.constant 0 : i32
    %c0_i32_0 = arith.constant 0 : i32
    return %arg0, %c0_i32 : i32, i32
  }
  func.func @transform_1(%arg0: i32) -> (i32, i32) {
    %c0_i32 = arith.constant 0 : i32
    %c0_i32_0 = arith.constant 0 : i32
    %c0_i32_1 = arith.constant 0 : i32
    return %c0_i32, %c0_i32_0 : i32, i32
  }
  func.func @transform_2(%arg0: i32) -> (i32, i32) {
    %c0_i32 = arith.constant 0 : i32
    %c0_i32_0 = arith.constant 0 : i32
    %c0_i32_1 = arith.constant 0 : i32
    return %c0_i32, %c0_i32_0 : i32, i32
  }
  func.func @transform_3(%arg0: i32) -> (i32, i32) {
    %c0_i32 = arith.constant 0 : i32
    %c0_i32_0 = arith.constant 0 : i32
    %c0_i32_1 = arith.constant 0 : i32
    return %c0_i32, %c0_i32_0 : i32, i32
  }
  func.func @transform_4(%arg0: i32) -> (i32, i32) {
    %c0_i32 = arith.constant 0 : i32
    %c0_i32_0 = arith.constant 0 : i32
    %c0_i32_1 = arith.constant 0 : i32
    return %c0_i32, %c0_i32_0 : i32, i32
  }
  func.func @transform_5(%arg0: i32) -> (i32, i32) {
    %c0_i32 = arith.constant 0 : i32
    %c0_i32_0 = arith.constant 0 : i32
    return %arg0, %c0_i32 : i32, i32
  }
}

module attributes {stable_mosaic.version = 11 : i64} {
  func.func @_linear_act_kernel(%arg0: i32, %arg1: memref<64x16xf32, #tpu.memory_space<vmem>>, %arg2: memref<1x16xf32, #tpu.memory_space<vmem>>, %arg3: memref<1x16xf32, #tpu.memory_space<vmem>>, %arg4: memref<16x64xf32, #tpu.memory_space<vmem>>, %arg5: memref<1x64xf32, #tpu.memory_space<vmem>>, %arg6: memref<64x64xf32, #tpu.memory_space<vmem>>) attributes {dimension_semantics = [#tpu.dimension_semantics<parallel>], iteration_bounds = array<i64: 1>, scalar_prefetch = 0 : i64, scratch_operands = 0 : i64, tpu.core_type = #tpu.core_type<tc>, window_params = [{transform_indices = @transform_0, window_bounds = array<i64: 64, 16>}, {pipeline_mode = #tpu.pipeline_mode<synchronous>, transform_indices = @transform_1, window_bounds = array<i64: 1, 16>}, {pipeline_mode = #tpu.pipeline_mode<synchronous>, transform_indices = @transform_2, window_bounds = array<i64: 1, 16>}, {pipeline_mode = #tpu.pipeline_mode<synchronous>, transform_indices = @transform_3, window_bounds = array<i64: 16, 64>}, {pipeline_mode = #tpu.pipeline_mode<synchronous>, transform_indices = @transform_4, window_bounds = array<i64: 1, 64>}, {transform_indices = @transform_5, window_bounds = array<i64: 64, 64>}]} {
    %c0 = arith.constant 0 : index
    %c0_0 = arith.constant 0 : index
    %0 = vector.load %arg1[%c0, %c0_0] : memref<64x16xf32, #tpu.memory_space<vmem>>, vector<64x16xf32>
    %c0_1 = arith.constant 0 : index
    %c0_2 = arith.constant 0 : index
    %1 = vector.load %arg2[%c0_1, %c0_2] : memref<1x16xf32, #tpu.memory_space<vmem>>, vector<1x16xf32>
    %2 = vector.broadcast %1 : vector<1x16xf32> to vector<64x16xf32>
    %3 = arith.mulf %0, %2 : vector<64x16xf32>
    %c0_3 = arith.constant 0 : index
    %c0_4 = arith.constant 0 : index
    %4 = vector.load %arg3[%c0_3, %c0_4] : memref<1x16xf32, #tpu.memory_space<vmem>>, vector<1x16xf32>
    %5 = vector.broadcast %4 : vector<1x16xf32> to vector<64x16xf32>
    %6 = arith.addf %3, %5 : vector<64x16xf32>
    %c0_5 = arith.constant 0 : index
    %c0_6 = arith.constant 0 : index
    %7 = vector.load %arg4[%c0_5, %c0_6] : memref<16x64xf32, #tpu.memory_space<vmem>>, vector<16x64xf32>
    %cst = arith.constant dense<0.000000e+00> : vector<64x64xf32>
    %8 = tpu.matmul %6, %7, %cst {dimension_numbers = #tpu.dot_dimension_numbers<[1], [0], [0], [1], [0, 0, 1, 1], [], []>} : vector<64x16xf32>, vector<16x64xf32>, vector<64x64xf32> -> vector<64x64xf32>
    %c0_7 = arith.constant 0 : index
    %c0_8 = arith.constant 0 : index
    %9 = vector.load %arg5[%c0_7, %c0_8] : memref<1x64xf32, #tpu.memory_space<vmem>>, vector<1x64xf32>
    %10 = vector.broadcast %9 : vector<1x64xf32> to vector<64x64xf32>
    %11 = arith.addf %8, %10 : vector<64x64xf32>
    %cst_9 = arith.constant 5.000000e-01 : f32
    %12 = vector.broadcast %cst_9 : f32 to vector<64x64xf32>
    %13 = arith.mulf %12, %11 : vector<64x64xf32>
    %cst_10 = arith.constant 4.471500e-02 : f32
    %14 = vector.broadcast %cst_10 : f32 to vector<64x64xf32>
    %15 = arith.mulf %14, %11 : vector<64x64xf32>
    %16 = arith.mulf %15, %11 : vector<64x64xf32>
    %17 = arith.mulf %16, %11 : vector<64x64xf32>
    %18 = arith.addf %11, %17 : vector<64x64xf32>
    %cst_11 = arith.constant 0.797884583 : f32
    %19 = vector.broadcast %cst_11 : f32 to vector<64x64xf32>
    %20 = arith.mulf %19, %18 : vector<64x64xf32>
    %21 = math.tanh %20 : vector<64x64xf32>
    %cst_12 = arith.constant 1.000000e+00 : f32
    %22 = vector.broadcast %cst_12 : f32 to vector<64x64xf32>
    %23 = arith.addf %22, %21 : vector<64x64xf32>
    %24 = arith.mulf %13, %23 : vector<64x64xf32>
    %c0_13 = arith.constant 0 : index
    %c0_14 = arith.constant 0 : index
    %25 = vector.load %arg6[%c0_13, %c0_14] : memref<64x64xf32, #tpu.memory_space<vmem>>, vector<64x64xf32>
    tpu.vector_store %arg6[%c0_13, %c0_14], %24 {strides = array<i32>} : memref<64x64xf32, #tpu.memory_space<vmem>>, vector<64x64xf32>,
    return
  }
  func.func @transform_0(%arg0: i32) -> (i32, i32) {
    %c0_i32 = arith.constant 0 : i32
    %c0_i32_0 = arith.constant 0 : i32
    return %arg0, %c0_i32 : i32, i32
  }
  func.func @transform_1(%arg0: i32) -> (i32, i32) {
    %c0_i32 = arith.constant 0 : i32
    %c0_i32_0 = arith.constant 0 : i32
    %c0_i32_1 = arith.constant 0 : i32
    return %c0_i32, %c0_i32_0 : i32, i32
  }
  func.func @transform_2(%arg0: i32) -> (i32, i32) {
    %c0_i32 = arith.constant 0 : i32
    %c0_i32_0 = arith.constant 0 : i32
    %c0_i32_1 = arith.constant 0 : i32
    return %c0_i32, %c0_i32_0 : i32, i32
  }
  func.func @transform_3(%arg0: i32) -> (i32, i32) {
    %c0_i32 = arith.constant 0 : i32
    %c0_i32_0 = arith.constant 0 : i32
    %c0_i32_1 = arith.constant 0 : i32
    return %c0_i32, %c0_i32_0 : i32, i32
  }
  func.func @transform_4(%arg0: i32) -> (i32, i32) {
    %c0_i32 = arith.constant 0 : i32
    %c0_i32_0 = arith.constant 0 : i32
    %c0_i32_1 = arith.constant 0 : i32
    return %c0_i32, %c0_i32_0 : i32, i32
  }
  func.func @transform_5(%arg0: i32) -> (i32, i32) {
    %c0_i32 = arith.constant 0 : i32
    %c0_i32_0 = arith.constant 0 : i32
    return %arg0, %c0_i32 : i32, i32
  }
}

module attributes {stable_mosaic.version = 11 : i64} {
  func.func @_linear_act_kernel(%arg0: i32, %arg1: memref<64x64xf32, #tpu.memory_space<vmem>>, %arg2: memref<1x64xf32, #tpu.memory_space<vmem>>, %arg3: memref<1x64xf32, #tpu.memory_space<vmem>>, %arg4: memref<64x1xf32, #tpu.memory_space<vmem>>, %arg5: memref<1x1xf32, #tpu.memory_space<vmem>>, %arg6: memref<64x1xf32, #tpu.memory_space<vmem>>) attributes {dimension_semantics = [#tpu.dimension_semantics<parallel>], iteration_bounds = array<i64: 1>, scalar_prefetch = 0 : i64, scratch_operands = 0 : i64, tpu.core_type = #tpu.core_type<tc>, window_params = [{transform_indices = @transform_0, window_bounds = array<i64: 64, 64>}, {pipeline_mode = #tpu.pipeline_mode<synchronous>, transform_indices = @transform_1, window_bounds = array<i64: 1, 64>}, {pipeline_mode = #tpu.pipeline_mode<synchronous>, transform_indices = @transform_2, window_bounds = array<i64: 1, 64>}, {pipeline_mode = #tpu.pipeline_mode<synchronous>, transform_indices = @transform_3, window_bounds = array<i64: 64, 1>}, {pipeline_mode = #tpu.pipeline_mode<synchronous>, transform_indices = @transform_4, window_bounds = array<i64: 1, 1>}, {transform_indices = @transform_5, window_bounds = array<i64: 64, 1>}]} {
    %c0 = arith.constant 0 : index
    %c0_0 = arith.constant 0 : index
    %0 = vector.load %arg1[%c0, %c0_0] : memref<64x64xf32, #tpu.memory_space<vmem>>, vector<64x64xf32>
    %c0_1 = arith.constant 0 : index
    %c0_2 = arith.constant 0 : index
    %1 = vector.load %arg2[%c0_1, %c0_2] : memref<1x64xf32, #tpu.memory_space<vmem>>, vector<1x64xf32>
    %2 = vector.broadcast %1 : vector<1x64xf32> to vector<64x64xf32>
    %3 = arith.mulf %0, %2 : vector<64x64xf32>
    %c0_3 = arith.constant 0 : index
    %c0_4 = arith.constant 0 : index
    %4 = vector.load %arg3[%c0_3, %c0_4] : memref<1x64xf32, #tpu.memory_space<vmem>>, vector<1x64xf32>
    %5 = vector.broadcast %4 : vector<1x64xf32> to vector<64x64xf32>
    %6 = arith.addf %3, %5 : vector<64x64xf32>
    %c0_5 = arith.constant 0 : index
    %c0_6 = arith.constant 0 : index
    %7 = vector.load %arg4[%c0_5, %c0_6] : memref<64x1xf32, #tpu.memory_space<vmem>>, vector<64x1xf32>
    %cst = arith.constant dense<0.000000e+00> : vector<64x1xf32>
    %8 = tpu.matmul %6, %7, %cst {dimension_numbers = #tpu.dot_dimension_numbers<[1], [0], [0], [1], [0, 0, 1, 1], [], []>} : vector<64x64xf32>, vector<64x1xf32>, vector<64x1xf32> -> vector<64x1xf32>
    %c0_7 = arith.constant 0 : index
    %c0_8 = arith.constant 0 : index
    %9 = vector.load %arg5[%c0_7, %c0_8] : memref<1x1xf32, #tpu.memory_space<vmem>>, vector<1x1xf32>
    %10 = vector.broadcast %9 : vector<1x1xf32> to vector<64x1xf32>
    %11 = arith.addf %8, %10 : vector<64x1xf32>
    %cst_9 = arith.constant 0.000000e+00 : f32
    %12 = vector.broadcast %cst_9 : f32 to vector<64x1xf32>
    %13 = arith.subf %12, %11 : vector<64x1xf32>
    %14 = math.exp %13 : vector<64x1xf32>
    %cst_10 = arith.constant 1.000000e+00 : f32
    %15 = vector.broadcast %cst_10 : f32 to vector<64x1xf32>
    %16 = arith.addf %15, %14 : vector<64x1xf32>
    %cst_11 = arith.constant 1.000000e+00 : f32
    %17 = vector.broadcast %cst_11 : f32 to vector<64x1xf32>
    %18 = arith.divf %17, %16 : vector<64x1xf32>
    %c0_12 = arith.constant 0 : index
    %c0_13 = arith.constant 0 : index
    %19 = vector.load %arg6[%c0_12, %c0_13] : memref<64x1xf32, #tpu.memory_space<vmem>>, vector<64x1xf32>
    tpu.vector_store %arg6[%c0_12, %c0_13], %18 {strides = array<i32>} : memref<64x1xf32, #tpu.memory_space<vmem>>, vector<64x1xf32>,
    return
  }
  func.func @transform_0(%arg0: i32) -> (i32, i32) {
    %c0_i32 = arith.constant 0 : i32
    %c0_i32_0 = arith.constant 0 : i32
    return %arg0, %c0_i32 : i32, i32
  }
  func.func @transform_1(%arg0: i32) -> (i32, i32) {
    %c0_i32 = arith.constant 0 : i32
    %c0_i32_0 = arith.constant 0 : i32
    %c0_i32_1 = arith.constant 0 : i32
    return %c0_i32, %c0_i32_0 : i32, i32
  }
  func.func @transform_2(%arg0: i32) -> (i32, i32) {
    %c0_i32 = arith.constant 0 : i32
    %c0_i32_0 = arith.constant 0 : i32
    %c0_i32_1 = arith.constant 0 : i32
    return %c0_i32, %c0_i32_0 : i32, i32
  }
  func.func @transform_3(%arg0: i32) -> (i32, i32) {
    %c0_i32 = arith.constant 0 : i32
    %c0_i32_0 = arith.constant 0 : i32
    %c0_i32_1 = arith.constant 0 : i32
    return %c0_i32, %c0_i32_0 : i32, i32
  }
  func.func @transform_4(%arg0: i32) -> (i32, i32) {
    %c0_i32 = arith.constant 0 : i32
    %c0_i32_0 = arith.constant 0 : i32
    %c0_i32_1 = arith.constant 0 : i32
    return %c0_i32, %c0_i32_0 : i32, i32
  }
  func.func @transform_5(%arg0: i32) -> (i32, i32) {
    %c0_i32 = arith.constant 0 : i32
    %c0_i32_0 = arith.constant 0 : i32
    return %arg0, %c0_i32 : i32, i32
  }
}

</mosaic_0001>

<bundles_post_ra>
// kernel: torch_model_forward.21
= control target key start
LH: loop header
LB: loop body
LE: loop exit
PB: predicated region body
PF: predicated region fallthrough
CT: control target
= control target key end

     0   :  { %vm12_vm0 = vcmask 122880   ;;  %vm39_vm1 = vcmask 130048   ;;  %v105_v0 = vmov 0.0   ;;  %s148_s0 = inlined_call_operand.vmem [shape: f32[32,16], index: 0, kind: input, shape index: {}]   ;;  %s149_s1 = inlined_call_operand.vmem [shape: f32[2,16], index: 1, kind: output, shape index: {}]  }
   0x1   :  { %13 = vst.msk [vmem:[#allocation2] sm:$0x1] %vm12_vm0, %v105_v0  ;;  %v15_v1 = vld [vmem:[%s148_s0] sm:$0xff]  ;;  %v16_v2 = vld [vmem:[%s148_s0 + $0x8] sm:$0xff]  ;;  %v17_v3 = vld [vmem:[%s148_s0 + $0x10] sm:$0xff] }
   0x2   :  { %14 = vst.msk [vmem:[#allocation3] sm:$0x1] %vm12_vm0, %v105_v0  ;;  %v18_v4 = vld [vmem:[%s148_s0 + $0x18] sm:$0xff]  ;;  %v40_v5 = vsel %vm39_vm1, %v15_v1, 0.0  ;;  %v41_v6 = vsel %vm39_vm1, %v16_v2, 0.0  ;;  %v43_v7 = vsel %vm39_vm1, %v17_v3, 0.0  ;;  %v57_v8 = vmul.f32 %v15_v1, %v15_v1 }
   0x3   :  { %v42_v9 = vadd.f32 %v41_v6, %v40_v5  ;;  %v58_v10 = vmul.f32 %v16_v2, %v16_v2  ;;  %v59_v11 = vmul.f32 %v17_v3, %v17_v3  ;;  %v45_v12 = vsel %vm39_vm1, %v18_v4, 0.0 }
   0x4   :  { %v60_v13 = vmul.f32 %v18_v4, %v18_v4  ;;  %v61_v14 = vsel %vm39_vm1, %v57_v8, 0.0 }
   0x5   :  { %v44_v15 = vadd.f32 %v43_v7, %v42_v9  ;;  %v62_v16 = vsel %vm39_vm1, %v58_v10, 0.0  ;;  %v64_v17 = vsel %vm39_vm1, %v59_v11, 0.0 }
   0x6   :  { %v63_v18 = vadd.f32 %v62_v16, %v61_v14  ;;  %v66_v20 = vsel %vm39_vm1, %v60_v13, 0.0 }
   0x7   :  { %v46_v19 = vadd.f32 %v45_v12, %v44_v15 }
   0x8   :  { %v65_v21 = vadd.f32 %v64_v17, %v63_v18  ;;  %v38_v31 = vld [vmem:[#allocation2] sm:$0x1] }
   0x9   :  { %v47_v22 = vrot.slane %v46_v19, 4  ;;  %v56_v36 = vld [vmem:[#allocation3] sm:$0x1] }
   0xa   :  { %v67_v23 = vadd.f32 %v66_v20, %v65_v21 }
   0xb   :  { %v48_v24 = vadd.f32 %v47_v22, %v46_v19 }
   0xc   :  { %v68_v25 = vrot.slane %v67_v23, 4 }
   0xd   :  { %v49_v26 = vrot.slane %v48_v24, 2 }
   0xe   :  { %v69_v27 = vadd.f32 %v68_v25, %v67_v23 }
   0xf   :  { %v50_v28 = vadd.f32 %v49_v26, %v48_v24 }
  0x10   :  { %v70_v29 = vrot.slane %v69_v27, 2 }
  0x11   :  { %v51_v30 = vrot.slane %v50_v28, 1 }
  0x12   :  { %v71_v32 = vadd.f32 %v70_v29, %v69_v27 }
  0x13   :  { %v52_v33 = vadd.f32 %v51_v30, %v50_v28 }
  0x14   :  { %v72_v34 = vrot.slane %v71_v32, 1 }
  0x15   :  { %v53_v35 = vadd.f32 %v52_v33, %v38_v31 }
  0x16   :  { %v73_v37 = vadd.f32 %v72_v34, %v71_v32 }
  0x17   :  { %55 = vst.msk [vmem:[#allocation2] sm:$0x1] %vm12_vm0, %v53_v35 }
  0x18   :  { %v74_v38 = vadd.f32 %v73_v37, %v56_v36 }
  0x1a   :  { %75 = vst.msk [vmem:[#allocation3] sm:$0x1] %vm12_vm0, %v74_v38 }
  0x1e   :  { %v79_v39 = vld [vmem:[#allocation2] sm:$0x1] }
  0x1f   :  { %v80_v40 = vmul.f32 0.03125, %v79_v39 }
  0x21   :  { %v81_v41 = vld [vmem:[#allocation3] sm:$0x1]  ;;  %v83_v42 = vmul.f32 %v80_v40, %v80_v40  ;;  %85 = vst.msk [vmem:[%s149_s1] sm:$0x1] %vm12_vm0, %v80_v40 }
  0x22   :  { %v82_v43 = vmul.f32 0.03125, %v81_v41 }
  0x24   :  { %v84_v44 = vsub.f32 %v82_v43, %v83_v42 }
  0x26   :  { %v86_v45 = vadd.f32 1e-05, %v84_v44 }
  0x28   :  { %103 = vrsqrt.f32 %v86_v45  ;;  %vm93_vm3 = vweird.f32 %v86_v45 }
  0x2e   :  { %v104_v46 = vpop.eup %103 }
  0x2f   :  { %v88_v47 = vmul.f32 %v104_v46, %v86_v45  ;;  %vm94_vm2 = vweird.f32 %v104_v46 }
  0x30   :  { %vm95_vm4 = vmor %vm93_vm3, %vm94_vm2 }
  0x31   :  { %v89_v48 = vmul.f32 %v104_v46, %v88_v47 }
  0x33   :  { %v90_v49 = vmul.f32 0.5, %v89_v48 }
  0x35   :  { %v91_v50 = vsub.f32 1.5, %v90_v49 }
  0x37   :  { %v92_v51 = vmul.f32 %v104_v46, %v91_v50 }
  0x39   :  { %v96_v52 = vsel %vm95_vm4, %v104_v46, %v92_v51 }
  0x3a   :  { %97 = vst.msk [vmem:[%s149_s1 + $0x1] sm:$0x1] %vm12_vm0, %v96_v52 }

// kernel: torch_model_forward.22
= control target key start
LH: loop header
LB: loop body
LE: loop exit
PB: predicated region body
PF: predicated region fallthrough
CT: control target
= control target key end

     0   :  { %vm46_vm0 = vcmask 130048   ;;  %vm124_vm1 = vcmask 261120   ;;  %s227_s3 = inlined_call_operand.vmem [shape: f32[16,32], index: 3, kind: input, shape index: {}]   ;;  %s228_s0 = inlined_call_operand.vmem [shape: f32[32,16], index: 0, kind: input, shape index: {}]   ;;  %s229_s1 = inlined_call_operand.vmem [shape: f32[1,16], index: 1, kind: input, shape index: {}]   ;;  %s230_s2 = inlined_call_operand.vmem [shape: f32[1,16], index: 2, kind: input, shape index: {}]   ;;  %s231_s4 = inlined_call_operand.vmem [shape: f32[1,32], index: 4, kind: input, shape index: {}]   ;;  %s232_s5 = inlined_call_operand.vmem [shape: f32[32,32], index: 5, kind: output, shape index: {}]  }
   0x1   :  { %v41_v0 = vld [vmem:[%s227_s3 + $0x8] sm:$0xff]  ;;  %v40_v1 = vld [vmem:[%s227_s3] sm:$0xff]  ;;  %v22_v6 = vld [vmem:[%s228_s0 + $0x10] sm:$0xff] }
   0x2   :  { %v20_v2 = vld [vmem:[%s228_s0] sm:$0xff]  ;;  %73 = vmatpush.msra.mxu0 %v41_v0  ;;  %137 = vmatpush.msra.mxu1 %v41_v0  ;;  %v21_v5 = vld [vmem:[%s228_s0 + $0x8] sm:$0xff]  ;;  %v23_v10 = vld [vmem:[%s228_s0 + $0x18] sm:$0xff] }
   0x3   :  { %v143_v3 = vld [vmem:[%s229_s1] ss:$0 sm:$0xff]  ;;  %138 = vmatpush.msra.mxu2 %v41_v0  ;;  %139 = vmatpush.msra.mxu3 %v41_v0 }
   0x4   :  { %v144_v4 = vld [vmem:[%s230_s2] ss:$0 sm:$0xff]  ;;  %74 = vmatpush.msra.mxu0 %v40_v1  ;;  %140 = vmatpush.msra.mxu1 %v40_v1  ;;  %v28_v7 = vmul.f32 %v143_v3, %v20_v2  ;;  %v29_v8 = vmul.f32 %v143_v3, %v21_v5  ;;  %v30_v9 = vmul.f32 %v143_v3, %v22_v6 }
   0x5   :  { %141 = vmatpush.msra.mxu2 %v40_v1  ;;  %142 = vmatpush.msra.mxu3 %v40_v1  ;;  %v31_v11 = vmul.f32 %v143_v3, %v23_v10  ;;  %v145_v16 = vld [vmem:[%s231_s4] ss:$0 sm:$0xff] }
   0x6   :  { %v36_v12 = vadd.f32 %v144_v4, %v28_v7  ;;  %v37_v13 = vadd.f32 %v144_v4, %v29_v8  ;;  %v38_v14 = vadd.f32 %v144_v4, %v30_v9 }
   0x7   :  { %v39_v15 = vadd.f32 %v144_v4, %v31_v11 }
   0x8   :  { %133 = vmatmul.msk.f32.vlgmr.msra.gmra.mxu0 %vm46_vm0, %v36_v12  ;;  %134 = vmatmul.msk.f32.vlgmr.msra.gmra.mxu1 %vm46_vm0, %v37_v13 }
   0x9   :  { %135 = vmatmul.msk.f32.vlgmr.msra.gmra.mxu2 %vm46_vm0, %v38_v14  ;;  %136 = vmatmul.msk.f32.vlgmr.msra.gmra.mxu3 %vm46_vm0, %v39_v15 }
  0x85   :  { %v76_v17 = vpop.f32.mrf.mxu0  ;;  %v79_v18 = vpop.f32.mrf.mxu1 }
  0x86   :  { %v77_v19 = vadd.f32 %v145_v16, %v76_v17  ;;  %v80_v20 = vadd.f32 %v145_v16, %v79_v18 }
  0x88   :  { %v92_v21 = vmul.f32 0.044715, %v77_v19  ;;  %v93_v22 = vmul.f32 0.044715, %v80_v20  ;;  %v88_v47 = vmul.f32 0.5, %v77_v19  ;;  %v89_v49 = vmul.f32 0.5, %v80_v20 }
  0x8a   :  { %v96_v23 = vmul.f32 %v92_v21, %v77_v19  ;;  %v97_v24 = vmul.f32 %v93_v22, %v80_v20 }
  0x8c   :  { %v100_v25 = vmul.f32 %v96_v23, %v77_v19  ;;  %v101_v26 = vmul.f32 %v97_v24, %v80_v20  ;;  %v82_v27 = vpop.f32.mrf.mxu2  ;;  %v85_v28 = vpop.f32.mrf.mxu3 }
  0x8d   :  { %v83_v29 = vadd.f32 %v145_v16, %v82_v27  ;;  %v86_v30 = vadd.f32 %v145_v16, %v85_v28 }
  0x8e   :  { %v104_v31 = vadd.f32 %v100_v25, %v77_v19  ;;  %v105_v32 = vadd.f32 %v101_v26, %v80_v20 }
  0x8f   :  { %v94_v33 = vmul.f32 0.044715, %v83_v29  ;;  %v95_v34 = vmul.f32 0.044715, %v86_v30  ;;  %v90_v55 = vmul.f32 0.5, %v83_v29  ;;  %v91_v57 = vmul.f32 0.5, %v86_v30 }
  0x90   :  { %v108_v35 = vmul.f32 0.7978846, %v104_v31  ;;  %v109_v36 = vmul.f32 0.7978846, %v105_v32 }
  0x91   :  { %v98_v37 = vmul.f32 %v94_v33, %v83_v29  ;;  %v99_v38 = vmul.f32 %v95_v34, %v86_v30 }
  0x92   :  { %146 = vtanh.f32 %v108_v35 }
  0x93   :  { %148 = vtanh.f32 %v109_v36  ;;  %v102_v39 = vmul.f32 %v98_v37, %v83_v29  ;;  %v103_v40 = vmul.f32 %v99_v38, %v86_v30 }
  0x95   :  { %v106_v41 = vadd.f32 %v102_v39, %v83_v29  ;;  %v107_v42 = vadd.f32 %v103_v40, %v86_v30 }
  0x97   :  { %v110_v43 = vmul.f32 0.7978846, %v106_v41  ;;  %v111_v44 = vmul.f32 0.7978846, %v107_v42 }
  0x98   :  { %v147_v45 = vpop.eup %146 }
  0x99   :  { %v149_v46 = vpop.eup %148  ;;  %v116_v48 = vadd.f32 1.0, %v147_v45  ;;  %150 = vtanh.f32 %v110_v43 }
  0x9a   :  { %v117_v50 = vadd.f32 1.0, %v149_v46  ;;  %152 = vtanh.f32 %v111_v44 }
  0x9b   :  { %v120_v51 = vmul.f32 %v116_v48, %v88_v47 }
  0x9c   :  { %v121_v52 = vmul.f32 %v117_v50, %v89_v49 }
  0x9d   :  { %125 = vst.msk [vmem:[%s232_s5] sm:$0xff] %vm124_vm1, %v120_v51 }
  0x9e   :  { %126 = vst.msk [vmem:[%s232_s5 + $0x8] sm:$0xff] %vm124_vm1, %v121_v52 }
  0x9f   :  { %v151_v53 = vpop.eup %150 }
  0xa0   :  { %v153_v54 = vpop.eup %152  ;;  %v118_v56 = vadd.f32 1.0, %v151_v53 }
  0xa1   :  { %v119_v58 = vadd.f32 1.0, %v153_v54 }
  0xa2   :  { %v122_v59 = vmul.f32 %v118_v56, %v90_v55 }
  0xa3   :  { %v123_v60 = vmul.f32 %v119_v58, %v91_v57 }
  0xa4   :  { %127 = vst.msk [vmem:[%s232_s5 + $0x10] sm:$0xff] %vm124_vm1, %v122_v59 }
  0xa5   :  { %128 = vst.msk [vmem:[%s232_s5 + $0x18] sm:$0xff] %vm124_vm1, %v123_v60 }

// kernel: torch_model_forward.23
= control target key start
LH: loop header
LB: loop body
LE: loop exit
PB: predicated region body
PF: predicated region fallthrough
CT: control target
= control target key end

     0   :  { %vm48_vm0 = vcmask 261120   ;;  %s200_s3 = inlined_call_operand.vmem [shape: f32[32,32], index: 3, kind: input, shape index: {}]   ;;  %s201_s0 = inlined_call_operand.vmem [shape: f32[32,32], index: 0, kind: input, shape index: {}]   ;;  %s202_s1 = inlined_call_operand.vmem [shape: f32[1,32], index: 1, kind: input, shape index: {}]   ;;  %s203_s2 = inlined_call_operand.vmem [shape: f32[1,32], index: 2, kind: input, shape index: {}, may-alias: {2,4}]   ;;  %s204_s4 = inlined_call_operand.vmem [shape: f32[1,32], index: 4, kind: input, shape index: {}, may-alias: {2,4}]   ;;  %s205_s5 = inlined_call_operand.vmem [shape: f32[32,32], index: 5, kind: output, shape index: {}]  }
   0x1   :  { %v43_v0 = vld [vmem:[%s200_s3 + $0x18] sm:$0xff]  ;;  %v42_v1 = vld [vmem:[%s200_s3 + $0x10] sm:$0xff]  ;;  %v41_v2 = vld [vmem:[%s200_s3 + $0x8] sm:$0xff] }
   0x2   :  { %103 = vmatpush.msra.mxu2 %v43_v0  ;;  %104 = vmatpush.msra.mxu3 %v43_v0  ;;  %v22_v3 = vld [vmem:[%s201_s0 + $0x10] sm:$0xff]  ;;  %v114_v4 = vld [vmem:[%s202_s1] ss:$0 sm:$0xff]  ;;  %v23_v6 = vld [vmem:[%s201_s0 + $0x18] sm:$0xff] }
   0x3   :  { %73 = vmatpush.msra.mxu0 %v43_v0  ;;  %102 = vmatpush.msra.mxu1 %v43_v0  ;;  %v115_v5 = vld [vmem:[%s203_s2] ss:$0 sm:$0xff]  ;;  %v21_v8 = vld [vmem:[%s201_s0 + $0x8] sm:$0xff]  ;;  %v30_v10 = vmul.f32 %v114_v4, %v22_v3  ;;  %v31_v11 = vmul.f32 %v114_v4, %v23_v6 }
   0x4   :  { %106 = vmatpush.msra.mxu2 %v42_v1  ;;  %107 = vmatpush.msra.mxu3 %v42_v1  ;;  %v20_v7 = vld [vmem:[%s201_s0] sm:$0xff]  ;;  %v29_v13 = vmul.f32 %v114_v4, %v21_v8 }
   0x5   :  { %v40_v9 = vld [vmem:[%s200_s3] sm:$0xff]  ;;  %74 = vmatpush.msra.mxu0 %v42_v1  ;;  %105 = vmatpush.msra.mxu1 %v42_v1  ;;  %v28_v12 = vmul.f32 %v114_v4, %v20_v7  ;;  %v38_v14 = vadd.f32 %v115_v5, %v30_v10  ;;  %v39_v15 = vadd.f32 %v115_v5, %v31_v11 }
   0x6   :  { %109 = vmatpush.msra.mxu2 %v41_v2  ;;  %110 = vmatpush.msra.mxu3 %v41_v2  ;;  %v37_v17 = vadd.f32 %v115_v5, %v29_v13  ;;  %v116_v18 = vld [vmem:[%s204_s4] ss:$0 sm:$0xff] }
   0x7   :  { %75 = vmatpush.msra.mxu0 %v41_v2  ;;  %108 = vmatpush.msra.mxu1 %v41_v2  ;;  %v36_v16 = vadd.f32 %v115_v5, %v28_v12 }
   0x8   :  { %112 = vmatpush.msra.mxu2 %v40_v9  ;;  %113 = vmatpush.msra.mxu3 %v40_v9 }
   0x9   :  { %100 = vmatmul.msk.f32.vlgmr.msra.gmra.mxu2 %vm48_vm0, %v38_v14  ;;  %101 = vmatmul.msk.f32.vlgmr.msra.gmra.mxu3 %vm48_vm0, %v39_v15 }
   0xa   :  { %76 = vmatpush.msra.mxu0 %v40_v9  ;;  %111 = vmatpush.msra.mxu1 %v40_v9 }
   0xb   :  { %98 = vmatmul.msk.f32.vlgmr.msra.gmra.mxu0 %vm48_vm0, %v36_v16  ;;  %99 = vmatmul.msk.f32.vlgmr.msra.gmra.mxu1 %vm48_vm0, %v37_v17 }
  0x88   :  { %v78_v19 = vpop.f32.mrf.mxu0  ;;  %v81_v20 = vpop.f32.mrf.mxu1 }
  0x89   :  { %v79_v21 = vadd.f32 %v116_v18, %v78_v19  ;;  %v82_v22 = vadd.f32 %v116_v18, %v81_v20 }
  0x8b   :  { %90 = vst.msk [vmem:[%s205_s5] sm:$0xff] %vm48_vm0, %v79_v21 }
  0x8c   :  { %91 = vst.msk [vmem:[%s205_s5 + $0x8] sm:$0xff] %vm48_vm0, %v82_v22  ;;  %v84_v23 = vpop.f32.mrf.mxu2  ;;  %v87_v24 = vpop.f32.mrf.mxu3 }
  0x8d   :  { %v85_v25 = vadd.f32 %v116_v18, %v84_v23  ;;  %v88_v26 = vadd.f32 %v116_v18, %v87_v24 }
  0x8f   :  { %92 = vst.msk [vmem:[%s205_s5 + $0x10] sm:$0xff] %vm48_vm0, %v85_v25 }
  0x90   :  { %93 = vst.msk [vmem:[%s205_s5 + $0x18] sm:$0xff] %vm48_vm0, %v88_v26 }

// kernel: torch_model_forward.26
= control target key start
LH: loop header
LB: loop body
LE: loop exit
PB: predicated region body
PF: predicated region fallthrough
CT: control target
= control target key end

     0   :  { %vm125_vm0 = vcmask 261120   ;;  %s308_s3 = inlined_call_operand.vmem [shape: f32[128,32], index: 3, kind: input, shape index: {}]   ;;  %s309_s1 = inlined_call_operand.vmem [shape: f32[1,128], index: 1, kind: input, shape index: {}]   ;;  %s310_s2 = inlined_call_operand.vmem [shape: f32[1,128], index: 2, kind: input, shape index: {}]   ;;  %s311_s4 = inlined_call_operand.vmem [shape: f32[1,32], index: 4, kind: input, shape index: {}]   ;;  %s312_s0 = inlined_call_operand.vmem [shape: f32[32,128], index: 0, kind: input, shape index: {}]   ;;  %s313_s5 = inlined_call_operand.vmem [shape: f32[32,32], index: 5, kind: output, shape index: {}]  }
   0x1   :  { %v55_v0 = vld [vmem:[%s308_s3 + $0x78] sm:$0xff]  ;;  %v54_v1 = vld [vmem:[%s308_s3 + $0x70] sm:$0xff]  ;;  %v53_v2 = vld [vmem:[%s308_s3 + $0x68] sm:$0xff] }
   0x2   :  { %60 = vmatpush.msra.mxu0 %v55_v0  ;;  %134 = vmatpush.msra.mxu1 %v55_v0  ;;  %v52_v3 = vld [vmem:[%s308_s3 + $0x60] sm:$0xff]  ;;  %v51_v4 = vld [vmem:[%s308_s3 + $0x58] sm:$0xff]  ;;  %v50_v5 = vld [vmem:[%s308_s3 + $0x50] sm:$0xff] }
   0x3   :  { %135 = vmatpush.msra.mxu2 %v55_v0  ;;  %136 = vmatpush.msra.mxu3 %v55_v0  ;;  %v49_v6 = vld [vmem:[%s308_s3 + $0x48] sm:$0xff]  ;;  %v48_v7 = vld [vmem:[%s308_s3 + $0x40] sm:$0xff]  ;;  %v47_v8 = vld [vmem:[%s308_s3 + $0x38] sm:$0xff] }
   0x4   :  { %61 = vmatpush.msra.mxu0 %v54_v1  ;;  %137 = vmatpush.msra.mxu1 %v54_v1  ;;  %v46_v9 = vld [vmem:[%s308_s3 + $0x30] sm:$0xff]  ;;  %v45_v10 = vld [vmem:[%s308_s3 + $0x28] sm:$0xff]  ;;  %v44_v11 = vld [vmem:[%s308_s3 + $0x20] sm:$0xff] }
   0x5   :  { %138 = vmatpush.msra.mxu2 %v54_v1  ;;  %139 = vmatpush.msra.mxu3 %v54_v1  ;;  %v182_v12 = vld [vmem:[%s309_s1] ss:$0 sm:$0xff]  ;;  %v43_v13 = vld [vmem:[%s308_s3 + $0x18] sm:$0xff]  ;;  %v21_v15 = vld [vmem:[%s312_s0 + $0x8] sm:$0xff] }
   0x6   :  { %62 = vmatpush.msra.mxu0 %v53_v2  ;;  %140 = vmatpush.msra.mxu1 %v53_v2  ;;  %v20_v14 = vld [vmem:[%s312_s0] sm:$0xff]  ;;  %v22_v16 = vld [vmem:[%s312_s0 + $0x10] sm:$0xff]  ;;  %v23_v17 = vld [vmem:[%s312_s0 + $0x18] sm:$0xff]  ;;  %v29_v21 = vmul.f32 %v182_v12, %v21_v15 }
   0x7   :  { %141 = vmatpush.msra.mxu2 %v53_v2  ;;  %142 = vmatpush.msra.mxu3 %v53_v2  ;;  %v42_v18 = vld [vmem:[%s308_s3 + $0x10] sm:$0xff]  ;;  %v28_v19 = vmul.f32 %v182_v12, %v20_v14  ;;  %v183_v20 = vld [vmem:[%s310_s2] ss:$0 sm:$0xff]  ;;  %v41_v22 = vld [vmem:[%s308_s3 + $0x8] sm:$0xff]  ;;  %v30_v23 = vmul.f32 %v182_v12, %v22_v16  ;;  %v31_v24 = vmul.f32 %v182_v12, %v23_v17 }
   0x8   :  { %63 = vmatpush.msra.mxu0 %v52_v3  ;;  %143 = vmatpush.msra.mxu1 %v52_v3  ;;  %v40_v25 = vld [vmem:[%s308_s3] sm:$0xff]  ;;  %v37_v27 = vadd.f32 %v183_v20, %v29_v21 }
   0x9   :  { %144 = vmatpush.msra.mxu2 %v52_v3  ;;  %145 = vmatpush.msra.mxu3 %v52_v3  ;;  %v36_v26 = vadd.f32 %v183_v20, %v28_v19  ;;  %v38_v28 = vadd.f32 %v183_v20, %v30_v23  ;;  %v39_v29 = vadd.f32 %v183_v20, %v31_v24  ;;  %v184_v30 = vld [vmem:[%s311_s4] ss:$0 sm:$0xff] }
   0xa   :  { %64 = vmatpush.msra.mxu0 %v51_v4  ;;  %146 = vmatpush.msra.mxu1 %v51_v4 }
   0xb   :  { %147 = vmatpush.msra.mxu2 %v51_v4  ;;  %148 = vmatpush.msra.mxu3 %v51_v4 }
   0xc   :  { %65 = vmatpush.msra.mxu0 %v50_v5  ;;  %149 = vmatpush.msra.mxu1 %v50_v5 }
   0xd   :  { %150 = vmatpush.msra.mxu2 %v50_v5  ;;  %151 = vmatpush.msra.mxu3 %v50_v5 }
   0xe   :  { %66 = vmatpush.msra.mxu0 %v49_v6  ;;  %152 = vmatpush.msra.mxu1 %v49_v6 }
   0xf   :  { %153 = vmatpush.msra.mxu2 %v49_v6  ;;  %154 = vmatpush.msra.mxu3 %v49_v6 }
  0x10   :  { %67 = vmatpush.msra.mxu0 %v48_v7  ;;  %155 = vmatpush.msra.mxu1 %v48_v7 }
  0x11   :  { %156 = vmatpush.msra.mxu2 %v48_v7  ;;  %157 = vmatpush.msra.mxu3 %v48_v7 }
  0x12   :  { %68 = vmatpush.msra.mxu0 %v47_v8  ;;  %158 = vmatpush.msra.mxu1 %v47_v8 }
  0x13   :  { %159 = vmatpush.msra.mxu2 %v47_v8  ;;  %160 = vmatpush.msra.mxu3 %v47_v8 }
  0x14   :  { %69 = vmatpush.msra.mxu0 %v46_v9  ;;  %161 = vmatpush.msra.mxu1 %v46_v9 }
  0x15   :  { %162 = vmatpush.msra.mxu2 %v46_v9  ;;  %163 = vmatpush.msra.mxu3 %v46_v9 }
  0x16   :  { %70 = vmatpush.msra.mxu0 %v45_v10  ;;  %164 = vmatpush.msra.mxu1 %v45_v10 }
  0x17   :  { %165 = vmatpush.msra.mxu2 %v45_v10  ;;  %166 = vmatpush.msra.mxu3 %v45_v10 }
  0x18   :  { %71 = vmatpush.msra.mxu0 %v44_v11  ;;  %167 = vmatpush.msra.mxu1 %v44_v11 }
  0x19   :  { %168 = vmatpush.msra.mxu2 %v44_v11  ;;  %169 = vmatpush.msra.mxu3 %v44_v11 }
  0x1a   :  { %72 = vmatpush.msra.mxu0 %v43_v13  ;;  %170 = vmatpush.msra.mxu1 %v43_v13 }
  0x1b   :  { %171 = vmatpush.msra.mxu2 %v43_v13  ;;  %172 = vmatpush.msra.mxu3 %v43_v13 }
  0x1c   :  { %73 = vmatpush.msra.mxu0 %v42_v18  ;;  %173 = vmatpush.msra.mxu1 %v42_v18 }
  0x1d   :  { %174 = vmatpush.msra.mxu2 %v42_v18  ;;  %175 = vmatpush.msra.mxu3 %v42_v18 }
  0x1e   :  { %74 = vmatpush.msra.mxu0 %v41_v22  ;;  %176 = vmatpush.msra.mxu1 %v41_v22 }
  0x1f   :  { %177 = vmatpush.msra.mxu2 %v41_v22  ;;  %178 = vmatpush.msra.mxu3 %v41_v22 }
  0x20   :  { %75 = vmatpush.msra.mxu0 %v40_v25  ;;  %179 = vmatpush.msra.mxu1 %v40_v25 }
  0x21   :  { %180 = vmatpush.msra.mxu2 %v40_v25  ;;  %181 = vmatpush.msra.mxu3 %v40_v25 }
  0x22   :  { %76 = vmatmul.f32.vlgmr.msra.gmra.mxu0 %v36_v26  ;;  %79 = vmatmul.f32.vlgmr.msra.gmra.mxu1 %v37_v27 }
  0x23   :  { %82 = vmatmul.f32.vlgmr.msra.gmra.mxu2 %v38_v28  ;;  %85 = vmatmul.f32.vlgmr.msra.gmra.mxu3 %v39_v29 }
  0x9f   :  { %v77_v31 = vpop.f32.mrf.mxu0  ;;  %v80_v32 = vpop.f32.mrf.mxu1 }
  0xa0   :  { %v78_v33 = vadd.f32 %v184_v30, %v77_v31  ;;  %v81_v34 = vadd.f32 %v184_v30, %v80_v32 }
  0xa2   :  { %v93_v35 = vmul.f32 0.044715, %v78_v33  ;;  %v94_v36 = vmul.f32 0.044715, %v81_v34  ;;  %v89_v61 = vmul.f32 0.5, %v78_v33  ;;  %v90_v63 = vmul.f32 0.5, %v81_v34 }
  0xa4   :  { %v97_v37 = vmul.f32 %v93_v35, %v78_v33  ;;  %v98_v38 = vmul.f32 %v94_v36, %v81_v34 }
  0xa6   :  { %v101_v39 = vmul.f32 %v97_v37, %v78_v33  ;;  %v102_v40 = vmul.f32 %v98_v38, %v81_v34  ;;  %v83_v41 = vpop.f32.mrf.mxu2  ;;  %v86_v42 = vpop.f32.mrf.mxu3 }
  0xa7   :  { %v84_v43 = vadd.f32 %v184_v30, %v83_v41  ;;  %v87_v44 = vadd.f32 %v184_v30, %v86_v42 }
  0xa8   :  { %v105_v45 = vadd.f32 %v101_v39, %v78_v33  ;;  %v106_v46 = vadd.f32 %v102_v40, %v81_v34 }
  0xa9   :  { %v95_v47 = vmul.f32 0.044715, %v84_v43  ;;  %v96_v48 = vmul.f32 0.044715, %v87_v44  ;;  %v91_v5 = vmul.f32 0.5, %v84_v43  ;;  %v92_v7 = vmul.f32 0.5, %v87_v44 }
  0xaa   :  { %v109_v49 = vmul.f32 0.7978846, %v105_v45  ;;  %v110_v50 = vmul.f32 0.7978846, %v106_v46 }
  0xab   :  { %v99_v51 = vmul.f32 %v95_v47, %v84_v43  ;;  %v100_v52 = vmul.f32 %v96_v48, %v87_v44 }
  0xac   :  { %185 = vtanh.f32 %v109_v49 }
  0xad   :  { %187 = vtanh.f32 %v110_v50  ;;  %v103_v53 = vmul.f32 %v99_v51, %v84_v43  ;;  %v104_v54 = vmul.f32 %v100_v52, %v87_v44 }
  0xaf   :  { %v107_v55 = vadd.f32 %v103_v53, %v84_v43  ;;  %v108_v56 = vadd.f32 %v104_v54, %v87_v44 }
  0xb1   :  { %v111_v57 = vmul.f32 0.7978846, %v107_v55  ;;  %v112_v58 = vmul.f32 0.7978846, %v108_v56 }
  0xb2   :  { %v186_v59 = vpop.eup %185 }
  0xb3   :  { %v188_v60 = vpop.eup %187  ;;  %v117_v62 = vadd.f32 1.0, %v186_v59  ;;  %189 = vtanh.f32 %v111_v57 }
  0xb4   :  { %v118_v0 = vadd.f32 1.0, %v188_v60  ;;  %191 = vtanh.f32 %v112_v58 }
  0xb5   :  { %v121_v1 = vmul.f32 %v117_v62, %v89_v61 }
  0xb6   :  { %v122_v2 = vmul.f32 %v118_v0, %v90_v63 }
  0xb7   :  { %126 = vst.msk [vmem:[%s313_s5] sm:$0xff] %vm125_vm0, %v121_v1 }
  0xb8   :  { %127 = vst.msk [vmem:[%s313_s5 + $0x8] sm:$0xff] %vm125_vm0, %v122_v2 }
  0xb9   :  { %v190_v3 = vpop.eup %189 }
  0xba   :  { %v192_v4 = vpop.eup %191  ;;  %v119_v6 = vadd.f32 1.0, %v190_v3 }
  0xbb   :  { %v120_v8 = vadd.f32 1.0, %v192_v4 }
  0xbc   :  { %v123_v9 = vmul.f32 %v119_v6, %v91_v5 }
  0xbd   :  { %v124_v10 = vmul.f32 %v120_v8, %v92_v7 }
  0xbe   :  { %128 = vst.msk [vmem:[%s313_s5 + $0x10] sm:$0xff] %vm125_vm0, %v123_v9 }
  0xbf   :  { %129 = vst.msk [vmem:[%s313_s5 + $0x18] sm:$0xff] %vm125_vm0, %v124_v10 }

// kernel: torch_model_forward.27
= control target key start
LH: loop header
LB: loop body
LE: loop exit
PB: predicated region body
PF: predicated region fallthrough
CT: control target
= control target key end

     0   :  { %vm48_vm0 = vcmask 261120   ;;  %s244_s3 = inlined_call_operand.vmem [shape: f32[32,32], index: 3, kind: input, shape index: {}]   ;;  %s245_s0 = inlined_call_operand.vmem [shape: f32[32,32], index: 0, kind: input, shape index: {}]   ;;  %s246_s1 = inlined_call_operand.vmem [shape: f32[1,32], index: 1, kind: input, shape index: {}]   ;;  %s247_s2 = inlined_call_operand.vmem [shape: f32[1,32], index: 2, kind: input, shape index: {}]   ;;  %s248_s4 = inlined_call_operand.vmem [shape: f32[1,32], index: 4, kind: input, shape index: {}]   ;;  %s249_s5 = inlined_call_operand.vmem [shape: f32[32,32], index: 5, kind: output, shape index: {}]  }
   0x1   :  { %v43_v0 = vld [vmem:[%s244_s3 + $0x18] sm:$0xff]  ;;  %v42_v1 = vld [vmem:[%s244_s3 + $0x10] sm:$0xff]  ;;  %v41_v2 = vld [vmem:[%s244_s3 + $0x8] sm:$0xff] }
   0x2   :  { %73 = vmatpush.msra.mxu0 %v43_v0  ;;  %138 = vmatpush.msra.mxu1 %v43_v0  ;;  %v20_v3 = vld [vmem:[%s245_s0] sm:$0xff]  ;;  %v21_v6 = vld [vmem:[%s245_s0 + $0x8] sm:$0xff]  ;;  %v22_v7 = vld [vmem:[%s245_s0 + $0x10] sm:$0xff] }
   0x3   :  { %139 = vmatpush.msra.mxu2 %v43_v0  ;;  %140 = vmatpush.msra.mxu3 %v43_v0  ;;  %v150_v4 = vld [vmem:[%s246_s1] ss:$0 sm:$0xff]  ;;  %v23_v8 = vld [vmem:[%s245_s0 + $0x18] sm:$0xff] }
   0x4   :  { %v151_v5 = vld [vmem:[%s247_s2] ss:$0 sm:$0xff]  ;;  %74 = vmatpush.msra.mxu0 %v42_v1  ;;  %141 = vmatpush.msra.mxu1 %v42_v1  ;;  %v28_v10 = vmul.f32 %v150_v4, %v20_v3  ;;  %v29_v11 = vmul.f32 %v150_v4, %v21_v6  ;;  %v30_v12 = vmul.f32 %v150_v4, %v22_v7 }
   0x5   :  { %142 = vmatpush.msra.mxu2 %v42_v1  ;;  %143 = vmatpush.msra.mxu3 %v42_v1  ;;  %v40_v9 = vld [vmem:[%s244_s3] sm:$0xff]  ;;  %v31_v13 = vmul.f32 %v150_v4, %v23_v8 }
   0x6   :  { %75 = vmatpush.msra.mxu0 %v41_v2  ;;  %144 = vmatpush.msra.mxu1 %v41_v2  ;;  %v36_v14 = vadd.f32 %v151_v5, %v28_v10  ;;  %v37_v15 = vadd.f32 %v151_v5, %v29_v11  ;;  %v38_v16 = vadd.f32 %v151_v5, %v30_v12  ;;  %v152_v18 = vld [vmem:[%s248_s4] ss:$0 sm:$0xff] }
   0x7   :  { %145 = vmatpush.msra.mxu2 %v41_v2  ;;  %146 = vmatpush.msra.mxu3 %v41_v2  ;;  %v39_v17 = vadd.f32 %v151_v5, %v31_v13 }
   0x8   :  { %76 = vmatpush.msra.mxu0 %v40_v9  ;;  %147 = vmatpush.msra.mxu1 %v40_v9 }
   0x9   :  { %148 = vmatpush.msra.mxu2 %v40_v9  ;;  %149 = vmatpush.msra.mxu3 %v40_v9 }
   0xa   :  { %134 = vmatmul.msk.f32.vlgmr.msra.gmra.mxu0 %vm48_vm0, %v36_v14  ;;  %135 = vmatmul.msk.f32.vlgmr.msra.gmra.mxu1 %vm48_vm0, %v37_v15 }
   0xb   :  { %136 = vmatmul.msk.f32.vlgmr.msra.gmra.mxu2 %vm48_vm0, %v38_v16  ;;  %137 = vmatmul.msk.f32.vlgmr.msra.gmra.mxu3 %vm48_vm0, %v39_v17 }
  0x87   :  { %v78_v19 = vpop.f32.mrf.mxu0  ;;  %v81_v20 = vpop.f32.mrf.mxu1 }
  0x88   :  { %v79_v21 = vadd.f32 %v152_v18, %v78_v19  ;;  %v82_v22 = vadd.f32 %v152_v18, %v81_v20 }
  0x8a   :  { %v94_v23 = vmul.f32 0.044715, %v79_v21  ;;  %v95_v24 = vmul.f32 0.044715, %v82_v22  ;;  %v90_v49 = vmul.f32 0.5, %v79_v21  ;;  %v91_v51 = vmul.f32 0.5, %v82_v22 }
  0x8c   :  { %v98_v25 = vmul.f32 %v94_v23, %v79_v21  ;;  %v99_v26 = vmul.f32 %v95_v24, %v82_v22 }
  0x8e   :  { %v102_v27 = vmul.f32 %v98_v25, %v79_v21  ;;  %v103_v28 = vmul.f32 %v99_v26, %v82_v22  ;;  %v84_v29 = vpop.f32.mrf.mxu2  ;;  %v87_v30 = vpop.f32.mrf.mxu3 }
  0x8f   :  { %v85_v31 = vadd.f32 %v152_v18, %v84_v29  ;;  %v88_v32 = vadd.f32 %v152_v18, %v87_v30 }
  0x90   :  { %v106_v33 = vadd.f32 %v102_v27, %v79_v21  ;;  %v107_v34 = vadd.f32 %v103_v28, %v82_v22 }
  0x91   :  { %v96_v35 = vmul.f32 0.044715, %v85_v31  ;;  %v97_v36 = vmul.f32 0.044715, %v88_v32  ;;  %v92_v57 = vmul.f32 0.5, %v85_v31  ;;  %v93_v59 = vmul.f32 0.5, %v88_v32 }
  0x92   :  { %v110_v37 = vmul.f32 0.7978846, %v106_v33  ;;  %v111_v38 = vmul.f32 0.7978846, %v107_v34 }
  0x93   :  { %v100_v39 = vmul.f32 %v96_v35, %v85_v31  ;;  %v101_v40 = vmul.f32 %v97_v36, %v88_v32 }
  0x94   :  { %153 = vtanh.f32 %v110_v37 }
  0x95   :  { %155 = vtanh.f32 %v111_v38  ;;  %v104_v41 = vmul.f32 %v100_v39, %v85_v31  ;;  %v105_v42 = vmul.f32 %v101_v40, %v88_v32 }
  0x97   :  { %v108_v43 = vadd.f32 %v104_v41, %v85_v31  ;;  %v109_v44 = vadd.f32 %v105_v42, %v88_v32 }
  0x99   :  { %v112_v45 = vmul.f32 0.7978846, %v108_v43  ;;  %v113_v46 = vmul.f32 0.7978846, %v109_v44 }
  0x9a   :  { %v154_v47 = vpop.eup %153 }
  0x9b   :  { %v156_v48 = vpop.eup %155  ;;  %v118_v50 = vadd.f32 1.0, %v154_v47  ;;  %157 = vtanh.f32 %v112_v45 }
  0x9c   :  { %v119_v52 = vadd.f32 1.0, %v156_v48  ;;  %159 = vtanh.f32 %v113_v46 }
  0x9d   :  { %v122_v53 = vmul.f32 %v118_v50, %v90_v49 }
  0x9e   :  { %v123_v54 = vmul.f32 %v119_v52, %v91_v51 }
  0x9f   :  { %126 = vst.msk [vmem:[%s249_s5] sm:$0xff] %vm48_vm0, %v122_v53 }
  0xa0   :  { %127 = vst.msk [vmem:[%s249_s5 + $0x8] sm:$0xff] %vm48_vm0, %v123_v54 }
  0xa1   :  { %v158_v55 = vpop.eup %157 }
  0xa2   :  { %v160_v56 = vpop.eup %159  ;;  %v120_v58 = vadd.f32 1.0, %v158_v55 }
  0xa3   :  { %v121_v60 = vadd.f32 1.0, %v160_v56 }
  0xa4   :  { %v124_v61 = vmul.f32 %v120_v58, %v92_v57 }
  0xa5   :  { %v125_v62 = vmul.f32 %v121_v60, %v93_v59 }
  0xa6   :  { %128 = vst.msk [vmem:[%s249_s5 + $0x10] sm:$0xff] %vm48_vm0, %v124_v61 }
  0xa7   :  { %129 = vst.msk [vmem:[%s249_s5 + $0x18] sm:$0xff] %vm48_vm0, %v125_v62 }

// kernel: torch_model_forward.32
= control target key start
LH: loop header
LB: loop body
LE: loop exit
PB: predicated region body
PF: predicated region fallthrough
CT: control target
= control target key end

     0   :  { %vm50_vm0 = vcmask 392192   ;;  %vm128_vm1 = vcmask 130048   ;;  %s255_s3 = inlined_call_operand.vmem [shape: f32[48,16], index: 3, kind: input, shape index: {}]   ;;  %s256_s0 = inlined_call_operand.vmem [shape: f32[32,48], index: 0, kind: input, shape index: {}]   ;;  %s257_s1 = inlined_call_operand.vmem [shape: f32[1,48], index: 1, kind: input, shape index: {}]   ;;  %s258_s2 = inlined_call_operand.vmem [shape: f32[1,48], index: 2, kind: input, shape index: {}]   ;;  %s259_s4 = inlined_call_operand.vmem [shape: f32[1,16], index: 4, kind: input, shape index: {}]   ;;  %s260_s5 = inlined_call_operand.vmem [shape: f32[32,16], index: 5, kind: output, shape index: {}]  }
   0x1   :  { %v45_v0 = vld [vmem:[%s255_s3 + $0x28] sm:$0xff]  ;;  %v44_v1 = vld [vmem:[%s255_s3 + $0x20] sm:$0xff]  ;;  %v43_v2 = vld [vmem:[%s255_s3 + $0x18] sm:$0xff] }
   0x2   :  { %73 = vmatpush.msra.mxu0 %v45_v0  ;;  %141 = vmatpush.msra.mxu1 %v45_v0  ;;  %v20_v3 = vld [vmem:[%s256_s0] sm:$0xff]  ;;  %v42_v5 = vld [vmem:[%s255_s3 + $0x10] sm:$0xff]  ;;  %v21_v6 = vld [vmem:[%s256_s0 + $0x8] sm:$0xff] }
   0x3   :  { %142 = vmatpush.msra.mxu2 %v45_v0  ;;  %143 = vmatpush.msra.mxu3 %v45_v0  ;;  %v159_v4 = vld [vmem:[%s257_s1] ss:$0 sm:$0xff]  ;;  %v22_v7 = vld [vmem:[%s256_s0 + $0x10] sm:$0xff]  ;;  %v23_v8 = vld [vmem:[%s256_s0 + $0x18] sm:$0xff] }
   0x4   :  { %74 = vmatpush.msra.mxu0 %v44_v1  ;;  %144 = vmatpush.msra.mxu1 %v44_v1  ;;  %v28_v9 = vmul.f32 %v159_v4, %v20_v3  ;;  %v160_v10 = vld [vmem:[%s258_s2] ss:$0 sm:$0xff]  ;;  %v29_v11 = vmul.f32 %v159_v4, %v21_v6  ;;  %v41_v12 = vld [vmem:[%s255_s3 + $0x8] sm:$0xff]  ;;  %v30_v13 = vmul.f32 %v159_v4, %v22_v7 }
   0x5   :  { %145 = vmatpush.msra.mxu2 %v44_v1  ;;  %146 = vmatpush.msra.mxu3 %v44_v1  ;;  %v31_v14 = vmul.f32 %v159_v4, %v23_v8  ;;  %v40_v15 = vld [vmem:[%s255_s3] sm:$0xff] }
   0x6   :  { %75 = vmatpush.msra.mxu0 %v43_v2  ;;  %147 = vmatpush.msra.mxu1 %v43_v2  ;;  %v36_v16 = vadd.f32 %v160_v10, %v28_v9  ;;  %v37_v17 = vadd.f32 %v160_v10, %v29_v11  ;;  %v38_v18 = vadd.f32 %v160_v10, %v30_v13  ;;  %v161_v20 = vld [vmem:[%s259_s4] ss:$0 sm:$0xff] }
   0x7   :  { %148 = vmatpush.msra.mxu2 %v43_v2  ;;  %149 = vmatpush.msra.mxu3 %v43_v2  ;;  %v39_v19 = vadd.f32 %v160_v10, %v31_v14 }
   0x8   :  { %76 = vmatpush.msra.mxu0 %v42_v5  ;;  %150 = vmatpush.msra.mxu1 %v42_v5 }
   0x9   :  { %151 = vmatpush.msra.mxu2 %v42_v5  ;;  %152 = vmatpush.msra.mxu3 %v42_v5 }
   0xa   :  { %77 = vmatpush.msra.mxu0 %v41_v12  ;;  %153 = vmatpush.msra.mxu1 %v41_v12 }
   0xb   :  { %154 = vmatpush.msra.mxu2 %v41_v12  ;;  %155 = vmatpush.msra.mxu3 %v41_v12 }
   0xc   :  { %78 = vmatpush.msra.mxu0 %v40_v15  ;;  %156 = vmatpush.msra.mxu1 %v40_v15 }
   0xd   :  { %157 = vmatpush.msra.mxu2 %v40_v15  ;;  %158 = vmatpush.msra.mxu3 %v40_v15 }
   0xe   :  { %137 = vmatmul.msk.f32.vlgmr.msra.gmra.mxu0 %vm50_vm0, %v36_v16  ;;  %138 = vmatmul.msk.f32.vlgmr.msra.gmra.mxu1 %vm50_vm0, %v37_v17 }
   0xf   :  { %139 = vmatmul.msk.f32.vlgmr.msra.gmra.mxu2 %vm50_vm0, %v38_v18  ;;  %140 = vmatmul.msk.f32.vlgmr.msra.gmra.mxu3 %vm50_vm0, %v39_v19 }
  0x8b   :  { %v80_v21 = vpop.f32.mrf.mxu0  ;;  %v83_v22 = vpop.f32.mrf.mxu1 }
  0x8c   :  { %v81_v23 = vadd.f32 %v161_v20, %v80_v21  ;;  %v84_v24 = vadd.f32 %v161_v20, %v83_v22 }
  0x8e   :  { %v96_v25 = vmul.f32 0.044715, %v81_v23  ;;  %v97_v26 = vmul.f32 0.044715, %v84_v24  ;;  %v92_v51 = vmul.f32 0.5, %v81_v23  ;;  %v93_v53 = vmul.f32 0.5, %v84_v24 }
  0x90   :  { %v100_v27 = vmul.f32 %v96_v25, %v81_v23  ;;  %v101_v28 = vmul.f32 %v97_v26, %v84_v24 }
  0x92   :  { %v104_v29 = vmul.f32 %v100_v27, %v81_v23  ;;  %v105_v30 = vmul.f32 %v101_v28, %v84_v24  ;;  %v86_v31 = vpop.f32.mrf.mxu2  ;;  %v89_v32 = vpop.f32.mrf.mxu3 }
  0x93   :  { %v87_v33 = vadd.f32 %v161_v20, %v86_v31  ;;  %v90_v34 = vadd.f32 %v161_v20, %v89_v32 }
  0x94   :  { %v108_v35 = vadd.f32 %v104_v29, %v81_v23  ;;  %v109_v36 = vadd.f32 %v105_v30, %v84_v24 }
  0x95   :  { %v98_v37 = vmul.f32 0.044715, %v87_v33  ;;  %v99_v38 = vmul.f32 0.044715, %v90_v34  ;;  %v94_v59 = vmul.f32 0.5, %v87_v33  ;;  %v95_v61 = vmul.f32 0.5, %v90_v34 }
  0x96   :  { %v112_v39 = vmul.f32 0.7978846, %v108_v35  ;;  %v113_v40 = vmul.f32 0.7978846, %v109_v36 }
  0x97   :  { %v102_v41 = vmul.f32 %v98_v37, %v87_v33  ;;  %v103_v42 = vmul.f32 %v99_v38, %v90_v34 }
  0x98   :  { %162 = vtanh.f32 %v112_v39 }
  0x99   :  { %164 = vtanh.f32 %v113_v40  ;;  %v106_v43 = vmul.f32 %v102_v41, %v87_v33  ;;  %v107_v44 = vmul.f32 %v103_v42, %v90_v34 }
  0x9b   :  { %v110_v45 = vadd.f32 %v106_v43, %v87_v33  ;;  %v111_v46 = vadd.f32 %v107_v44, %v90_v34 }
  0x9d   :  { %v114_v47 = vmul.f32 0.7978846, %v110_v45  ;;  %v115_v48 = vmul.f32 0.7978846, %v111_v46 }
  0x9e   :  { %v163_v49 = vpop.eup %162 }
  0x9f   :  { %v165_v50 = vpop.eup %164  ;;  %v120_v52 = vadd.f32 1.0, %v163_v49  ;;  %166 = vtanh.f32 %v114_v47 }
  0xa0   :  { %v121_v54 = vadd.f32 1.0, %v165_v50  ;;  %168 = vtanh.f32 %v115_v48 }
  0xa1   :  { %v124_v55 = vmul.f32 %v120_v52, %v92_v51 }
  0xa2   :  { %v125_v56 = vmul.f32 %v121_v54, %v93_v53 }
  0xa3   :  { %129 = vst.msk [vmem:[%s260_s5] sm:$0xff] %vm128_vm1, %v124_v55 }
  0xa4   :  { %130 = vst.msk [vmem:[%s260_s5 + $0x8] sm:$0xff] %vm128_vm1, %v125_v56 }
  0xa5   :  { %v167_v57 = vpop.eup %166 }
  0xa6   :  { %v169_v58 = vpop.eup %168  ;;  %v122_v60 = vadd.f32 1.0, %v167_v57 }
  0xa7   :  { %v123_v62 = vadd.f32 1.0, %v169_v58 }
  0xa8   :  { %v126_v63 = vmul.f32 %v122_v60, %v94_v59 }
  0xa9   :  { %v127_v0 = vmul.f32 %v123_v62, %v95_v61 }
  0xaa   :  { %131 = vst.msk [vmem:[%s260_s5 + $0x10] sm:$0xff] %vm128_vm1, %v126_v63 }
  0xab   :  { %132 = vst.msk [vmem:[%s260_s5 + $0x18] sm:$0xff] %vm128_vm1, %v127_v0 }

// kernel: torch_model_forward.33
= control target key start
LH: loop header
LB: loop body
LE: loop exit
PB: predicated region body
PF: predicated region fallthrough
CT: control target
= control target key end

     0   :  { %vm46_vm0 = vcmask 130048   ;;  %s186_s3 = inlined_call_operand.vmem [shape: f32[16,16], index: 3, kind: input, shape index: {}]   ;;  %s187_s0 = inlined_call_operand.vmem [shape: f32[32,16], index: 0, kind: input, shape index: {}]   ;;  %s188_s1 = inlined_call_operand.vmem [shape: f32[1,16], index: 1, kind: input, shape index: {}]   ;;  %s189_s2 = inlined_call_operand.vmem [shape: f32[1,16], index: 2, kind: input, shape index: {}]   ;;  %s190_s4 = inlined_call_operand.vmem [shape: f32[1,16], index: 4, kind: input, shape index: {}]   ;;  %s191_s5 = inlined_call_operand.vmem [shape: f32[32,16], index: 5, kind: output, shape index: {}]  }
   0x1   :  { %v41_v0 = vld [vmem:[%s186_s3 + $0x8] sm:$0xff]  ;;  %v40_v1 = vld [vmem:[%s186_s3] sm:$0xff]  ;;  %v22_v2 = vld [vmem:[%s187_s0 + $0x10] sm:$0xff] }
   0x2   :  { %101 = vmatpush.msra.mxu2 %v41_v0  ;;  %102 = vmatpush.msra.mxu3 %v41_v0  ;;  %v106_v3 = vld [vmem:[%s188_s1] ss:$0 sm:$0xff]  ;;  %v23_v5 = vld [vmem:[%s187_s0 + $0x18] sm:$0xff]  ;;  %v21_v10 = vld [vmem:[%s187_s0 + $0x8] sm:$0xff] }
   0x3   :  { %v107_v4 = vld [vmem:[%s189_s2] ss:$0 sm:$0xff]  ;;  %73 = vmatpush.msra.mxu0 %v41_v0  ;;  %100 = vmatpush.msra.mxu1 %v41_v0  ;;  %v30_v7 = vmul.f32 %v106_v3, %v22_v2  ;;  %v31_v8 = vmul.f32 %v106_v3, %v23_v5  ;;  %v29_v11 = vmul.f32 %v106_v3, %v21_v10 }
   0x4   :  { %v20_v6 = vld [vmem:[%s187_s0] sm:$0xff]  ;;  %104 = vmatpush.msra.mxu2 %v40_v1  ;;  %105 = vmatpush.msra.mxu3 %v40_v1 }
   0x5   :  { %v28_v9 = vmul.f32 %v106_v3, %v20_v6  ;;  %74 = vmatpush.msra.mxu0 %v40_v1  ;;  %103 = vmatpush.msra.mxu1 %v40_v1  ;;  %v38_v12 = vadd.f32 %v107_v4, %v30_v7  ;;  %v39_v13 = vadd.f32 %v107_v4, %v31_v8  ;;  %v108_v16 = vld [vmem:[%s190_s4] ss:$0 sm:$0xff] }
   0x6   :  { %v37_v15 = vadd.f32 %v107_v4, %v29_v11 }
   0x7   :  { %v36_v14 = vadd.f32 %v107_v4, %v28_v9  ;;  %98 = vmatmul.msk.f32.vlgmr.msra.gmra.mxu2 %vm46_vm0, %v38_v12  ;;  %99 = vmatmul.msk.f32.vlgmr.msra.gmra.mxu3 %vm46_vm0, %v39_v13 }
   0x8   :  { %97 = vmatmul.msk.f32.vlgmr.msra.gmra.mxu1 %vm46_vm0, %v37_v15 }
   0x9   :  { %96 = vmatmul.msk.f32.vlgmr.msra.gmra.mxu0 %vm46_vm0, %v36_v14 }
  0x85   :  { %v79_v18 = vpop.f32.mrf.mxu1 }
  0x86   :  { %v76_v17 = vpop.f32.mrf.mxu0  ;;  %v80_v20 = vadd.f32 %v108_v16, %v79_v18 }
  0x87   :  { %v77_v19 = vadd.f32 %v108_v16, %v76_v17 }
  0x88   :  { %89 = vst.msk [vmem:[%s191_s5 + $0x8] sm:$0xff] %vm46_vm0, %v80_v20 }
  0x89   :  { %88 = vst.msk [vmem:[%s191_s5] sm:$0xff] %vm46_vm0, %v77_v19 }
  0x8a   :  { %v82_v21 = vpop.f32.mrf.mxu2  ;;  %v85_v22 = vpop.f32.mrf.mxu3 }
  0x8b   :  { %v83_v23 = vadd.f32 %v108_v16, %v82_v21  ;;  %v86_v24 = vadd.f32 %v108_v16, %v85_v22 }
  0x8d   :  { %90 = vst.msk [vmem:[%s191_s5 + $0x10] sm:$0xff] %vm46_vm0, %v83_v23 }
  0x8e   :  { %91 = vst.msk [vmem:[%s191_s5 + $0x18] sm:$0xff] %vm46_vm0, %v86_v24 }

// kernel: torch_model_forward.34
= control target key start
LH: loop header
LB: loop body
LE: loop exit
PB: predicated region body
PF: predicated region fallthrough
CT: control target
= control target key end

     0   :  { %vm12_vm0 = vcmask 319488   ;;  %vm59_vm1 = vcmask 326656   ;;  %v145_v0 = vmov 0.0   ;;  %s208_s0 = inlined_call_operand.vmem [shape: f32[64,40], index: 0, kind: input, shape index: {}]   ;;  %s209_s1 = inlined_call_operand.vmem [shape: f32[2,40], index: 1, kind: output, shape index: {}]  }
   0x1   :  { %13 = vst.msk [vmem:[#allocation2] sm:$0x1] %vm12_vm0, %v145_v0  ;;  %v15_v1 = vld [vmem:[%s208_s0] sm:$0xff]  ;;  %v16_v2 = vld [vmem:[%s208_s0 + $0x8] sm:$0xff]  ;;  %v17_v3 = vld [vmem:[%s208_s0 + $0x10] sm:$0xff] }
   0x2   :  { %14 = vst.msk [vmem:[#allocation3] sm:$0x1] %vm12_vm0, %v145_v0  ;;  %v18_v4 = vld [vmem:[%s208_s0 + $0x18] sm:$0xff]  ;;  %v60_v5 = vsel %vm59_vm1, %v15_v1, 0.0  ;;  %v85_v6 = vmul.f32 %v15_v1, %v15_v1  ;;  %v86_v7 = vmul.f32 %v16_v2, %v16_v2  ;;  %v19_v8 = vld [vmem:[%s208_s0 + $0x20] sm:$0xff]  ;;  %v61_v9 = vsel %vm59_vm1, %v16_v2, 0.0 }
   0x3   :  { %v63_v10 = vsel %vm59_vm1, %v17_v3, 0.0  ;;  %v87_v11 = vmul.f32 %v17_v3, %v17_v3  ;;  %v62_v12 = vadd.f32 %v61_v9, %v60_v5  ;;  %v20_v13 = vld [vmem:[%s208_s0 + $0x28] sm:$0xff]  ;;  %v65_v14 = vsel %vm59_vm1, %v18_v4, 0.0  ;;  %v21_v20 = vld [vmem:[%s208_s0 + $0x30] sm:$0xff]  ;;  %v22_v27 = vld [vmem:[%s208_s0 + $0x38] sm:$0xff] }
   0x4   :  { %v88_v15 = vmul.f32 %v18_v4, %v18_v4  ;;  %v89_v17 = vmul.f32 %v19_v8, %v19_v8  ;;  %v93_v18 = vsel %vm59_vm1, %v85_v6, 0.0  ;;  %v94_v19 = vsel %vm59_vm1, %v86_v7, 0.0 }
   0x5   :  { %v64_v16 = vadd.f32 %v63_v10, %v62_v12  ;;  %v67_v21 = vsel %vm59_vm1, %v19_v8, 0.0  ;;  %v95_v22 = vadd.f32 %v94_v19, %v93_v18  ;;  %v96_v23 = vsel %vm59_vm1, %v87_v11, 0.0 }
   0x6   :  { %v90_v25 = vmul.f32 %v20_v13, %v20_v13  ;;  %v98_v26 = vsel %vm59_vm1, %v88_v15, 0.0  ;;  %v69_v28 = vsel %vm59_vm1, %v20_v13, 0.0  ;;  %v91_v31 = vmul.f32 %v21_v20, %v21_v20 }
   0x7   :  { %v66_v24 = vadd.f32 %v65_v14, %v64_v16  ;;  %v97_v29 = vadd.f32 %v96_v23, %v95_v22  ;;  %v100_v32 = vsel %vm59_vm1, %v89_v17, 0.0  ;;  %v71_v33 = vsel %vm59_vm1, %v21_v20, 0.0 }
   0x8   :  { %v92_v36 = vmul.f32 %v22_v27, %v22_v27  ;;  %v102_v37 = vsel %vm59_vm1, %v90_v25, 0.0  ;;  %v73_v38 = vsel %vm59_vm1, %v22_v27, 0.0  ;;  %v104_v41 = vsel %vm59_vm1, %v91_v31, 0.0  ;;  %v58_v55 = vld [vmem:[#allocation2] sm:$0x1] }
   0x9   :  { %v68_v30 = vadd.f32 %v67_v21, %v66_v24  ;;  %v99_v34 = vadd.f32 %v98_v26, %v97_v29  ;;  %v84_v60 = vld [vmem:[#allocation3] sm:$0x1] }
   0xa   :  { %v106_v44 = vsel %vm59_vm1, %v92_v36, 0.0 }
   0xb   :  { %v70_v35 = vadd.f32 %v69_v28, %v68_v30  ;;  %v101_v39 = vadd.f32 %v100_v32, %v99_v34 }
   0xd   :  { %v72_v40 = vadd.f32 %v71_v33, %v70_v35  ;;  %v103_v42 = vadd.f32 %v102_v37, %v101_v39 }
   0xf   :  { %v74_v43 = vadd.f32 %v73_v38, %v72_v40  ;;  %v105_v45 = vadd.f32 %v104_v41, %v103_v42 }
  0x11   :  { %v75_v46 = vrot.slane %v74_v43, 4  ;;  %v107_v47 = vadd.f32 %v106_v44, %v105_v45 }
  0x13   :  { %v76_v48 = vadd.f32 %v75_v46, %v74_v43  ;;  %v108_v49 = vrot.slane %v107_v47, 4 }
  0x15   :  { %v77_v50 = vrot.slane %v76_v48, 2  ;;  %v109_v51 = vadd.f32 %v108_v49, %v107_v47 }
  0x17   :  { %v78_v52 = vadd.f32 %v77_v50, %v76_v48  ;;  %v110_v53 = vrot.slane %v109_v51, 2 }
  0x19   :  { %v79_v54 = vrot.slane %v78_v52, 1  ;;  %v111_v56 = vadd.f32 %v110_v53, %v109_v51 }
  0x1b   :  { %v80_v57 = vadd.f32 %v79_v54, %v78_v52  ;;  %v112_v58 = vrot.slane %v111_v56, 1 }
  0x1d   :  { %v81_v59 = vadd.f32 %v80_v57, %v58_v55  ;;  %v113_v61 = vadd.f32 %v112_v58, %v111_v56 }
  0x1f   :  { %83 = vst.msk [vmem:[#allocation2] sm:$0x1] %vm12_vm0, %v81_v59  ;;  %v114_v62 = vadd.f32 %v113_v61, %v84_v60 }
  0x21   :  { %115 = vst.msk [vmem:[#allocation3] sm:$0x1] %vm12_vm0, %v114_v62 }
  0x26   :  { %v119_v63 = vld [vmem:[#allocation2] sm:$0x1] }
  0x27   :  { %v120_v0 = vmul.f32 0.015625, %v119_v63 }
  0x28   :  { %v121_v1 = vld [vmem:[#allocation3] sm:$0x1] }
  0x29   :  { %v123_v2 = vmul.f32 %v120_v0, %v120_v0  ;;  %125 = vst.msk [vmem:[%s209_s1] sm:$0x1] %vm12_vm0, %v120_v0  ;;  %v122_v3 = vmul.f32 0.015625, %v121_v1 }
  0x2b   :  { %v124_v4 = vsub.f32 %v122_v3, %v123_v2 }
  0x2d   :  { %v126_v5 = vadd.f32 1e-05, %v124_v4 }
  0x2f   :  { %143 = vrsqrt.f32 %v126_v5  ;;  %vm133_vm3 = vweird.f32 %v126_v5 }
  0x35   :  { %v144_v6 = vpop.eup %143 }
  0x36   :  { %v128_v7 = vmul.f32 %v144_v6, %v126_v5  ;;  %vm134_vm2 = vweird.f32 %v144_v6 }
  0x37   :  { %vm135_vm4 = vmor %vm133_vm3, %vm134_vm2 }
  0x38   :  { %v129_v8 = vmul.f32 %v144_v6, %v128_v7 }
  0x3a   :  { %v130_v9 = vmul.f32 0.5, %v129_v8 }
  0x3c   :  { %v131_v10 = vsub.f32 1.5, %v130_v9 }
  0x3e   :  { %v132_v11 = vmul.f32 %v144_v6, %v131_v10 }
  0x40   :  { %v136_v12 = vsel %vm135_vm4, %v144_v6, %v132_v11 }
  0x41   :  { %137 = vst.msk [vmem:[%s209_s1 + $0x1] sm:$0x1] %vm12_vm0, %v136_v12 }

// kernel: torch_model_forward.36
= control target key start
LH: loop header
LB: loop body
LE: loop exit
PB: predicated region body
PF: predicated region fallthrough
CT: control target
= control target key end

     0   :  { %vm60_vm0 = vcmask 261120   ;;  %vm126_vm1 = vcmask 130048   ;;  %s277_s3 = inlined_call_operand.vmem [shape: f32[32,16], index: 3, kind: input, shape index: {}]   ;;  %s278_s0 = inlined_call_operand.vmem [shape: f32[64,32], index: 0, kind: input, shape index: {}]   ;;  %s279_s1 = inlined_call_operand.vmem [shape: f32[1,32], index: 1, kind: input, shape index: {}]   ;;  %s280_s2 = inlined_call_operand.vmem [shape: f32[1,32], index: 2, kind: input, shape index: {}]   ;;  %s281_s4 = inlined_call_operand.vmem [shape: f32[1,16], index: 4, kind: input, shape index: {}]   ;;  %s282_s5 = inlined_call_operand.vmem [shape: f32[64,16], index: 5, kind: output, shape index: {}]  }
   0x1   :  { %v55_v0 = vld [vmem:[%s277_s3 + $0x18] sm:$0xff]  ;;  %v54_v1 = vld [vmem:[%s277_s3 + $0x10] sm:$0xff]  ;;  %v53_v2 = vld [vmem:[%s277_s3 + $0x8] sm:$0xff] }
   0x2   :  { %148 = vmatpush.msra.mxu2 %v55_v0  ;;  %149 = vmatpush.msra.mxu3 %v55_v0  ;;  %v24_v3 = vld [vmem:[%s278_s0 + $0x20] sm:$0xff]  ;;  %v26_v6 = vld [vmem:[%s278_s0 + $0x30] sm:$0xff]  ;;  %v25_v14 = vld [vmem:[%s278_s0 + $0x28] sm:$0xff] }
   0x3   :  { %97 = vmatpush.msra.mxu0 %v55_v0  ;;  %147 = vmatpush.msra.mxu1 %v55_v0  ;;  %v159_v4 = vld [vmem:[%s279_s1] ss:$0 sm:$0xff]  ;;  %v22_v8 = vld [vmem:[%s278_s0 + $0x10] sm:$0xff]  ;;  %v27_v15 = vld [vmem:[%s278_s0 + $0x38] sm:$0xff] }
   0x4   :  { %v160_v5 = vld [vmem:[%s280_s2] ss:$0 sm:$0xff]  ;;  %151 = vmatpush.msra.mxu2 %v54_v1  ;;  %152 = vmatpush.msra.mxu3 %v54_v1  ;;  %v36_v10 = vmul.f32 %v159_v4, %v24_v3  ;;  %v38_v11 = vmul.f32 %v159_v4, %v26_v6  ;;  %v34_v13 = vmul.f32 %v159_v4, %v22_v8  ;;  %v21_v20 = vld [vmem:[%s278_s0 + $0x8] sm:$0xff]  ;;  %v23_v21 = vld [vmem:[%s278_s0 + $0x18] sm:$0xff] }
   0x5   :  { %v20_v7 = vld [vmem:[%s278_s0] sm:$0xff]  ;;  %98 = vmatpush.msra.mxu0 %v54_v1  ;;  %150 = vmatpush.msra.mxu1 %v54_v1  ;;  %v37_v22 = vmul.f32 %v159_v4, %v25_v14  ;;  %v39_v23 = vmul.f32 %v159_v4, %v27_v15  ;;  %v33_v24 = vmul.f32 %v159_v4, %v21_v20 }
   0x6   :  { %v52_v9 = vld [vmem:[%s277_s3] sm:$0xff]  ;;  %v32_v12 = vmul.f32 %v159_v4, %v20_v7  ;;  %154 = vmatpush.msra.mxu2 %v53_v2  ;;  %155 = vmatpush.msra.mxu3 %v53_v2  ;;  %v48_v16 = vadd.f32 %v160_v5, %v36_v10  ;;  %v50_v17 = vadd.f32 %v160_v5, %v38_v11 }
   0x7   :  { %99 = vmatpush.msra.mxu0 %v53_v2  ;;  %153 = vmatpush.msra.mxu1 %v53_v2  ;;  %v46_v19 = vadd.f32 %v160_v5, %v34_v13  ;;  %v35_v25 = vmul.f32 %v159_v4, %v23_v21  ;;  %v49_v26 = vadd.f32 %v160_v5, %v37_v22  ;;  %v161_v30 = vld [vmem:[%s281_s4] ss:$0 sm:$0xff] }
   0x8   :  { %v44_v18 = vadd.f32 %v160_v5, %v32_v12  ;;  %157 = vmatpush.msra.mxu2 %v52_v9  ;;  %158 = vmatpush.msra.mxu3 %v52_v9  ;;  %v51_v27 = vadd.f32 %v160_v5, %v39_v23  ;;  %v45_v28 = vadd.f32 %v160_v5, %v33_v24 }
   0x9   :  { %143 = vmatmul.msk.f32.vlgmr.msra.gmra.mxu2 %vm60_vm0, %v48_v16  ;;  %145 = vmatmul.msk.f32.vlgmr.msra.gmra.mxu3 %vm60_vm0, %v50_v17  ;;  %v47_v29 = vadd.f32 %v160_v5, %v35_v25 }
   0xa   :  { %100 = vmatpush.msra.mxu0 %v52_v9  ;;  %156 = vmatpush.msra.mxu1 %v52_v9 }
   0xb   :  { %139 = vmatmul.msk.f32.vlgmr.msra.gmra.mxu0 %vm60_vm0, %v44_v18  ;;  %141 = vmatmul.msk.f32.vlgmr.msra.gmra.mxu1 %vm60_vm0, %v46_v19 }
  0x11   :  { %144 = vmatmul.msk.f32.gmra.mxu2 %vm60_vm0, %v49_v26  ;;  %146 = vmatmul.msk.f32.gmra.mxu3 %vm60_vm0, %v51_v27 }
  0x13   :  { %140 = vmatmul.msk.f32.gmra.mxu0 %vm60_vm0, %v45_v28  ;;  %142 = vmatmul.msk.f32.gmra.mxu1 %vm60_vm0, %v47_v29 }
  0x88   :  { %v102_v31 = vpop.f32.mrf.mxu0  ;;  %v108_v32 = vpop.f32.mrf.mxu1 }
  0x89   :  { %v103_v33 = vadd.f32 %v161_v30, %v102_v31  ;;  %v109_v34 = vadd.f32 %v161_v30, %v108_v32 }
  0x8b   :  { %127 = vst.msk [vmem:[%s282_s5] sm:$0xff] %vm126_vm1, %v103_v33 }
  0x8c   :  { %129 = vst.msk [vmem:[%s282_s5 + $0x10] sm:$0xff] %vm126_vm1, %v109_v34  ;;  %v114_v35 = vpop.f32.mrf.mxu2  ;;  %v120_v36 = vpop.f32.mrf.mxu3 }
  0x8d   :  { %v115_v37 = vadd.f32 %v161_v30, %v114_v35  ;;  %v121_v38 = vadd.f32 %v161_v30, %v120_v36 }
  0x8f   :  { %131 = vst.msk [vmem:[%s282_s5 + $0x20] sm:$0xff] %vm126_vm1, %v115_v37 }
  0x90   :  { %133 = vst.msk [vmem:[%s282_s5 + $0x30] sm:$0xff] %vm126_vm1, %v121_v38  ;;  %v105_v39 = vpop.f32.mrf.mxu0  ;;  %v111_v40 = vpop.f32.mrf.mxu1 }
  0x91   :  { %v106_v41 = vadd.f32 %v161_v30, %v105_v39  ;;  %v112_v42 = vadd.f32 %v161_v30, %v111_v40 }
  0x93   :  { %128 = vst.msk [vmem:[%s282_s5 + $0x8] sm:$0xff] %vm126_vm1, %v106_v41 }
  0x94   :  { %130 = vst.msk [vmem:[%s282_s5 + $0x18] sm:$0xff] %vm126_vm1, %v112_v42  ;;  %v117_v43 = vpop.f32.mrf.mxu2  ;;  %v123_v44 = vpop.f32.mrf.mxu3 }
  0x95   :  { %v118_v45 = vadd.f32 %v161_v30, %v117_v43  ;;  %v124_v46 = vadd.f32 %v161_v30, %v123_v44 }
  0x97   :  { %132 = vst.msk [vmem:[%s282_s5 + $0x28] sm:$0xff] %vm126_vm1, %v118_v45 }
  0x98   :  { %134 = vst.msk [vmem:[%s282_s5 + $0x38] sm:$0xff] %vm126_vm1, %v124_v46 }

// kernel: torch_model_forward.35
= control target key start
LH: loop header
LB: loop body
LE: loop exit
PB: predicated region body
PF: predicated region fallthrough
CT: control target
= control target key end

     0   :  { %vm61_vm0 = vcmask 326656   ;;  %vm199_vm1 = vcmask 261120   ;;  %s393_s3 = inlined_call_operand.vmem [shape: f32[40,32], index: 3, kind: input, shape index: {}]   ;;  %s394_s0 = inlined_call_operand.vmem [shape: f32[64,40], index: 0, kind: input, shape index: {}]   ;;  %s395_s1 = inlined_call_operand.vmem [shape: f32[1,40], index: 1, kind: input, shape index: {}]   ;;  %s396_s2 = inlined_call_operand.vmem [shape: f32[1,40], index: 2, kind: input, shape index: {}]   ;;  %s397_s4 = inlined_call_operand.vmem [shape: f32[1,32], index: 4, kind: input, shape index: {}]   ;;  %s398_s5 = inlined_call_operand.vmem [shape: f32[64,32], index: 5, kind: output, shape index: {}]  }
   0x1   :  { %v56_v0 = vld [vmem:[%s393_s3 + $0x20] sm:$0xff]  ;;  %v55_v1 = vld [vmem:[%s393_s3 + $0x18] sm:$0xff]  ;;  %v54_v2 = vld [vmem:[%s393_s3 + $0x10] sm:$0xff] }
   0x2   :  { %97 = vmatpush.msra.mxu0 %v56_v0  ;;  %220 = vmatpush.msra.mxu1 %v56_v0  ;;  %v20_v3 = vld [vmem:[%s394_s0] sm:$0xff]  ;;  %v22_v6 = vld [vmem:[%s394_s0 + $0x10] sm:$0xff]  ;;  %v53_v8 = vld [vmem:[%s393_s3 + $0x8] sm:$0xff] }
   0x3   :  { %221 = vmatpush.msra.mxu2 %v56_v0  ;;  %222 = vmatpush.msra.mxu3 %v56_v0  ;;  %v235_v4 = vld [vmem:[%s395_s1] ss:$0 sm:$0xff]  ;;  %v26_v12 = vld [vmem:[%s394_s0 + $0x30] sm:$0xff]  ;;  %v21_v19 = vld [vmem:[%s394_s0 + $0x8] sm:$0xff] }
   0x4   :  { %98 = vmatpush.msra.mxu0 %v55_v1  ;;  %223 = vmatpush.msra.mxu1 %v55_v1  ;;  %v236_v5 = vld [vmem:[%s396_s2] ss:$0 sm:$0xff]  ;;  %v32_v9 = vmul.f32 %v235_v4, %v20_v3  ;;  %v34_v10 = vmul.f32 %v235_v4, %v22_v6  ;;  %v38_v13 = vmul.f32 %v235_v4, %v26_v12  ;;  %v23_v20 = vld [vmem:[%s394_s0 + $0x18] sm:$0xff]  ;;  %v25_v21 = vld [vmem:[%s394_s0 + $0x28] sm:$0xff] }
   0x5   :  { %v24_v7 = vld [vmem:[%s394_s0 + $0x20] sm:$0xff]  ;;  %224 = vmatpush.msra.mxu2 %v55_v1  ;;  %225 = vmatpush.msra.mxu3 %v55_v1  ;;  %v27_v22 = vld [vmem:[%s394_s0 + $0x38] sm:$0xff]  ;;  %v33_v23 = vmul.f32 %v235_v4, %v21_v19  ;;  %v35_v24 = vmul.f32 %v235_v4, %v23_v20  ;;  %v37_v25 = vmul.f32 %v235_v4, %v25_v21 }
   0x6   :  { %v36_v11 = vmul.f32 %v235_v4, %v24_v7  ;;  %99 = vmatpush.msra.mxu0 %v54_v2  ;;  %226 = vmatpush.msra.mxu1 %v54_v2  ;;  %v52_v14 = vld [vmem:[%s393_s3] sm:$0xff]  ;;  %v44_v15 = vadd.f32 %v236_v5, %v32_v9  ;;  %v46_v16 = vadd.f32 %v236_v5, %v34_v10 }
   0x7   :  { %227 = vmatpush.msra.mxu2 %v54_v2  ;;  %228 = vmatpush.msra.mxu3 %v54_v2  ;;  %v50_v18 = vadd.f32 %v236_v5, %v38_v13  ;;  %v39_v26 = vmul.f32 %v235_v4, %v27_v22  ;;  %v45_v27 = vadd.f32 %v236_v5, %v33_v23  ;;  %v237_v31 = vld [vmem:[%s397_s4] ss:$0 sm:$0xff] }
   0x8   :  { %100 = vmatpush.msra.mxu0 %v53_v8  ;;  %229 = vmatpush.msra.mxu1 %v53_v8  ;;  %v48_v17 = vadd.f32 %v236_v5, %v36_v11  ;;  %v47_v28 = vadd.f32 %v236_v5, %v35_v24  ;;  %v49_v29 = vadd.f32 %v236_v5, %v37_v25 }
   0x9   :  { %230 = vmatpush.msra.mxu2 %v53_v8  ;;  %231 = vmatpush.msra.mxu3 %v53_v8  ;;  %v51_v30 = vadd.f32 %v236_v5, %v39_v26 }
   0xa   :  { %101 = vmatpush.msra.mxu0 %v52_v14  ;;  %232 = vmatpush.msra.mxu1 %v52_v14 }
   0xb   :  { %233 = vmatpush.msra.mxu2 %v52_v14  ;;  %234 = vmatpush.msra.mxu3 %v52_v14 }
   0xc   :  { %212 = vmatmul.msk.f32.vlgmr.msra.gmra.mxu0 %vm61_vm0, %v44_v15  ;;  %214 = vmatmul.msk.f32.vlgmr.msra.gmra.mxu1 %vm61_vm0, %v46_v16 }
   0xd   :  { %216 = vmatmul.msk.f32.vlgmr.msra.gmra.mxu2 %vm61_vm0, %v48_v17  ;;  %218 = vmatmul.msk.f32.vlgmr.msra.gmra.mxu3 %vm61_vm0, %v50_v18 }
  0x14   :  { %213 = vmatmul.msk.f32.gmra.mxu0 %vm61_vm0, %v45_v27  ;;  %215 = vmatmul.msk.f32.gmra.mxu1 %vm61_vm0, %v47_v28 }
  0x15   :  { %217 = vmatmul.msk.f32.gmra.mxu2 %vm61_vm0, %v49_v29  ;;  %219 = vmatmul.msk.f32.gmra.mxu3 %vm61_vm0, %v51_v30 }
  0x89   :  { %v103_v32 = vpop.f32.mrf.mxu0  ;;  %v109_v33 = vpop.f32.mrf.mxu1 }
  0x8a   :  { %v104_v34 = vadd.f32 %v237_v31, %v103_v32  ;;  %v110_v35 = vadd.f32 %v237_v31, %v109_v33 }
  0x8c   :  { %v135_v36 = vmul.f32 0.044715, %v104_v34  ;;  %v137_v37 = vmul.f32 0.044715, %v110_v35  ;;  %v127_v12 = vmul.f32 0.5, %v104_v34  ;;  %v129_v18 = vmul.f32 0.5, %v110_v35 }
  0x8e   :  { %v143_v38 = vmul.f32 %v135_v36, %v104_v34  ;;  %v145_v39 = vmul.f32 %v137_v37, %v110_v35 }
  0x90   :  { %v151_v40 = vmul.f32 %v143_v38, %v104_v34  ;;  %v153_v41 = vmul.f32 %v145_v39, %v110_v35  ;;  %v115_v42 = vpop.f32.mrf.mxu2  ;;  %v121_v43 = vpop.f32.mrf.mxu3 }
  0x91   :  { %v116_v44 = vadd.f32 %v237_v31, %v115_v42  ;;  %v340_v45 = vadd.f32 %v237_v31, %v121_v43  ;;  %v106_v46 = vpop.f32.mrf.mxu0  ;;  %v112_v47 = vpop.f32.mrf.mxu1 }
  0x92   :  { %v159_v48 = vadd.f32 %v151_v40, %v104_v34  ;;  %v161_v49 = vadd.f32 %v153_v41, %v110_v35  ;;  %v342_v50 = vadd.f32 %v237_v31, %v106_v46  ;;  %v344_v51 = vadd.f32 %v237_v31, %v112_v47 }
  0x93   :  { %v139_v52 = vmul.f32 0.044715, %v116_v44  ;;  %v141_v53 = vmul.f32 0.044715, %v340_v45  ;;  %v131_v32 = vmul.f32 0.5, %v116_v44  ;;  %v133_v36 = vmul.f32 0.5, %v340_v45 }
  0x94   :  { %v167_v54 = vmul.f32 0.7978846, %v159_v48  ;;  %v169_v55 = vmul.f32 0.7978846, %v161_v49  ;;  %v136_v58 = vmul.f32 0.044715, %v342_v50 }
  0x95   :  { %v147_v56 = vmul.f32 %v139_v52, %v116_v44  ;;  %v149_v57 = vmul.f32 %v141_v53, %v340_v45  ;;  %v138_v59 = vmul.f32 0.044715, %v344_v51  ;;  %v128_v41 = vmul.f32 0.5, %v342_v50 }
  0x96   :  { %238 = vtanh.f32 %v167_v54  ;;  %v144_v62 = vmul.f32 %v136_v58, %v342_v50  ;;  %v130_v46 = vmul.f32 0.5, %v344_v51 }
  0x97   :  { %240 = vtanh.f32 %v169_v55  ;;  %v155_v60 = vmul.f32 %v147_v56, %v116_v44  ;;  %v157_v61 = vmul.f32 %v149_v57, %v340_v45  ;;  %v146_v63 = vmul.f32 %v138_v59, %v344_v51 }
  0x98   :  { %v118_v0 = vpop.f32.mrf.mxu2  ;;  %v124_v1 = vpop.f32.mrf.mxu3  ;;  %v152_v4 = vmul.f32 %v144_v62, %v342_v50 }
  0x99   :  { %v163_v2 = vadd.f32 %v155_v60, %v116_v44  ;;  %v165_v3 = vadd.f32 %v157_v61, %v340_v45  ;;  %v119_v5 = vadd.f32 %v237_v31, %v118_v0  ;;  %v154_v6 = vmul.f32 %v146_v63, %v344_v51 }
  0x9a   :  { %v125_v7 = vadd.f32 %v237_v31, %v124_v1  ;;  %v160_v10 = vadd.f32 %v152_v4, %v342_v50 }
  0x9b   :  { %v171_v8 = vmul.f32 0.7978846, %v163_v2  ;;  %v173_v9 = vmul.f32 0.7978846, %v165_v3  ;;  %v162_v13 = vadd.f32 %v154_v6, %v344_v51  ;;  %v140_v14 = vmul.f32 0.044715, %v119_v5 }
  0x9c   :  { %v239_v11 = vpop.eup %238  ;;  %v142_v15 = vmul.f32 0.044715, %v125_v7  ;;  %v168_v19 = vmul.f32 0.7978846, %v160_v10  ;;  %v132_v50 = vmul.f32 0.5, %v119_v5  ;;  %v134_v52 = vmul.f32 0.5, %v125_v7 }
  0x9d   :  { %v241_v16 = vpop.eup %240  ;;  %v183_v17 = vadd.f32 1.0, %v239_v11  ;;  %242 = vtanh.f32 %v171_v8  ;;  %v170_v21 = vmul.f32 0.7978846, %v162_v13  ;;  %v148_v22 = vmul.f32 %v140_v14, %v119_v5 }
  0x9e   :  { %v185_v20 = vadd.f32 1.0, %v241_v16  ;;  %244 = vtanh.f32 %v173_v9  ;;  %v150_v24 = vmul.f32 %v142_v15, %v125_v7 }
  0x9f   :  { %v191_v23 = vmul.f32 %v183_v17, %v127_v12  ;;  %246 = vtanh.f32 %v168_v19  ;;  %v156_v26 = vmul.f32 %v148_v22, %v119_v5 }
  0xa0   :  { %v193_v25 = vmul.f32 %v185_v20, %v129_v18  ;;  %248 = vtanh.f32 %v170_v21  ;;  %v158_v27 = vmul.f32 %v150_v24, %v125_v7 }
  0xa1   :  { %200 = vst.msk [vmem:[%s398_s5] sm:$0xff] %vm199_vm1, %v191_v23  ;;  %v164_v28 = vadd.f32 %v156_v26, %v119_v5 }
  0xa2   :  { %202 = vst.msk [vmem:[%s398_s5 + $0x10] sm:$0xff] %vm199_vm1, %v193_v25  ;;  %v166_v30 = vadd.f32 %v158_v27, %v125_v7 }
  0xa3   :  { %v243_v29 = vpop.eup %242  ;;  %v172_v34 = vmul.f32 0.7978846, %v164_v28 }
  0xa4   :  { %v245_v31 = vpop.eup %244  ;;  %v187_v33 = vadd.f32 1.0, %v243_v29  ;;  %v174_v38 = vmul.f32 0.7978846, %v166_v30 }
  0xa5   :  { %v247_v35 = vpop.eup %246  ;;  %v189_v37 = vadd.f32 1.0, %v245_v31  ;;  %250 = vtanh.f32 %v172_v34 }
  0xa6   :  { %v249_v39 = vpop.eup %248  ;;  %v195_v40 = vmul.f32 %v187_v33, %v131_v32  ;;  %v184_v42 = vadd.f32 1.0, %v247_v35  ;;  %252 = vtanh.f32 %v174_v38 }
  0xa7   :  { %v197_v43 = vmul.f32 %v189_v37, %v133_v36  ;;  %v186_v47 = vadd.f32 1.0, %v249_v39 }
  0xa8   :  { %204 = vst.msk [vmem:[%s398_s5 + $0x20] sm:$0xff] %vm199_vm1, %v195_v40  ;;  %v192_v44 = vmul.f32 %v184_v42, %v128_v41 }
  0xa9   :  { %206 = vst.msk [vmem:[%s398_s5 + $0x30] sm:$0xff] %vm199_vm1, %v197_v43  ;;  %v194_v45 = vmul.f32 %v186_v47, %v130_v46 }
  0xaa   :  { %201 = vst.msk [vmem:[%s398_s5 + $0x8] sm:$0xff] %vm199_vm1, %v192_v44 }
  0xab   :  { %203 = vst.msk [vmem:[%s398_s5 + $0x18] sm:$0xff] %vm199_vm1, %v194_v45  ;;  %v251_v48 = vpop.eup %250 }
  0xac   :  { %v253_v49 = vpop.eup %252  ;;  %v188_v51 = vadd.f32 1.0, %v251_v48 }
  0xad   :  { %v190_v53 = vadd.f32 1.0, %v253_v49 }
  0xae   :  { %v196_v54 = vmul.f32 %v188_v51, %v132_v50 }
  0xaf   :  { %v198_v55 = vmul.f32 %v190_v53, %v134_v52 }
  0xb0   :  { %205 = vst.msk [vmem:[%s398_s5 + $0x28] sm:$0xff] %vm199_vm1, %v196_v54 }
  0xb1   :  { %207 = vst.msk [vmem:[%s398_s5 + $0x38] sm:$0xff] %vm199_vm1, %v198_v55 }

// kernel: torch_model_forward.37
= control target key start
LH: loop header
LB: loop body
LE: loop exit
PB: predicated region body
PF: predicated region fallthrough
CT: control target
= control target key end

     0   :  { %vm63_vm0 = vcmask 457728   ;;  %vm201_vm1 = vcmask 523264   ;;  %s407_s3 = inlined_call_operand.vmem [shape: f32[56,64], index: 3, kind: input, shape index: {}]   ;;  %s408_s1 = inlined_call_operand.vmem [shape: f32[1,56], index: 1, kind: input, shape index: {}]   ;;  %s409_s0 = inlined_call_operand.vmem [shape: f32[64,56], index: 0, kind: input, shape index: {}]   ;;  %s410_s2 = inlined_call_operand.vmem [shape: f32[1,56], index: 2, kind: input, shape index: {}]   ;;  %s411_s4 = inlined_call_operand.vmem [shape: f32[1,64], index: 4, kind: input, shape index: {}]   ;;  %s412_s5 = inlined_call_operand.vmem [shape: f32[64,64], index: 5, kind: output, shape index: {}]  }
   0x1   :  { %v58_v0 = vld [vmem:[%s407_s3 + $0x30] sm:$0xff]  ;;  %v57_v1 = vld [vmem:[%s407_s3 + $0x28] sm:$0xff]  ;;  %v56_v2 = vld [vmem:[%s407_s3 + $0x20] sm:$0xff] }
   0x2   :  { %97 = vmatpush.msra.mxu0 %v58_v0  ;;  %222 = vmatpush.msra.mxu1 %v58_v0  ;;  %v243_v3 = vld [vmem:[%s408_s1] ss:$0 sm:$0xff]  ;;  %v55_v4 = vld [vmem:[%s407_s3 + $0x18] sm:$0xff]  ;;  %v22_v6 = vld [vmem:[%s409_s0 + $0x10] sm:$0xff] }
   0x3   :  { %223 = vmatpush.msra.mxu2 %v58_v0  ;;  %224 = vmatpush.msra.mxu3 %v58_v0  ;;  %v20_v5 = vld [vmem:[%s409_s0] sm:$0xff]  ;;  %v26_v8 = vld [vmem:[%s409_s0 + $0x30] sm:$0xff]  ;;  %v34_v12 = vmul.f32 %v243_v3, %v22_v6  ;;  %v53_v13 = vld [vmem:[%s407_s3 + $0x8] sm:$0xff] }
   0x4   :  { %98 = vmatpush.msra.mxu0 %v57_v1  ;;  %225 = vmatpush.msra.mxu1 %v57_v1  ;;  %v24_v7 = vld [vmem:[%s409_s0 + $0x20] sm:$0xff]  ;;  %v54_v9 = vld [vmem:[%s407_s3 + $0x10] sm:$0xff]  ;;  %v32_v10 = vmul.f32 %v243_v3, %v20_v5  ;;  %v38_v15 = vmul.f32 %v243_v3, %v26_v8  ;;  %v21_v21 = vld [vmem:[%s409_s0 + $0x8] sm:$0xff] }
   0x5   :  { %226 = vmatpush.msra.mxu2 %v57_v1  ;;  %227 = vmatpush.msra.mxu3 %v57_v1  ;;  %v244_v11 = vld [vmem:[%s410_s2] ss:$0 sm:$0xff]  ;;  %v36_v14 = vmul.f32 %v243_v3, %v24_v7  ;;  %v23_v22 = vld [vmem:[%s409_s0 + $0x18] sm:$0xff]  ;;  %v25_v23 = vld [vmem:[%s409_s0 + $0x28] sm:$0xff]  ;;  %v33_v25 = vmul.f32 %v243_v3, %v21_v21 }
   0x6   :  { %99 = vmatpush.msra.mxu0 %v56_v2  ;;  %228 = vmatpush.msra.mxu1 %v56_v2  ;;  %v52_v16 = vld [vmem:[%s407_s3] sm:$0xff]  ;;  %v44_v17 = vadd.f32 %v244_v11, %v32_v10  ;;  %v46_v18 = vadd.f32 %v244_v11, %v34_v12  ;;  %v50_v20 = vadd.f32 %v244_v11, %v38_v15  ;;  %v27_v24 = vld [vmem:[%s409_s0 + $0x38] sm:$0xff] }
   0x7   :  { %229 = vmatpush.msra.mxu2 %v56_v2  ;;  %230 = vmatpush.msra.mxu3 %v56_v2  ;;  %v48_v19 = vadd.f32 %v244_v11, %v36_v14  ;;  %v35_v26 = vmul.f32 %v243_v3, %v23_v22  ;;  %v37_v27 = vmul.f32 %v243_v3, %v25_v23  ;;  %v245_v33 = vld [vmem:[%s411_s4] ss:$0 sm:$0xff] }
   0x8   :  { %100 = vmatpush.msra.mxu0 %v55_v4  ;;  %231 = vmatpush.msra.mxu1 %v55_v4  ;;  %v39_v28 = vmul.f32 %v243_v3, %v27_v24  ;;  %v45_v29 = vadd.f32 %v244_v11, %v33_v25 }
   0x9   :  { %232 = vmatpush.msra.mxu2 %v55_v4  ;;  %233 = vmatpush.msra.mxu3 %v55_v4  ;;  %v47_v30 = vadd.f32 %v244_v11, %v35_v26  ;;  %v49_v31 = vadd.f32 %v244_v11, %v37_v27 }
   0xa   :  { %101 = vmatpush.msra.mxu0 %v54_v9  ;;  %234 = vmatpush.msra.mxu1 %v54_v9  ;;  %v51_v32 = vadd.f32 %v244_v11, %v39_v28 }
   0xb   :  { %235 = vmatpush.msra.mxu2 %v54_v9  ;;  %236 = vmatpush.msra.mxu3 %v54_v9 }
   0xc   :  { %102 = vmatpush.msra.mxu0 %v53_v13  ;;  %237 = vmatpush.msra.mxu1 %v53_v13 }
   0xd   :  { %238 = vmatpush.msra.mxu2 %v53_v13  ;;  %239 = vmatpush.msra.mxu3 %v53_v13 }
   0xe   :  { %103 = vmatpush.msra.mxu0 %v52_v16  ;;  %240 = vmatpush.msra.mxu1 %v52_v16 }
   0xf   :  { %241 = vmatpush.msra.mxu2 %v52_v16  ;;  %242 = vmatpush.msra.mxu3 %v52_v16 }
  0x10   :  { %214 = vmatmul.msk.f32.vlgmr.msra.gmra.mxu0 %vm63_vm0, %v44_v17  ;;  %216 = vmatmul.msk.f32.vlgmr.msra.gmra.mxu1 %vm63_vm0, %v46_v18 }
  0x11   :  { %218 = vmatmul.msk.f32.vlgmr.msra.gmra.mxu2 %vm63_vm0, %v48_v19  ;;  %220 = vmatmul.msk.f32.vlgmr.msra.gmra.mxu3 %vm63_vm0, %v50_v20 }
  0x18   :  { %215 = vmatmul.msk.f32.gmra.mxu0 %vm63_vm0, %v45_v29  ;;  %217 = vmatmul.msk.f32.gmra.mxu1 %vm63_vm0, %v47_v30 }
  0x19   :  { %219 = vmatmul.msk.f32.gmra.mxu2 %vm63_vm0, %v49_v31  ;;  %221 = vmatmul.msk.f32.gmra.mxu3 %vm63_vm0, %v51_v32 }
  0x8d   :  { %v105_v34 = vpop.f32.mrf.mxu0  ;;  %v111_v35 = vpop.f32.mrf.mxu1 }
  0x8e   :  { %v106_v36 = vadd.f32 %v245_v33, %v105_v34  ;;  %v112_v37 = vadd.f32 %v245_v33, %v111_v35 }
  0x90   :  { %v137_v38 = vmul.f32 0.044715, %v106_v36  ;;  %v139_v39 = vmul.f32 0.044715, %v112_v37  ;;  %v129_v14 = vmul.f32 0.5, %v106_v36  ;;  %v131_v20 = vmul.f32 0.5, %v112_v37 }
  0x92   :  { %v145_v40 = vmul.f32 %v137_v38, %v106_v36  ;;  %v147_v41 = vmul.f32 %v139_v39, %v112_v37 }
  0x94   :  { %v153_v42 = vmul.f32 %v145_v40, %v106_v36  ;;  %v155_v43 = vmul.f32 %v147_v41, %v112_v37  ;;  %v117_v44 = vpop.f32.mrf.mxu2  ;;  %v123_v45 = vpop.f32.mrf.mxu3 }
  0x95   :  { %v118_v46 = vadd.f32 %v245_v33, %v117_v44  ;;  %v354_v47 = vadd.f32 %v245_v33, %v123_v45  ;;  %v108_v48 = vpop.f32.mrf.mxu0  ;;  %v114_v49 = vpop.f32.mrf.mxu1 }
  0x96   :  { %v161_v50 = vadd.f32 %v153_v42, %v106_v36  ;;  %v163_v51 = vadd.f32 %v155_v43, %v112_v37  ;;  %v356_v52 = vadd.f32 %v245_v33, %v108_v48  ;;  %v358_v53 = vadd.f32 %v245_v33, %v114_v49 }
  0x97   :  { %v141_v54 = vmul.f32 0.044715, %v118_v46  ;;  %v143_v55 = vmul.f32 0.044715, %v354_v47  ;;  %v133_v34 = vmul.f32 0.5, %v118_v46  ;;  %v135_v38 = vmul.f32 0.5, %v354_v47 }
  0x98   :  { %v169_v56 = vmul.f32 0.7978846, %v161_v50  ;;  %v171_v57 = vmul.f32 0.7978846, %v163_v51  ;;  %v138_v60 = vmul.f32 0.044715, %v356_v52 }
  0x99   :  { %v149_v58 = vmul.f32 %v141_v54, %v118_v46  ;;  %v151_v59 = vmul.f32 %v143_v55, %v354_v47  ;;  %v140_v61 = vmul.f32 0.044715, %v358_v53  ;;  %v130_v43 = vmul.f32 0.5, %v356_v52 }
  0x9a   :  { %246 = vtanh.f32 %v169_v56  ;;  %v146_v0 = vmul.f32 %v138_v60, %v356_v52  ;;  %v132_v48 = vmul.f32 0.5, %v358_v53 }
  0x9b   :  { %248 = vtanh.f32 %v171_v57  ;;  %v157_v62 = vmul.f32 %v149_v58, %v118_v46  ;;  %v159_v63 = vmul.f32 %v151_v59, %v354_v47  ;;  %v148_v1 = vmul.f32 %v140_v61, %v358_v53 }
  0x9c   :  { %v120_v2 = vpop.f32.mrf.mxu2  ;;  %v126_v3 = vpop.f32.mrf.mxu3  ;;  %v154_v6 = vmul.f32 %v146_v0, %v356_v52 }
  0x9d   :  { %v165_v4 = vadd.f32 %v157_v62, %v118_v46  ;;  %v167_v5 = vadd.f32 %v159_v63, %v354_v47  ;;  %v121_v7 = vadd.f32 %v245_v33, %v120_v2  ;;  %v156_v8 = vmul.f32 %v148_v1, %v358_v53 }
  0x9e   :  { %v127_v9 = vadd.f32 %v245_v33, %v126_v3  ;;  %v162_v12 = vadd.f32 %v154_v6, %v356_v52 }
  0x9f   :  { %v173_v10 = vmul.f32 0.7978846, %v165_v4  ;;  %v175_v11 = vmul.f32 0.7978846, %v167_v5  ;;  %v164_v15 = vadd.f32 %v156_v8, %v358_v53  ;;  %v142_v16 = vmul.f32 0.044715, %v121_v7 }
  0xa0   :  { %v247_v13 = vpop.eup %246  ;;  %v144_v17 = vmul.f32 0.044715, %v127_v9  ;;  %v170_v21 = vmul.f32 0.7978846, %v162_v12  ;;  %v134_v52 = vmul.f32 0.5, %v121_v7  ;;  %v136_v54 = vmul.f32 0.5, %v127_v9 }
  0xa1   :  { %v249_v18 = vpop.eup %248  ;;  %v185_v19 = vadd.f32 1.0, %v247_v13  ;;  %250 = vtanh.f32 %v173_v10  ;;  %v172_v23 = vmul.f32 0.7978846, %v164_v15  ;;  %v150_v24 = vmul.f32 %v142_v16, %v121_v7 }
  0xa2   :  { %v187_v22 = vadd.f32 1.0, %v249_v18  ;;  %252 = vtanh.f32 %v175_v11  ;;  %v152_v26 = vmul.f32 %v144_v17, %v127_v9 }
  0xa3   :  { %v193_v25 = vmul.f32 %v185_v19, %v129_v14  ;;  %254 = vtanh.f32 %v170_v21  ;;  %v158_v28 = vmul.f32 %v150_v24, %v121_v7 }
  0xa4   :  { %v195_v27 = vmul.f32 %v187_v22, %v131_v20  ;;  %256 = vtanh.f32 %v172_v23  ;;  %v160_v29 = vmul.f32 %v152_v26, %v127_v9 }
  0xa5   :  { %202 = vst.msk [vmem:[%s412_s5] sm:$0xff] %vm201_vm1, %v193_v25  ;;  %v166_v30 = vadd.f32 %v158_v28, %v121_v7 }
  0xa6   :  { %204 = vst.msk [vmem:[%s412_s5 + $0x10] sm:$0xff] %vm201_vm1, %v195_v27  ;;  %v168_v32 = vadd.f32 %v160_v29, %v127_v9 }
  0xa7   :  { %v251_v31 = vpop.eup %250  ;;  %v174_v36 = vmul.f32 0.7978846, %v166_v30 }
  0xa8   :  { %v253_v33 = vpop.eup %252  ;;  %v189_v35 = vadd.f32 1.0, %v251_v31  ;;  %v176_v40 = vmul.f32 0.7978846, %v168_v32 }
  0xa9   :  { %v255_v37 = vpop.eup %254  ;;  %v191_v39 = vadd.f32 1.0, %v253_v33  ;;  %258 = vtanh.f32 %v174_v36 }
  0xaa   :  { %v257_v41 = vpop.eup %256  ;;  %v197_v42 = vmul.f32 %v189_v35, %v133_v34  ;;  %v186_v44 = vadd.f32 1.0, %v255_v37  ;;  %260 = vtanh.f32 %v176_v40 }
  0xab   :  { %v199_v45 = vmul.f32 %v191_v39, %v135_v38  ;;  %v188_v49 = vadd.f32 1.0, %v257_v41 }
  0xac   :  { %206 = vst.msk [vmem:[%s412_s5 + $0x20] sm:$0xff] %vm201_vm1, %v197_v42  ;;  %v194_v46 = vmul.f32 %v186_v44, %v130_v43 }
  0xad   :  { %208 = vst.msk [vmem:[%s412_s5 + $0x30] sm:$0xff] %vm201_vm1, %v199_v45  ;;  %v196_v47 = vmul.f32 %v188_v49, %v132_v48 }
  0xae   :  { %203 = vst.msk [vmem:[%s412_s5 + $0x8] sm:$0xff] %vm201_vm1, %v194_v46 }
  0xaf   :  { %205 = vst.msk [vmem:[%s412_s5 + $0x18] sm:$0xff] %vm201_vm1, %v196_v47  ;;  %v259_v50 = vpop.eup %258 }
  0xb0   :  { %v261_v51 = vpop.eup %260  ;;  %v190_v53 = vadd.f32 1.0, %v259_v50 }
  0xb1   :  { %v192_v55 = vadd.f32 1.0, %v261_v51 }
  0xb2   :  { %v198_v56 = vmul.f32 %v190_v53, %v134_v52 }
  0xb3   :  { %v200_v57 = vmul.f32 %v192_v55, %v136_v54 }
  0xb4   :  { %207 = vst.msk [vmem:[%s412_s5 + $0x28] sm:$0xff] %vm201_vm1, %v198_v56 }
  0xb5   :  { %209 = vst.msk [vmem:[%s412_s5 + $0x38] sm:$0xff] %vm201_vm1, %v200_v57 }

// kernel: torch_model_forward.38
= control target key start
LH: loop header
LB: loop body
LE: loop exit
PB: predicated region body
PF: predicated region fallthrough
CT: control target
= control target key end

     0   :  { %vm64_vm0 = vcmask 523264   ;;  %vm202_vm1 = vcmask 261120   ;;  %s414_s3 = inlined_call_operand.vmem [shape: f32[64,32], index: 3, kind: input, shape index: {}]   ;;  %s415_s1 = inlined_call_operand.vmem [shape: f32[1,64], index: 1, kind: input, shape index: {}]   ;;  %s416_s2 = inlined_call_operand.vmem [shape: f32[1,64], index: 2, kind: input, shape index: {}]   ;;  %s417_s0 = inlined_call_operand.vmem [shape: f32[64,64], index: 0, kind: input, shape index: {}]   ;;  %s418_s4 = inlined_call_operand.vmem [shape: f32[1,32], index: 4, kind: input, shape index: {}]   ;;  %s419_s5 = inlined_call_operand.vmem [shape: f32[64,32], index: 5, kind: output, shape index: {}]  }
   0x1   :  { %v59_v0 = vld [vmem:[%s414_s3 + $0x38] sm:$0xff]  ;;  %v58_v1 = vld [vmem:[%s414_s3 + $0x30] sm:$0xff]  ;;  %v57_v2 = vld [vmem:[%s414_s3 + $0x28] sm:$0xff] }
   0x2   :  { %97 = vmatpush.msra.mxu0 %v59_v0  ;;  %223 = vmatpush.msra.mxu1 %v59_v0  ;;  %v56_v3 = vld [vmem:[%s414_s3 + $0x20] sm:$0xff]  ;;  %v55_v4 = vld [vmem:[%s414_s3 + $0x18] sm:$0xff]  ;;  %v22_v7 = vld [vmem:[%s417_s0 + $0x10] sm:$0xff] }
   0x3   :  { %224 = vmatpush.msra.mxu2 %v59_v0  ;;  %225 = vmatpush.msra.mxu3 %v59_v0  ;;  %v247_v5 = vld [vmem:[%s415_s1] ss:$0 sm:$0xff]  ;;  %v26_v9 = vld [vmem:[%s417_s0 + $0x30] sm:$0xff]  ;;  %v53_v14 = vld [vmem:[%s414_s3 + $0x8] sm:$0xff] }
   0x4   :  { %98 = vmatpush.msra.mxu0 %v58_v1  ;;  %226 = vmatpush.msra.mxu1 %v58_v1  ;;  %v20_v6 = vld [vmem:[%s417_s0] sm:$0xff]  ;;  %v54_v10 = vld [vmem:[%s414_s3 + $0x10] sm:$0xff]  ;;  %v34_v13 = vmul.f32 %v247_v5, %v22_v7  ;;  %v38_v16 = vmul.f32 %v247_v5, %v26_v9  ;;  %v21_v22 = vld [vmem:[%s417_s0 + $0x8] sm:$0xff] }
   0x5   :  { %227 = vmatpush.msra.mxu2 %v58_v1  ;;  %228 = vmatpush.msra.mxu3 %v58_v1  ;;  %v24_v8 = vld [vmem:[%s417_s0 + $0x20] sm:$0xff]  ;;  %v32_v11 = vmul.f32 %v247_v5, %v20_v6  ;;  %v23_v23 = vld [vmem:[%s417_s0 + $0x18] sm:$0xff]  ;;  %v25_v24 = vld [vmem:[%s417_s0 + $0x28] sm:$0xff]  ;;  %v33_v26 = vmul.f32 %v247_v5, %v21_v22 }
   0x6   :  { %99 = vmatpush.msra.mxu0 %v57_v2  ;;  %229 = vmatpush.msra.mxu1 %v57_v2  ;;  %v248_v12 = vld [vmem:[%s416_s2] ss:$0 sm:$0xff]  ;;  %v36_v15 = vmul.f32 %v247_v5, %v24_v8  ;;  %v27_v25 = vld [vmem:[%s417_s0 + $0x38] sm:$0xff]  ;;  %v35_v27 = vmul.f32 %v247_v5, %v23_v23  ;;  %v37_v28 = vmul.f32 %v247_v5, %v25_v24 }
   0x7   :  { %230 = vmatpush.msra.mxu2 %v57_v2  ;;  %231 = vmatpush.msra.mxu3 %v57_v2  ;;  %v52_v17 = vld [vmem:[%s414_s3] sm:$0xff]  ;;  %v44_v18 = vadd.f32 %v248_v12, %v32_v11  ;;  %v46_v19 = vadd.f32 %v248_v12, %v34_v13  ;;  %v50_v21 = vadd.f32 %v248_v12, %v38_v16 }
   0x8   :  { %100 = vmatpush.msra.mxu0 %v56_v3  ;;  %232 = vmatpush.msra.mxu1 %v56_v3  ;;  %v48_v20 = vadd.f32 %v248_v12, %v36_v15  ;;  %v39_v29 = vmul.f32 %v247_v5, %v27_v25  ;;  %v45_v30 = vadd.f32 %v248_v12, %v33_v26  ;;  %v249_v34 = vld [vmem:[%s418_s4] ss:$0 sm:$0xff] }
   0x9   :  { %233 = vmatpush.msra.mxu2 %v56_v3  ;;  %234 = vmatpush.msra.mxu3 %v56_v3  ;;  %v47_v31 = vadd.f32 %v248_v12, %v35_v27  ;;  %v49_v32 = vadd.f32 %v248_v12, %v37_v28 }
   0xa   :  { %101 = vmatpush.msra.mxu0 %v55_v4  ;;  %235 = vmatpush.msra.mxu1 %v55_v4  ;;  %v51_v33 = vadd.f32 %v248_v12, %v39_v29 }
   0xb   :  { %236 = vmatpush.msra.mxu2 %v55_v4  ;;  %237 = vmatpush.msra.mxu3 %v55_v4 }
   0xc   :  { %102 = vmatpush.msra.mxu0 %v54_v10  ;;  %238 = vmatpush.msra.mxu1 %v54_v10 }
   0xd   :  { %239 = vmatpush.msra.mxu2 %v54_v10  ;;  %240 = vmatpush.msra.mxu3 %v54_v10 }
   0xe   :  { %103 = vmatpush.msra.mxu0 %v53_v14  ;;  %241 = vmatpush.msra.mxu1 %v53_v14 }
   0xf   :  { %242 = vmatpush.msra.mxu2 %v53_v14  ;;  %243 = vmatpush.msra.mxu3 %v53_v14 }
  0x10   :  { %104 = vmatpush.msra.mxu0 %v52_v17  ;;  %244 = vmatpush.msra.mxu1 %v52_v17 }
  0x11   :  { %245 = vmatpush.msra.mxu2 %v52_v17  ;;  %246 = vmatpush.msra.mxu3 %v52_v17 }
  0x12   :  { %215 = vmatmul.msk.f32.vlgmr.msra.gmra.mxu0 %vm64_vm0, %v44_v18  ;;  %217 = vmatmul.msk.f32.vlgmr.msra.gmra.mxu1 %vm64_vm0, %v46_v19 }
  0x13   :  { %219 = vmatmul.msk.f32.vlgmr.msra.gmra.mxu2 %vm64_vm0, %v48_v20  ;;  %221 = vmatmul.msk.f32.vlgmr.msra.gmra.mxu3 %vm64_vm0, %v50_v21 }
  0x1a   :  { %216 = vmatmul.msk.f32.gmra.mxu0 %vm64_vm0, %v45_v30  ;;  %218 = vmatmul.msk.f32.gmra.mxu1 %vm64_vm0, %v47_v31 }
  0x1b   :  { %220 = vmatmul.msk.f32.gmra.mxu2 %vm64_vm0, %v49_v32  ;;  %222 = vmatmul.msk.f32.gmra.mxu3 %vm64_vm0, %v51_v33 }
  0x8f   :  { %v106_v35 = vpop.f32.mrf.mxu0  ;;  %v112_v36 = vpop.f32.mrf.mxu1 }
  0x90   :  { %v107_v37 = vadd.f32 %v249_v34, %v106_v35  ;;  %v113_v38 = vadd.f32 %v249_v34, %v112_v36 }
  0x92   :  { %v138_v39 = vmul.f32 0.044715, %v107_v37  ;;  %v140_v40 = vmul.f32 0.044715, %v113_v38  ;;  %v130_v15 = vmul.f32 0.5, %v107_v37  ;;  %v132_v21 = vmul.f32 0.5, %v113_v38 }
  0x94   :  { %v146_v41 = vmul.f32 %v138_v39, %v107_v37  ;;  %v148_v42 = vmul.f32 %v140_v40, %v113_v38 }
  0x96   :  { %v154_v43 = vmul.f32 %v146_v41, %v107_v37  ;;  %v156_v44 = vmul.f32 %v148_v42, %v113_v38  ;;  %v118_v45 = vpop.f32.mrf.mxu2  ;;  %v124_v46 = vpop.f32.mrf.mxu3 }
  0x97   :  { %v119_v47 = vadd.f32 %v249_v34, %v118_v45  ;;  %v361_v48 = vadd.f32 %v249_v34, %v124_v46  ;;  %v109_v49 = vpop.f32.mrf.mxu0  ;;  %v115_v50 = vpop.f32.mrf.mxu1 }
  0x98   :  { %v162_v51 = vadd.f32 %v154_v43, %v107_v37  ;;  %v164_v52 = vadd.f32 %v156_v44, %v113_v38  ;;  %v363_v53 = vadd.f32 %v249_v34, %v109_v49  ;;  %v365_v54 = vadd.f32 %v249_v34, %v115_v50 }
  0x99   :  { %v142_v55 = vmul.f32 0.044715, %v119_v47  ;;  %v144_v56 = vmul.f32 0.044715, %v361_v48  ;;  %v134_v35 = vmul.f32 0.5, %v119_v47  ;;  %v136_v39 = vmul.f32 0.5, %v361_v48 }
  0x9a   :  { %v170_v57 = vmul.f32 0.7978846, %v162_v51  ;;  %v172_v58 = vmul.f32 0.7978846, %v164_v52  ;;  %v139_v61 = vmul.f32 0.044715, %v363_v53 }
  0x9b   :  { %v150_v59 = vmul.f32 %v142_v55, %v119_v47  ;;  %v152_v60 = vmul.f32 %v144_v56, %v361_v48  ;;  %v141_v62 = vmul.f32 0.044715, %v365_v54  ;;  %v131_v44 = vmul.f32 0.5, %v363_v53 }
  0x9c   :  { %250 = vtanh.f32 %v170_v57  ;;  %v147_v1 = vmul.f32 %v139_v61, %v363_v53  ;;  %v133_v49 = vmul.f32 0.5, %v365_v54 }
  0x9d   :  { %252 = vtanh.f32 %v172_v58  ;;  %v158_v63 = vmul.f32 %v150_v59, %v119_v47  ;;  %v160_v0 = vmul.f32 %v152_v60, %v361_v48  ;;  %v149_v2 = vmul.f32 %v141_v62, %v365_v54 }
  0x9e   :  { %v121_v3 = vpop.f32.mrf.mxu2  ;;  %v127_v4 = vpop.f32.mrf.mxu3  ;;  %v155_v7 = vmul.f32 %v147_v1, %v363_v53 }
  0x9f   :  { %v166_v5 = vadd.f32 %v158_v63, %v119_v47  ;;  %v168_v6 = vadd.f32 %v160_v0, %v361_v48  ;;  %v122_v8 = vadd.f32 %v249_v34, %v121_v3  ;;  %v157_v9 = vmul.f32 %v149_v2, %v365_v54 }
  0xa0   :  { %v128_v10 = vadd.f32 %v249_v34, %v127_v4  ;;  %v163_v13 = vadd.f32 %v155_v7, %v363_v53 }
  0xa1   :  { %v174_v11 = vmul.f32 0.7978846, %v166_v5  ;;  %v176_v12 = vmul.f32 0.7978846, %v168_v6  ;;  %v165_v16 = vadd.f32 %v157_v9, %v365_v54  ;;  %v143_v17 = vmul.f32 0.044715, %v122_v8 }
  0xa2   :  { %v251_v14 = vpop.eup %250  ;;  %v145_v18 = vmul.f32 0.044715, %v128_v10  ;;  %v171_v22 = vmul.f32 0.7978846, %v163_v13  ;;  %v135_v53 = vmul.f32 0.5, %v122_v8  ;;  %v137_v55 = vmul.f32 0.5, %v128_v10 }
  0xa3   :  { %v253_v19 = vpop.eup %252  ;;  %v186_v20 = vadd.f32 1.0, %v251_v14  ;;  %254 = vtanh.f32 %v174_v11  ;;  %v173_v24 = vmul.f32 0.7978846, %v165_v16  ;;  %v151_v25 = vmul.f32 %v143_v17, %v122_v8 }
  0xa4   :  { %v188_v23 = vadd.f32 1.0, %v253_v19  ;;  %256 = vtanh.f32 %v176_v12  ;;  %v153_v27 = vmul.f32 %v145_v18, %v128_v10 }
  0xa5   :  { %v194_v26 = vmul.f32 %v186_v20, %v130_v15  ;;  %258 = vtanh.f32 %v171_v22  ;;  %v159_v29 = vmul.f32 %v151_v25, %v122_v8 }
  0xa6   :  { %v196_v28 = vmul.f32 %v188_v23, %v132_v21  ;;  %260 = vtanh.f32 %v173_v24  ;;  %v161_v30 = vmul.f32 %v153_v27, %v128_v10 }
  0xa7   :  { %203 = vst.msk [vmem:[%s419_s5] sm:$0xff] %vm202_vm1, %v194_v26  ;;  %v167_v31 = vadd.f32 %v159_v29, %v122_v8 }
  0xa8   :  { %205 = vst.msk [vmem:[%s419_s5 + $0x10] sm:$0xff] %vm202_vm1, %v196_v28  ;;  %v169_v33 = vadd.f32 %v161_v30, %v128_v10 }
  0xa9   :  { %v255_v32 = vpop.eup %254  ;;  %v175_v37 = vmul.f32 0.7978846, %v167_v31 }
  0xaa   :  { %v257_v34 = vpop.eup %256  ;;  %v190_v36 = vadd.f32 1.0, %v255_v32  ;;  %v177_v41 = vmul.f32 0.7978846, %v169_v33 }
  0xab   :  { %v259_v38 = vpop.eup %258  ;;  %v192_v40 = vadd.f32 1.0, %v257_v34  ;;  %262 = vtanh.f32 %v175_v37 }
  0xac   :  { %v261_v42 = vpop.eup %260  ;;  %v198_v43 = vmul.f32 %v190_v36, %v134_v35  ;;  %v187_v45 = vadd.f32 1.0, %v259_v38  ;;  %264 = vtanh.f32 %v177_v41 }
  0xad   :  { %v200_v46 = vmul.f32 %v192_v40, %v136_v39  ;;  %v189_v50 = vadd.f32 1.0, %v261_v42 }
  0xae   :  { %207 = vst.msk [vmem:[%s419_s5 + $0x20] sm:$0xff] %vm202_vm1, %v198_v43  ;;  %v195_v47 = vmul.f32 %v187_v45, %v131_v44 }
  0xaf   :  { %209 = vst.msk [vmem:[%s419_s5 + $0x30] sm:$0xff] %vm202_vm1, %v200_v46  ;;  %v197_v48 = vmul.f32 %v189_v50, %v133_v49 }
  0xb0   :  { %204 = vst.msk [vmem:[%s419_s5 + $0x8] sm:$0xff] %vm202_vm1, %v195_v47 }
  0xb1   :  { %206 = vst.msk [vmem:[%s419_s5 + $0x18] sm:$0xff] %vm202_vm1, %v197_v48  ;;  %v263_v51 = vpop.eup %262 }
  0xb2   :  { %v265_v52 = vpop.eup %264  ;;  %v191_v54 = vadd.f32 1.0, %v263_v51 }
  0xb3   :  { %v193_v56 = vadd.f32 1.0, %v265_v52 }
  0xb4   :  { %v199_v57 = vmul.f32 %v191_v54, %v135_v53 }
  0xb5   :  { %v201_v58 = vmul.f32 %v193_v56, %v137_v55 }
  0xb6   :  { %208 = vst.msk [vmem:[%s419_s5 + $0x28] sm:$0xff] %vm202_vm1, %v199_v57 }
  0xb7   :  { %210 = vst.msk [vmem:[%s419_s5 + $0x38] sm:$0xff] %vm202_vm1, %v201_v58 }

// kernel: torch_model_forward.39
= control target key start
LH: loop header
LB: loop body
LE: loop exit
PB: predicated region body
PF: predicated region fallthrough
CT: control target
= control target key end

     0   :  { %vm60_vm0 = vcmask 261120   ;;  %vm126_vm1 = vcmask 31744   ;;  %s605_s3 = inlined_call_operand.vmem [shape: f32[32,4], index: 3, kind: input, shape index: {}]   ;;  %s606_s0 = inlined_call_operand.vmem [shape: f32[64,32], index: 0, kind: input, shape index: {}]   ;;  %s607_s1 = inlined_call_operand.vmem [shape: f32[1,32], index: 1, kind: input, shape index: {}]   ;;  %s608_s2 = inlined_call_operand.vmem [shape: f32[1,32], index: 2, kind: input, shape index: {}]   ;;  %s609_s4 = inlined_call_operand.vmem [shape: f32[1,4], index: 4, kind: input, shape index: {}]   ;;  %s610_s5 = inlined_call_operand.vmem [shape: f32[64,4], index: 5, kind: output, shape index: {}]  }
   0x1   :  { %v55_v0 = vld [vmem:[%s605_s3 + $0x18] sm:$0xff]  ;;  %v54_v1 = vld [vmem:[%s605_s3 + $0x10] sm:$0xff]  ;;  %v53_v2 = vld [vmem:[%s605_s3 + $0x8] sm:$0xff] }
   0x2   :  { %97 = vmatpush.msra.mxu0 %v55_v0  ;;  %339 = vmatpush.msra.mxu1 %v55_v0  ;;  %v20_v3 = vld [vmem:[%s606_s0] sm:$0xff]  ;;  %v22_v6 = vld [vmem:[%s606_s0 + $0x10] sm:$0xff]  ;;  %v21_v14 = vld [vmem:[%s606_s0 + $0x8] sm:$0xff] }
   0x3   :  { %340 = vmatpush.msra.mxu2 %v55_v0  ;;  %341 = vmatpush.msra.mxu3 %v55_v0  ;;  %v351_v4 = vld [vmem:[%s607_s1] ss:$0 sm:$0xff]  ;;  %v26_v8 = vld [vmem:[%s606_s0 + $0x30] sm:$0xff]  ;;  %v23_v18 = vld [vmem:[%s606_s0 + $0x18] sm:$0xff] }
   0x4   :  { %v352_v5 = vld [vmem:[%s608_s2] ss:$0 sm:$0xff]  ;;  %98 = vmatpush.msra.mxu0 %v54_v1  ;;  %342 = vmatpush.msra.mxu1 %v54_v1  ;;  %v32_v10 = vmul.f32 %v351_v4, %v20_v3  ;;  %v34_v11 = vmul.f32 %v351_v4, %v22_v6  ;;  %v38_v13 = vmul.f32 %v351_v4, %v26_v8  ;;  %v25_v19 = vld [vmem:[%s606_s0 + $0x28] sm:$0xff]  ;;  %v27_v22 = vld [vmem:[%s606_s0 + $0x38] sm:$0xff] }
   0x5   :  { %v24_v7 = vld [vmem:[%s606_s0 + $0x20] sm:$0xff]  ;;  %343 = vmatpush.msra.mxu2 %v54_v1  ;;  %344 = vmatpush.msra.mxu3 %v54_v1  ;;  %v33_v21 = vmul.f32 %v351_v4, %v21_v14  ;;  %v35_v23 = vmul.f32 %v351_v4, %v23_v18  ;;  %v37_v24 = vmul.f32 %v351_v4, %v25_v19 }
   0x6   :  { %v52_v9 = vld [vmem:[%s605_s3] sm:$0xff]  ;;  %v36_v12 = vmul.f32 %v351_v4, %v24_v7  ;;  %99 = vmatpush.msra.mxu0 %v53_v2  ;;  %345 = vmatpush.msra.mxu1 %v53_v2  ;;  %v44_v15 = vadd.f32 %v352_v5, %v32_v10  ;;  %v46_v16 = vadd.f32 %v352_v5, %v34_v11 }
   0x7   :  { %346 = vmatpush.msra.mxu2 %v53_v2  ;;  %347 = vmatpush.msra.mxu3 %v53_v2  ;;  %v50_v20 = vadd.f32 %v352_v5, %v38_v13  ;;  %v39_v25 = vmul.f32 %v351_v4, %v27_v22  ;;  %v45_v26 = vadd.f32 %v352_v5, %v33_v21  ;;  %v353_v30 = vld [vmem:[%s609_s4] ss:$0 sm:$0xff] }
   0x8   :  { %v48_v17 = vadd.f32 %v352_v5, %v36_v12  ;;  %100 = vmatpush.msra.mxu0 %v52_v9  ;;  %348 = vmatpush.msra.mxu1 %v52_v9  ;;  %v47_v27 = vadd.f32 %v352_v5, %v35_v23  ;;  %v49_v28 = vadd.f32 %v352_v5, %v37_v24 }
   0x9   :  { %349 = vmatpush.msra.mxu2 %v52_v9  ;;  %331 = vmatmul.msk.f32.vlgmr.msra.gmra.mxu0 %vm60_vm0, %v44_v15  ;;  %v51_v29 = vadd.f32 %v352_v5, %v39_v25 }
   0xa   :  { %333 = vmatmul.msk.f32.vlgmr.msra.gmra.mxu1 %vm60_vm0, %v46_v16  ;;  %335 = vmatmul.msk.f32.vlgmr.msra.gmra.mxu2 %vm60_vm0, %v48_v17 }
   0xb   :  { %350 = vmatpush.msra.mxu3 %v52_v9 }
   0xc   :  { %337 = vmatmul.msk.f32.vlgmr.msra.gmra.mxu3 %vm60_vm0, %v50_v20 }
  0x11   :  { %332 = vmatmul.msk.f32.gmra.mxu0 %vm60_vm0, %v45_v26 }
  0x12   :  { %334 = vmatmul.msk.f32.gmra.mxu1 %vm60_vm0, %v47_v27  ;;  %336 = vmatmul.msk.f32.gmra.mxu2 %vm60_vm0, %v49_v28 }
  0x14   :  { %338 = vmatmul.msk.f32.gmra.mxu3 %vm60_vm0, %v51_v29 }
  0x86   :  { %v102_v31 = vpop.f32.mrf.mxu0 }
  0x87   :  { %v103_v32 = vadd.f32 %v353_v30, %v102_v31  ;;  %v108_v33 = vpop.f32.mrf.mxu1 }
  0x88   :  { %v109_v34 = vadd.f32 %v353_v30, %v108_v33 }
  0x89   :  { %v127_v35 = vsel %vm126_vm1, %v103_v32, -inf }
  0x8a   :  { %v133_v36 = vsel %vm126_vm1, %v109_v34, -inf  ;;  %128 = vmax.xlane.f32.xlu0 %v127_v35 }
  0x8b   :  { %134 = vmax.xlane.f32.xlu1 %v133_v36 }
  0x8d   :  { %v114_v37 = vpop.f32.mrf.mxu2 }
  0x8e   :  { %v115_v38 = vadd.f32 %v353_v30, %v114_v37  ;;  %v105_v39 = vpop.f32.mrf.mxu0 }
  0x8f   :  { %v106_v40 = vadd.f32 %v353_v30, %v105_v39  ;;  %v111_v41 = vpop.f32.mrf.mxu1  ;;  %v120_v42 = vpop.f32.mrf.mxu3 }
  0x90   :  { %v112_v43 = vadd.f32 %v353_v30, %v111_v41  ;;  %v139_v44 = vsel %vm126_vm1, %v115_v38, -inf  ;;  %v121_v47 = vadd.f32 %v353_v30, %v120_v42 }
  0x91   :  { %140 = vmax.xlane.f32.xlu2 %v139_v44  ;;  %v130_v45 = vsel %vm126_vm1, %v106_v40, -inf }
  0x92   :  { %v136_v46 = vsel %vm126_vm1, %v112_v43, -inf  ;;  %131 = vmax.xlane.f32.xlu0 %v130_v45  ;;  %v145_v53 = vsel %vm126_vm1, %v121_v47, -inf }
  0x93   :  { %137 = vmax.xlane.f32.xlu1 %v136_v46 }
  0x95   :  { %v117_v48 = vpop.f32.mrf.mxu2 }
  0x96   :  { %v118_v49 = vadd.f32 %v353_v30, %v117_v48 }
  0x97   :  { %v123_v50 = vpop.f32.mrf.mxu3 }
  0x98   :  { %v124_v51 = vadd.f32 %v353_v30, %v123_v50  ;;  %v142_v52 = vsel %vm126_vm1, %v118_v49, -inf }
  0x99   :  { %143 = vmax.xlane.f32.xlu2 %v142_v52 }
  0x9a   :  { %v148_v54 = vsel %vm126_vm1, %v124_v51, -inf  ;;  %146 = vmax.xlane.f32.xlu0 %v145_v53 }
  0x9b   :  { %149 = vmax.xlane.f32.xlu1 %v148_v54 }
  0xfd   :  { %v129_v55 = vpop.xlane.xlu0 %128 }
  0xfe   :  { %v135_v56 = vpop.xlane.xlu1 %134  ;;  %v151_v57 = vsub.f32 %v103_v32, %v129_v55 }
  0xff   :  { %v153_v58 = vsub.f32 %v109_v34, %v135_v56 }
 0x100   :  { %v159_v59 = vmul.f32 1.442695, %v151_v57 }
 0x101   :  { %v163_v60 = vmul.f32 1.442695, %v153_v58 }
 0x102   :  { %354 = vpow2.f32 %v159_v59 }
 0x103   :  { %356 = vpow2.f32 %v163_v60 }
 0x104   :  { %v141_v61 = vpop.xlane.xlu2 %140 }
 0x105   :  { %v155_v62 = vsub.f32 %v115_v38, %v141_v61  ;;  %v132_v63 = vpop.xlane.xlu0 %131 }
 0x106   :  { %v138_v0 = vpop.xlane.xlu1 %137  ;;  %v152_v3 = vsub.f32 %v106_v40, %v132_v63 }
 0x107   :  { %v167_v1 = vmul.f32 1.442695, %v155_v62  ;;  %v154_v2 = vsub.f32 %v112_v43, %v138_v0 }
 0x108   :  { %v477_v4 = vpop.eup %354  ;;  %v161_v9 = vmul.f32 1.442695, %v152_v3 }
 0x109   :  { %v479_v5 = vpop.eup %356  ;;  %358 = vpow2.f32 %v167_v1  ;;  %v165_v6 = vmul.f32 1.442695, %v154_v2  ;;  %v175_v7 = vsel %vm126_vm1, %v477_v4, 0.0 }
 0x10a   :  { %v181_v8 = vsel %vm126_vm1, %v479_v5, 0.0  ;;  %176 = vadd.xlane.f32.xlu2 %v175_v7 }
 0x10b   :  { %360 = vpow2.f32 %v165_v6  ;;  %182 = vadd.xlane.f32.xlu1 %v181_v8 }
 0x10c   :  { %v144_v10 = vpop.xlane.xlu2 %143  ;;  %362 = vpow2.f32 %v161_v9 }
 0x10d   :  { %v156_v11 = vsub.f32 %v118_v49, %v144_v10  ;;  %v147_v12 = vpop.xlane.xlu0 %146 }
 0x10e   :  { %v150_v13 = vpop.xlane.xlu1 %149  ;;  %v157_v14 = vsub.f32 %v121_v47, %v147_v12 }
 0x10f   :  { %v485_v15 = vpop.eup %358  ;;  %v169_v16 = vmul.f32 1.442695, %v156_v11  ;;  %v158_v17 = vsub.f32 %v124_v51, %v150_v13 }
 0x110   :  { %v171_v18 = vmul.f32 1.442695, %v157_v14  ;;  %v187_v19 = vsel %vm126_vm1, %v485_v15, 0.0 }
 0x111   :  { %v489_v20 = vpop.eup %360  ;;  %364 = vpow2.f32 %v169_v16  ;;  %188 = vadd.xlane.f32.xlu0 %v187_v19  ;;  %v173_v22 = vmul.f32 1.442695, %v158_v17 }
 0x112   :  { %366 = vpow2.f32 %v171_v18  ;;  %v184_v21 = vsel %vm126_vm1, %v489_v20, 0.0  ;;  %v493_v23 = vpop.eup %362 }
 0x113   :  { %185 = vadd.xlane.f32.xlu2 %v184_v21  ;;  %368 = vpow2.f32 %v173_v22  ;;  %v178_v27 = vsel %vm126_vm1, %v493_v23, 0.0 }
 0x117   :  { %v495_v24 = vpop.eup %364 }
 0x118   :  { %v497_v25 = vpop.eup %366  ;;  %v190_v26 = vsel %vm126_vm1, %v495_v24, 0.0 }
 0x119   :  { %191 = vadd.xlane.f32.xlu1 %v190_v26  ;;  %179 = vadd.xlane.f32.xlu0 %v178_v27  ;;  %v193_v28 = vsel %vm126_vm1, %v497_v25, 0.0  ;;  %v505_v29 = vpop.eup %368 }
 0x11a   :  { %v196_v30 = vsel %vm126_vm1, %v505_v29, 0.0 }
 0x11b   :  { %194 = vadd.xlane.f32.xlu2 %v193_v28 }
 0x121   :  { %197 = vadd.xlane.f32.xlu0 %v196_v30 }
 0x17d   :  { %v177_v31 = vpop.xlane.xlu2 %176 }
 0x17e   :  { %v183_v32 = vpop.xlane.xlu1 %182  ;;  %370 = vrcp.f32 %v177_v31  ;;  %v208_v41 = vand.u32 2147483647, %v177_v31  ;;  %v210_v42 = vand.u32 2147483648, %v177_v31  ;;  %vm204_vm5 = vweird.f32 %v177_v31 }
 0x17f   :  { %372 = vrcp.f32 %v183_v32  ;;  %v238_v43 = vand.u32 2147483647, %v183_v32  ;;  %v240_v44 = vand.u32 2147483648, %v183_v32  ;;  %vm234_vm4 = vweird.f32 %v183_v32 }
 0x180   :  { %vm209_vm7 = vcmp.eq.f32.partialorder %v208_v41, 8.507059e+37  ;;  %v211_v50 = vor.u32 1.1754944e-38, %v210_v42 }
 0x181   :  { %vm239_vm9 = vcmp.eq.f32.partialorder %v238_v43, 8.507059e+37  ;;  %v241_v55 = vor.u32 1.1754944e-38, %v240_v44 }
 0x184   :  { %v371_v33 = vpop.eup %370  ;;  %v509_v34 = vpop.xlane.xlu0 %188 }
 0x185   :  { %v373_v35 = vpop.eup %372  ;;  %v200_v36 = vmul.f32 %v371_v33, %v177_v31  ;;  %374 = vrcp.f32 %v509_v34  ;;  %vm205_vm2 = vweird.f32 %v371_v33  ;;  %v268_v63 = vand.u32 2147483647, %v509_v34 }
 0x186   :  { %v230_v37 = vmul.f32 %v373_v35, %v183_v32  ;;  %v512_v38 = vpop.xlane.xlu2 %185  ;;  %vm235_vm3 = vweird.f32 %v373_v35  ;;  %vm206_vm6 = vmor %vm204_vm5, %vm205_vm2  ;;  %v270_v0 = vand.u32 2147483648, %v509_v34  ;;  %vm264_vm11 = vweird.f32 %v509_v34 }
 0x187   :  { %v201_v39 = vsub.f32 1.0, %v200_v36  ;;  %376 = vrcp.f32 %v512_v38  ;;  %vm236_vm8 = vmor %vm234_vm4, %vm235_vm3  ;;  %v255_v7 = vand.u32 2147483648, %v512_v38  ;;  %vm249_vm14 = vweird.f32 %v512_v38 }
 0x188   :  { %v231_v40 = vsub.f32 1.0, %v230_v37  ;;  %v271_v10 = vor.u32 1.1754944e-38, %v270_v0  ;;  %vm269_vm15 = vcmp.eq.f32.partialorder %v268_v63, 8.507059e+37 }
 0x189   :  { %v202_v45 = vmul.f32 %v371_v33, %v201_v39  ;;  %v256_v17 = vor.u32 1.1754944e-38, %v255_v7 }
 0x18a   :  { %v232_v46 = vmul.f32 %v373_v35, %v231_v40 }
 0x18b   :  { %v375_v47 = vpop.eup %374  ;;  %v203_v48 = vadd.f32 %v371_v33, %v202_v45 }
 0x18c   :  { %v233_v49 = vadd.f32 %v373_v35, %v232_v46  ;;  %v260_v51 = vmul.f32 %v375_v47, %v509_v34  ;;  %v516_v52 = vpop.xlane.xlu1 %191  ;;  %v518_v53 = vpop.xlane.xlu0 %179  ;;  %vm265_vm10 = vweird.f32 %v375_v47 }
 0x18d   :  { %v377_v54 = vpop.eup %376  ;;  %v207_v56 = vsel %vm206_vm6, %v371_v33, %v203_v48  ;;  %378 = vrcp.f32 %v516_v52  ;;  %vm266_vm13 = vmor %vm264_vm11, %vm265_vm10  ;;  %v283_v18 = vand.u32 2147483647, %v516_v52  ;;  %v285_v28 = vand.u32 2147483648, %v516_v52 }
 0x18e   :  { %v237_v57 = vsel %vm236_vm8, %v373_v35, %v233_v49  ;;  %v212_v58 = vsel %vm209_vm7, %v211_v50, %v207_v56  ;;  %v261_v59 = vsub.f32 1.0, %v260_v51  ;;  %v245_v60 = vmul.f32 %v377_v54, %v512_v38  ;;  %v525_v1 = vpop.xlane.xlu2 %194 }
 0x18f   :  { %v242_v61 = vsel %vm239_vm9, %v241_v55, %v237_v57  ;;  %v213_v62 = vmul.f32 %v477_v4, %v212_v58  ;;  %v253_v4 = vand.u32 2147483647, %v512_v38  ;;  %380 = vrcp.f32 %v518_v53 }
 0x190   :  { %v243_v2 = vmul.f32 %v479_v5, %v242_v61  ;;  %v262_v3 = vmul.f32 %v375_v47, %v261_v59  ;;  %v246_v6 = vsub.f32 1.0, %v245_v60  ;;  %vm250_vm12 = vweird.f32 %v377_v54 }
 0x191   :  { %319 = vst.msk [vmem:[%s610_s5] sm:$0xff] %vm126_vm1, %v213_v62  ;;  %382 = vrcp.f32 %v525_v1  ;;  %vm251_vm0 = vmor %vm249_vm14, %vm250_vm12  ;;  %vm254_vm2 = vcmp.eq.f32.partialorder %v253_v4, 8.507059e+37  ;;  %v223_v30 = vand.u32 2147483647, %v518_v53  ;;  %vm279_vm4 = vweird.f32 %v516_v52 }
 0x192   :  { %321 = vst.msk [vmem:[%s610_s5 + $0x10] sm:$0xff] %vm126_vm1, %v243_v2  ;;  %v263_v5 = vadd.f32 %v375_v47, %v262_v3  ;;  %v247_v8 = vmul.f32 %v377_v54, %v246_v6  ;;  %vm557_vm5 = vcmp.eq.f32.partialorder %v283_v18, 8.507059e+37  ;;  %vm219_vm6 = vweird.f32 %v518_v53 }
 0x193   :  { %v379_v9 = vpop.eup %378  ;;  %v286_v39 = vor.u32 1.1754944e-38, %v285_v28  ;;  %vm568_vm8 = vcmp.eq.f32.partialorder %v223_v30, 8.507059e+37  ;;  %v300_v42 = vand.u32 2147483648, %v525_v1  ;;  %v298_v48 = vand.u32 2147483647, %v525_v1 }
 0x194   :  { %v267_v11 = vsel %vm266_vm13, %v375_v47, %v263_v5  ;;  %v248_v12 = vadd.f32 %v377_v54, %v247_v8  ;;  %v275_v13 = vmul.f32 %v379_v9, %v516_v52  ;;  %v543_v14 = vpop.xlane.xlu0 %197  ;;  %vm280_vm3 = vweird.f32 %v379_v9 }
 0x195   :  { %v272_v16 = vsel %vm269_vm15, %v271_v10, %v267_v11  ;;  %384 = vrcp.f32 %v543_v14  ;;  %v381_v26 = vpop.eup %380  ;;  %vm281_vm7 = vmor %vm279_vm4, %vm280_vm3  ;;  %vm294_vm12 = vweird.f32 %v525_v1  ;;  %v301_v55 = vor.u32 1.1754944e-38, %v300_v42 }
 0x196   :  { %v273_v19 = vmul.f32 %v485_v15, %v272_v16  ;;  %v252_v21 = vsel %vm251_vm0, %v377_v54, %v248_v12  ;;  %v276_v22 = vsub.f32 1.0, %v275_v13  ;;  %v215_v15 = vmul.f32 %v381_v26, %v518_v53 }
 0x197   :  { %v257_v27 = vsel %vm254_vm2, %v256_v17, %v252_v21  ;;  %v383_v31 = vpop.eup %382  ;;  %vm220_vm9 = vweird.f32 %v381_v26  ;;  %v315_v56 = vand.u32 2147483648, %v543_v14  ;;  %v313_v58 = vand.u32 2147483647, %v543_v14 }
 0x198   :  { %323 = vst.msk [vmem:[%s610_s5 + $0x20] sm:$0xff] %vm126_vm1, %v273_v19  ;;  %v258_v32 = vmul.f32 %v489_v20, %v257_v27  ;;  %v277_v33 = vmul.f32 %v379_v9, %v276_v22  ;;  %v290_v35 = vmul.f32 %v383_v31, %v525_v1  ;;  %v216_v37 = vsub.f32 1.0, %v215_v15  ;;  %vm221_vm11 = vmor %vm219_vm6, %vm220_vm9 }
 0x199   :  { %v225_v20 = vand.u32 2147483648, %v518_v53  ;;  %vm295_vm10 = vweird.f32 %v383_v31  ;;  %vm299_vm15 = vcmp.eq.f32.partialorder %v298_v48, 8.507059e+37  ;;  %vm309_vm0 = vweird.f32 %v543_v14 }
 0x19a   :  { %322 = vst.msk [vmem:[%s610_s5 + $0x18] sm:$0xff] %vm126_vm1, %v258_v32  ;;  %v278_v36 = vadd.f32 %v379_v9, %v277_v33  ;;  %v291_v41 = vsub.f32 1.0, %v290_v35  ;;  %v217_v44 = vmul.f32 %v381_v26, %v216_v37  ;;  %vm296_vm13 = vmor %vm294_vm12, %vm295_vm10  ;;  %v316_v0 = vor.u32 1.1754944e-38, %v315_v56 }
 0x19b   :  { %v385_v38 = vpop.eup %384  ;;  %v226_v51 = vor.u32 1.1754944e-38, %v225_v20  ;;  %vm314_vm3 = vcmp.eq.f32.partialorder %v313_v58, 8.507059e+37 }
 0x19c   :  { %v282_v43 = vsel %vm281_vm7, %v379_v9, %v278_v36  ;;  %v305_v45 = vmul.f32 %v385_v38, %v543_v14  ;;  %v292_v47 = vmul.f32 %v383_v31, %v291_v41  ;;  %v218_v50 = vadd.f32 %v381_v26, %v217_v44 }
 0x19d   :  { %v287_v46 = vsel %vm557_vm5, %v286_v39, %v282_v43  ;;  %vm310_vm14 = vweird.f32 %v385_v38 }
 0x19e   :  { %v288_v49 = vmul.f32 %v495_v24, %v287_v46  ;;  %v306_v52 = vsub.f32 1.0, %v305_v45  ;;  %v293_v54 = vadd.f32 %v383_v31, %v292_v47  ;;  %v222_v57 = vsel %vm221_vm11, %v381_v26, %v218_v50  ;;  %vm311_vm2 = vmor %vm309_vm0, %vm310_vm14 }
 0x19f   :  { %v227_v53 = vsel %vm568_vm8, %v226_v51, %v222_v57 }
 0x1a0   :  { %324 = vst.msk [vmem:[%s610_s5 + $0x28] sm:$0xff] %vm126_vm1, %v288_v49  ;;  %v307_v24 = vmul.f32 %v385_v38, %v306_v52  ;;  %v297_v59 = vsel %vm296_vm13, %v383_v31, %v293_v54  ;;  %v228_v60 = vmul.f32 %v493_v23, %v227_v53 }
 0x1a1   :  { %v302_v61 = vsel %vm299_vm15, %v301_v55, %v297_v59 }
 0x1a2   :  { %v308_v62 = vadd.f32 %v385_v38, %v307_v24  ;;  %v303_v63 = vmul.f32 %v497_v25, %v302_v61  ;;  %320 = vst.msk [vmem:[%s610_s5 + $0x8] sm:$0xff] %vm126_vm1, %v228_v60 }
 0x1a4   :  { %v312_v1 = vsel %vm311_vm2, %v385_v38, %v308_v62  ;;  %325 = vst.msk [vmem:[%s610_s5 + $0x30] sm:$0xff] %vm126_vm1, %v303_v63 }
 0x1a5   :  { %v317_v23 = vsel %vm314_vm3, %v316_v0, %v312_v1 }
 0x1a6   :  { %v318_v2 = vmul.f32 %v505_v29, %v317_v23 }
 0x1a8   :  { %326 = vst.msk [vmem:[%s610_s5 + $0x38] sm:$0xff] %vm126_vm1, %v318_v2 }

// kernel: torch_model_forward.40
= control target key start
LH: loop header
LB: loop body
LE: loop exit
PB: predicated region body
PF: predicated region fallthrough
CT: control target
= control target key end

     0   :  { %vm58_vm0 = vcmask 130048   ;;  %vm196_vm1 = vcmask 523264   ;;  %s372_s3 = inlined_call_operand.vmem [shape: f32[16,64], index: 3, kind: input, shape index: {}]   ;;  %s373_s0 = inlined_call_operand.vmem [shape: f32[64,16], index: 0, kind: input, shape index: {}]   ;;  %s374_s1 = inlined_call_operand.vmem [shape: f32[1,16], index: 1, kind: input, shape index: {}]   ;;  %s375_s2 = inlined_call_operand.vmem [shape: f32[1,16], index: 2, kind: input, shape index: {}]   ;;  %s376_s4 = inlined_call_operand.vmem [shape: f32[1,64], index: 4, kind: input, shape index: {}]   ;;  %s377_s5 = inlined_call_operand.vmem [shape: f32[64,64], index: 5, kind: output, shape index: {}]  }
   0x1   :  { %v53_v0 = vld [vmem:[%s372_s3 + $0x8] sm:$0xff]  ;;  %v52_v1 = vld [vmem:[%s372_s3] sm:$0xff]  ;;  %v22_v5 = vld [vmem:[%s373_s0 + $0x10] sm:$0xff] }
   0x2   :  { %v20_v2 = vld [vmem:[%s373_s0] sm:$0xff]  ;;  %97 = vmatpush.msra.mxu0 %v53_v0  ;;  %217 = vmatpush.msra.mxu1 %v53_v0  ;;  %v26_v10 = vld [vmem:[%s373_s0 + $0x30] sm:$0xff]  ;;  %v21_v12 = vld [vmem:[%s373_s0 + $0x8] sm:$0xff] }
   0x3   :  { %v223_v3 = vld [vmem:[%s374_s1] ss:$0 sm:$0xff]  ;;  %218 = vmatpush.msra.mxu2 %v53_v0  ;;  %219 = vmatpush.msra.mxu3 %v53_v0  ;;  %v23_v13 = vld [vmem:[%s373_s0 + $0x18] sm:$0xff]  ;;  %v25_v17 = vld [vmem:[%s373_s0 + $0x28] sm:$0xff] }
   0x4   :  { %v224_v4 = vld [vmem:[%s375_s2] ss:$0 sm:$0xff]  ;;  %98 = vmatpush.msra.mxu0 %v52_v1  ;;  %220 = vmatpush.msra.mxu1 %v52_v1  ;;  %v32_v7 = vmul.f32 %v223_v3, %v20_v2  ;;  %v34_v8 = vmul.f32 %v223_v3, %v22_v5  ;;  %v38_v11 = vmul.f32 %v223_v3, %v26_v10  ;;  %v27_v18 = vld [vmem:[%s373_s0 + $0x38] sm:$0xff] }
   0x5   :  { %v24_v6 = vld [vmem:[%s373_s0 + $0x20] sm:$0xff]  ;;  %221 = vmatpush.msra.mxu2 %v52_v1  ;;  %222 = vmatpush.msra.mxu3 %v52_v1  ;;  %v33_v20 = vmul.f32 %v223_v3, %v21_v12  ;;  %v35_v21 = vmul.f32 %v223_v3, %v23_v13  ;;  %v37_v22 = vmul.f32 %v223_v3, %v25_v17 }
   0x6   :  { %v36_v9 = vmul.f32 %v223_v3, %v24_v6  ;;  %v44_v14 = vadd.f32 %v224_v4, %v32_v7  ;;  %v46_v15 = vadd.f32 %v224_v4, %v34_v8  ;;  %v50_v19 = vadd.f32 %v224_v4, %v38_v11  ;;  %v225_v28 = vld [vmem:[%s376_s4] ss:$0 sm:$0xff] }
   0x7   :  { %v39_v23 = vmul.f32 %v223_v3, %v27_v18  ;;  %v45_v24 = vadd.f32 %v224_v4, %v33_v20  ;;  %v47_v25 = vadd.f32 %v224_v4, %v35_v21  ;;  %v49_v26 = vadd.f32 %v224_v4, %v37_v22 }
   0x8   :  { %v48_v16 = vadd.f32 %v224_v4, %v36_v9  ;;  %209 = vmatmul.msk.f32.vlgmr.msra.gmra.mxu0 %vm58_vm0, %v44_v14  ;;  %211 = vmatmul.msk.f32.vlgmr.msra.gmra.mxu1 %vm58_vm0, %v46_v15 }
   0x9   :  { %215 = vmatmul.msk.f32.vlgmr.msra.gmra.mxu3 %vm58_vm0, %v50_v19  ;;  %v51_v27 = vadd.f32 %v224_v4, %v39_v23 }
   0xa   :  { %213 = vmatmul.msk.f32.vlgmr.msra.gmra.mxu2 %vm58_vm0, %v48_v16 }
  0x10   :  { %210 = vmatmul.msk.f32.gmra.mxu0 %vm58_vm0, %v45_v24  ;;  %212 = vmatmul.msk.f32.gmra.mxu1 %vm58_vm0, %v47_v25 }
  0x11   :  { %216 = vmatmul.msk.f32.gmra.mxu3 %vm58_vm0, %v51_v27 }
  0x12   :  { %214 = vmatmul.msk.f32.gmra.mxu2 %vm58_vm0, %v49_v26 }
  0x85   :  { %v100_v29 = vpop.f32.mrf.mxu0  ;;  %v106_v30 = vpop.f32.mrf.mxu1 }
  0x86   :  { %v101_v31 = vadd.f32 %v225_v28, %v100_v29  ;;  %v107_v32 = vadd.f32 %v225_v28, %v106_v30 }
  0x88   :  { %v132_v33 = vmul.f32 0.044715, %v101_v31  ;;  %v134_v34 = vmul.f32 0.044715, %v107_v32  ;;  %v124_v9 = vmul.f32 0.5, %v101_v31  ;;  %v126_v15 = vmul.f32 0.5, %v107_v32 }
  0x8a   :  { %v140_v35 = vmul.f32 %v132_v33, %v101_v31  ;;  %v142_v36 = vmul.f32 %v134_v34, %v107_v32 }
  0x8c   :  { %v148_v37 = vmul.f32 %v140_v35, %v101_v31  ;;  %v150_v38 = vmul.f32 %v142_v36, %v107_v32  ;;  %v118_v40 = vpop.f32.mrf.mxu3 }
  0x8d   :  { %v112_v39 = vpop.f32.mrf.mxu2  ;;  %v319_v42 = vadd.f32 %v225_v28, %v118_v40  ;;  %v103_v43 = vpop.f32.mrf.mxu0 }
  0x8e   :  { %v113_v41 = vadd.f32 %v225_v28, %v112_v39  ;;  %v109_v44 = vpop.f32.mrf.mxu1  ;;  %v156_v45 = vadd.f32 %v148_v37, %v101_v31  ;;  %v158_v46 = vadd.f32 %v150_v38, %v107_v32  ;;  %v321_v47 = vadd.f32 %v225_v28, %v103_v43 }
  0x8f   :  { %v323_v48 = vadd.f32 %v225_v28, %v109_v44  ;;  %v138_v50 = vmul.f32 0.044715, %v319_v42  ;;  %v130_v33 = vmul.f32 0.5, %v319_v42 }
  0x90   :  { %v136_v49 = vmul.f32 0.044715, %v113_v41  ;;  %v164_v51 = vmul.f32 0.7978846, %v156_v45  ;;  %v166_v52 = vmul.f32 0.7978846, %v158_v46 }
  0x91   :  { %v146_v54 = vmul.f32 %v138_v50, %v319_v42  ;;  %v133_v55 = vmul.f32 0.044715, %v321_v47  ;;  %v135_v56 = vmul.f32 0.044715, %v323_v48  ;;  %v128_v29 = vmul.f32 0.5, %v113_v41 }
  0x92   :  { %v144_v53 = vmul.f32 %v136_v49, %v113_v41  ;;  %226 = vtanh.f32 %v164_v51  ;;  %v125_v38 = vmul.f32 0.5, %v321_v47  ;;  %v127_v43 = vmul.f32 0.5, %v323_v48 }
  0x93   :  { %228 = vtanh.f32 %v166_v52  ;;  %v154_v58 = vmul.f32 %v146_v54, %v319_v42  ;;  %v141_v59 = vmul.f32 %v133_v55, %v321_v47  ;;  %v143_v60 = vmul.f32 %v135_v56, %v323_v48 }
  0x94   :  { %v152_v57 = vmul.f32 %v144_v53, %v113_v41  ;;  %v121_v62 = vpop.f32.mrf.mxu3 }
  0x95   :  { %v115_v61 = vpop.f32.mrf.mxu2  ;;  %v162_v0 = vadd.f32 %v154_v58, %v319_v42  ;;  %v149_v1 = vmul.f32 %v141_v59, %v321_v47  ;;  %v151_v3 = vmul.f32 %v143_v60, %v323_v48  ;;  %v122_v4 = vadd.f32 %v225_v28, %v121_v62 }
  0x96   :  { %v160_v63 = vadd.f32 %v152_v57, %v113_v41  ;;  %v116_v2 = vadd.f32 %v225_v28, %v115_v61 }
  0x97   :  { %v170_v6 = vmul.f32 0.7978846, %v162_v0  ;;  %v157_v7 = vadd.f32 %v149_v1, %v321_v47  ;;  %v159_v10 = vadd.f32 %v151_v3, %v323_v48  ;;  %v139_v12 = vmul.f32 0.044715, %v122_v4 }
  0x98   :  { %v168_v5 = vmul.f32 0.7978846, %v160_v63  ;;  %v227_v8 = vpop.eup %226  ;;  %v137_v11 = vmul.f32 0.044715, %v116_v2  ;;  %v129_v47 = vmul.f32 0.5, %v116_v2  ;;  %v131_v49 = vmul.f32 0.5, %v122_v4 }
  0x99   :  { %v229_v13 = vpop.eup %228  ;;  %v180_v14 = vadd.f32 1.0, %v227_v8  ;;  %v165_v16 = vmul.f32 0.7978846, %v157_v7  ;;  %v167_v18 = vmul.f32 0.7978846, %v159_v10  ;;  %v147_v21 = vmul.f32 %v139_v12, %v122_v4 }
  0x9a   :  { %230 = vtanh.f32 %v168_v5  ;;  %v182_v17 = vadd.f32 1.0, %v229_v13  ;;  %v145_v19 = vmul.f32 %v137_v11, %v116_v2 }
  0x9b   :  { %232 = vtanh.f32 %v170_v6  ;;  %v188_v20 = vmul.f32 %v180_v14, %v124_v9  ;;  %v155_v24 = vmul.f32 %v147_v21, %v122_v4 }
  0x9c   :  { %234 = vtanh.f32 %v165_v16  ;;  %v190_v22 = vmul.f32 %v182_v17, %v126_v15  ;;  %v153_v23 = vmul.f32 %v145_v19, %v116_v2 }
  0x9d   :  { %236 = vtanh.f32 %v167_v18  ;;  %197 = vst.msk [vmem:[%s377_s5] sm:$0xff] %vm196_vm1, %v188_v20  ;;  %v163_v27 = vadd.f32 %v155_v24, %v122_v4 }
  0x9e   :  { %199 = vst.msk [vmem:[%s377_s5 + $0x10] sm:$0xff] %vm196_vm1, %v190_v22  ;;  %v161_v25 = vadd.f32 %v153_v23, %v116_v2 }
  0x9f   :  { %v171_v35 = vmul.f32 0.7978846, %v163_v27 }
  0xa0   :  { %v231_v26 = vpop.eup %230  ;;  %v169_v31 = vmul.f32 0.7978846, %v161_v25 }
  0xa1   :  { %v233_v28 = vpop.eup %232  ;;  %v184_v30 = vadd.f32 1.0, %v231_v26 }
  0xa2   :  { %v235_v32 = vpop.eup %234  ;;  %v186_v34 = vadd.f32 1.0, %v233_v28  ;;  %238 = vtanh.f32 %v169_v31 }
  0xa3   :  { %v237_v36 = vpop.eup %236  ;;  %v192_v37 = vmul.f32 %v184_v30, %v128_v29  ;;  %v181_v39 = vadd.f32 1.0, %v235_v32  ;;  %240 = vtanh.f32 %v171_v35 }
  0xa4   :  { %v194_v40 = vmul.f32 %v186_v34, %v130_v33  ;;  %v183_v44 = vadd.f32 1.0, %v237_v36 }
  0xa5   :  { %201 = vst.msk [vmem:[%s377_s5 + $0x20] sm:$0xff] %vm196_vm1, %v192_v37  ;;  %v189_v41 = vmul.f32 %v181_v39, %v125_v38 }
  0xa6   :  { %203 = vst.msk [vmem:[%s377_s5 + $0x30] sm:$0xff] %vm196_vm1, %v194_v40  ;;  %v191_v42 = vmul.f32 %v183_v44, %v127_v43 }
  0xa7   :  { %198 = vst.msk [vmem:[%s377_s5 + $0x8] sm:$0xff] %vm196_vm1, %v189_v41 }
  0xa8   :  { %200 = vst.msk [vmem:[%s377_s5 + $0x18] sm:$0xff] %vm196_vm1, %v191_v42  ;;  %v239_v45 = vpop.eup %238 }
  0xa9   :  { %v241_v46 = vpop.eup %240  ;;  %v185_v48 = vadd.f32 1.0, %v239_v45 }
  0xaa   :  { %v187_v50 = vadd.f32 1.0, %v241_v46 }
  0xab   :  { %v193_v51 = vmul.f32 %v185_v48, %v129_v47 }
  0xac   :  { %v195_v52 = vmul.f32 %v187_v50, %v131_v49 }
  0xad   :  { %202 = vst.msk [vmem:[%s377_s5 + $0x28] sm:$0xff] %vm196_vm1, %v193_v51 }
  0xae   :  { %204 = vst.msk [vmem:[%s377_s5 + $0x38] sm:$0xff] %vm196_vm1, %v195_v52 }

// kernel: torch_model_forward.41
= control target key start
LH: loop header
LB: loop body
LE: loop exit
PB: predicated region body
PF: predicated region fallthrough
CT: control target
= control target key end

     0   :  { %vm66_vm0 = vcmask 523264   ;;  %vm284_vm2 = vcmask 7168   ;;  %s547_s3 = inlined_call_operand.vmem [shape: f32[64,1], index: 3, kind: input, shape index: {}]   ;;  %s548_s4 = inlined_call_operand.<no memory space> [shape: f32[1,1], index: 4, kind: input, shape index: {}]   ;;  %s549_s1 = inlined_call_operand.vmem [shape: f32[1,64], index: 1, kind: input, shape index: {}]   ;;  %s550_s2 = inlined_call_operand.vmem [shape: f32[1,64], index: 2, kind: input, shape index: {}]   ;;  %s551_s0 = inlined_call_operand.vmem [shape: f32[64,64], index: 0, kind: input, shape index: {}]   ;;  %s552_s5 = inlined_call_operand.vmem [shape: f32[64,1], index: 5, kind: output, shape index: {}]  }
   0x1   :  { %v61_v0 = vld [vmem:[%s547_s3 + $0x38] sm:$0xff]  ;;  %v60_v1 = vld [vmem:[%s547_s3 + $0x30] sm:$0xff]  ;;  %v10_v2 = vstv %s548_s4  ;;  %v59_v3 = vld [vmem:[%s547_s3 + $0x28] sm:$0xff] }
   0x2   :  { %99 = vmatpush.msra.mxu0 %v61_v0  ;;  %305 = vmatpush.msra.mxu1 %v61_v0  ;;  %11 = vst [vmem:[#allocation2] sm:$0x1] %v10_v2  ;;  %v58_v4 = vld [vmem:[%s547_s3 + $0x20] sm:$0xff]  ;;  %v57_v6 = vld [vmem:[%s547_s3 + $0x18] sm:$0xff]  ;;  %v24_v8 = vld [vmem:[%s551_s0 + $0x10] sm:$0xff] }
   0x3   :  { %306 = vmatpush.msra.mxu2 %v61_v0  ;;  %307 = vmatpush.msra.mxu3 %v61_v0  ;;  %v329_v5 = vld [vmem:[%s549_s1] ss:$0 sm:$0xff]  ;;  %v28_v10 = vld [vmem:[%s551_s0 + $0x30] sm:$0xff]  ;;  %v55_v15 = vld [vmem:[%s547_s3 + $0x8] sm:$0xff] }
   0x4   :  { %100 = vmatpush.msra.mxu0 %v60_v1  ;;  %308 = vmatpush.msra.mxu1 %v60_v1  ;;  %v22_v7 = vld [vmem:[%s551_s0] sm:$0xff]  ;;  %v56_v11 = vld [vmem:[%s547_s3 + $0x10] sm:$0xff]  ;;  %v36_v14 = vmul.f32 %v329_v5, %v24_v8  ;;  %v40_v17 = vmul.f32 %v329_v5, %v28_v10  ;;  %v23_v23 = vld [vmem:[%s551_s0 + $0x8] sm:$0xff] }
   0x5   :  { %309 = vmatpush.msra.mxu2 %v60_v1  ;;  %310 = vmatpush.msra.mxu3 %v60_v1  ;;  %v26_v9 = vld [vmem:[%s551_s0 + $0x20] sm:$0xff]  ;;  %v34_v12 = vmul.f32 %v329_v5, %v22_v7  ;;  %v25_v24 = vld [vmem:[%s551_s0 + $0x18] sm:$0xff]  ;;  %v27_v25 = vld [vmem:[%s551_s0 + $0x28] sm:$0xff]  ;;  %v35_v27 = vmul.f32 %v329_v5, %v23_v23 }
   0x6   :  { %101 = vmatpush.msra.mxu0 %v59_v3  ;;  %311 = vmatpush.msra.mxu1 %v59_v3  ;;  %v330_v13 = vld [vmem:[%s550_s2] ss:$0 sm:$0xff]  ;;  %v38_v16 = vmul.f32 %v329_v5, %v26_v9  ;;  %v29_v26 = vld [vmem:[%s551_s0 + $0x38] sm:$0xff]  ;;  %v37_v28 = vmul.f32 %v329_v5, %v25_v24  ;;  %v39_v29 = vmul.f32 %v329_v5, %v27_v25 }
   0x7   :  { %312 = vmatpush.msra.mxu2 %v59_v3  ;;  %313 = vmatpush.msra.mxu3 %v59_v3  ;;  %v54_v18 = vld [vmem:[%s547_s3] sm:$0xff]  ;;  %v46_v19 = vadd.f32 %v330_v13, %v34_v12  ;;  %v48_v20 = vadd.f32 %v330_v13, %v36_v14  ;;  %v52_v22 = vadd.f32 %v330_v13, %v40_v17 }
   0x8   :  { %102 = vmatpush.msra.mxu0 %v58_v4  ;;  %314 = vmatpush.msra.mxu1 %v58_v4  ;;  %v50_v21 = vadd.f32 %v330_v13, %v38_v16  ;;  %v41_v30 = vmul.f32 %v329_v5, %v29_v26  ;;  %v47_v31 = vadd.f32 %v330_v13, %v35_v27 }
   0x9   :  { %315 = vmatpush.msra.mxu2 %v58_v4  ;;  %316 = vmatpush.msra.mxu3 %v58_v4  ;;  %v49_v32 = vadd.f32 %v330_v13, %v37_v28  ;;  %v51_v33 = vadd.f32 %v330_v13, %v39_v29  ;;  %v331_v35 = vld [vmem:[#allocation2] ss:$0 sm:$0xff] }
   0xa   :  { %103 = vmatpush.msra.mxu0 %v57_v6  ;;  %317 = vmatpush.msra.mxu1 %v57_v6  ;;  %v53_v34 = vadd.f32 %v330_v13, %v41_v30 }
   0xb   :  { %318 = vmatpush.msra.mxu2 %v57_v6  ;;  %319 = vmatpush.msra.mxu3 %v57_v6 }
   0xc   :  { %104 = vmatpush.msra.mxu0 %v56_v11  ;;  %320 = vmatpush.msra.mxu1 %v56_v11 }
   0xd   :  { %321 = vmatpush.msra.mxu2 %v56_v11  ;;  %322 = vmatpush.msra.mxu3 %v56_v11 }
   0xe   :  { %105 = vmatpush.msra.mxu0 %v55_v15  ;;  %323 = vmatpush.msra.mxu1 %v55_v15 }
   0xf   :  { %324 = vmatpush.msra.mxu2 %v55_v15  ;;  %325 = vmatpush.msra.mxu3 %v55_v15 }
  0x10   :  { %106 = vmatpush.msra.mxu0 %v54_v18  ;;  %326 = vmatpush.msra.mxu1 %v54_v18 }
  0x11   :  { %327 = vmatpush.msra.mxu2 %v54_v18  ;;  %328 = vmatpush.msra.mxu3 %v54_v18 }
  0x12   :  { %297 = vmatmul.msk.f32.vlgmr.msra.gmra.mxu0 %vm66_vm0, %v46_v19  ;;  %299 = vmatmul.msk.f32.vlgmr.msra.gmra.mxu1 %vm66_vm0, %v48_v20 }
  0x13   :  { %301 = vmatmul.msk.f32.vlgmr.msra.gmra.mxu2 %vm66_vm0, %v50_v21  ;;  %303 = vmatmul.msk.f32.vlgmr.msra.gmra.mxu3 %vm66_vm0, %v52_v22 }
  0x1a   :  { %298 = vmatmul.msk.f32.gmra.mxu0 %vm66_vm0, %v47_v31  ;;  %300 = vmatmul.msk.f32.gmra.mxu1 %vm66_vm0, %v49_v32 }
  0x1b   :  { %302 = vmatmul.msk.f32.gmra.mxu2 %vm66_vm0, %v51_v33  ;;  %304 = vmatmul.msk.f32.gmra.mxu3 %vm66_vm0, %v53_v34 }
  0x8f   :  { %v108_v36 = vpop.f32.mrf.mxu0  ;;  %v114_v37 = vpop.f32.mrf.mxu1 }
  0x90   :  { %v109_v38 = vadd.f32 %v331_v35, %v108_v36  ;;  %v115_v39 = vadd.f32 %v331_v35, %v114_v37 }
  0x92   :  { %v132_v40 = vsub.f32 0.0, %v109_v38  ;;  %v134_v41 = vsub.f32 0.0, %v115_v39 }
  0x94   :  { %v140_v42 = vmul.f32 1.442695, %v132_v40  ;;  %v144_v43 = vmul.f32 1.442695, %v134_v41 }
  0x96   :  { %332 = vpow2.f32 %v140_v42  ;;  %v120_v44 = vpop.f32.mrf.mxu2  ;;  %v126_v45 = vpop.f32.mrf.mxu3 }
  0x97   :  { %334 = vpow2.f32 %v144_v43  ;;  %v121_v46 = vadd.f32 %v331_v35, %v120_v44  ;;  %v127_v47 = vadd.f32 %v331_v35, %v126_v45  ;;  %v111_v48 = vpop.f32.mrf.mxu0  ;;  %v117_v49 = vpop.f32.mrf.mxu1 }
  0x98   :  { %v112_v50 = vadd.f32 %v331_v35, %v111_v48  ;;  %v118_v51 = vadd.f32 %v331_v35, %v117_v49 }
  0x99   :  { %v136_v52 = vsub.f32 0.0, %v121_v46  ;;  %v138_v53 = vsub.f32 0.0, %v127_v47 }
  0x9a   :  { %v133_v54 = vsub.f32 0.0, %v112_v50  ;;  %v135_v55 = vsub.f32 0.0, %v118_v51 }
  0x9b   :  { %v148_v56 = vmul.f32 1.442695, %v136_v52  ;;  %v152_v57 = vmul.f32 1.442695, %v138_v53 }
  0x9c   :  { %v333_v58 = vpop.eup %332  ;;  %v142_v61 = vmul.f32 1.442695, %v133_v54  ;;  %v146_v63 = vmul.f32 1.442695, %v135_v55 }
  0x9d   :  { %v335_v59 = vpop.eup %334  ;;  %v156_v60 = vadd.f32 1.0, %v333_v58  ;;  %336 = vpow2.f32 %v148_v56 }
  0x9e   :  { %v158_v62 = vadd.f32 1.0, %v335_v59  ;;  %338 = vpow2.f32 %v152_v57  ;;  %v123_v0 = vpop.f32.mrf.mxu2  ;;  %v129_v2 = vpop.f32.mrf.mxu3 }
  0x9f   :  { %340 = vrcp.f32 %v156_v60  ;;  %v124_v1 = vadd.f32 %v331_v35, %v123_v0  ;;  %v130_v9 = vadd.f32 %v331_v35, %v129_v2  ;;  %vm169_vm1 = vweird.f32 %v156_v60 }
  0xa0   :  { %342 = vrcp.f32 %v158_v62  ;;  %v173_v17 = vand.u32 2147483647, %v156_v60  ;;  %v175_v18 = vand.u32 2147483648, %v156_v60  ;;  %v203_v20 = vand.u32 2147483647, %v158_v62 }
  0xa1   :  { %344 = vpow2.f32 %v142_v61  ;;  %v137_v4 = vsub.f32 0.0, %v124_v1  ;;  %v205_v21 = vand.u32 2147483648, %v158_v62  ;;  %v139_v22 = vsub.f32 0.0, %v130_v9 }
  0xa2   :  { %346 = vpow2.f32 %v146_v63  ;;  %vm199_vm4 = vweird.f32 %v158_v62  ;;  %vm174_vm6 = vcmp.eq.f32.partialorder %v173_v17, 8.507059e+37  ;;  %v176_v29 = vor.u32 1.1754944e-38, %v175_v18 }
  0xa3   :  { %v337_v3 = vpop.eup %336  ;;  %v150_v14 = vmul.f32 1.442695, %v137_v4  ;;  %vm204_vm8 = vcmp.eq.f32.partialorder %v203_v20, 8.507059e+37  ;;  %v154_v32 = vmul.f32 1.442695, %v139_v22  ;;  %v206_v35 = vor.u32 1.1754944e-38, %v205_v21 }
  0xa4   :  { %v339_v5 = vpop.eup %338  ;;  %v459_v6 = vadd.f32 1.0, %v337_v3 }
  0xa5   :  { %v341_v7 = vpop.eup %340  ;;  %v461_v8 = vadd.f32 1.0, %v339_v5 }
  0xa6   :  { %v343_v10 = vpop.eup %342  ;;  %v165_v11 = vmul.f32 %v341_v7, %v156_v60  ;;  %348 = vrcp.f32 %v459_v6  ;;  %vm170_vm3 = vweird.f32 %v341_v7  ;;  %v233_v36 = vand.u32 2147483647, %v459_v6 }
  0xa7   :  { %v345_v12 = vpop.eup %344  ;;  %v195_v13 = vmul.f32 %v343_v10, %v158_v62  ;;  %350 = vrcp.f32 %v461_v8  ;;  %vm200_vm5 = vweird.f32 %v343_v10  ;;  %vm171_vm7 = vmor %vm169_vm1, %vm170_vm3  ;;  %v235_v42 = vand.u32 2147483648, %v459_v6 }
  0xa8   :  { %v347_v15 = vpop.eup %346  ;;  %v166_v16 = vsub.f32 1.0, %v165_v11  ;;  %v465_v24 = vadd.f32 1.0, %v345_v12  ;;  %352 = vpow2.f32 %v150_v14  ;;  %vm201_vm9 = vmor %vm199_vm4, %vm200_vm5  ;;  %v263_v43 = vand.u32 2147483647, %v461_v8 }
  0xa9   :  { %v196_v19 = vsub.f32 1.0, %v195_v13  ;;  %v467_v25 = vadd.f32 1.0, %v347_v15  ;;  %v265_v44 = vand.u32 2147483648, %v461_v8  ;;  %vm229_vm11 = vweird.f32 %v459_v6 }
  0xaa   :  { %v167_v23 = vmul.f32 %v341_v7, %v166_v16  ;;  %354 = vrcp.f32 %v465_v24  ;;  %vm489_vm12 = vcmp.eq.f32.partialorder %v233_v36, 8.507059e+37  ;;  %vm259_vm13 = vweird.f32 %v461_v8 }
  0xab   :  { %v197_v26 = vmul.f32 %v343_v10, %v196_v19  ;;  %356 = vrcp.f32 %v467_v25  ;;  %v236_v55 = vor.u32 1.1754944e-38, %v235_v42  ;;  %vm497_vm0 = vcmp.eq.f32.partialorder %v263_v43, 8.507059e+37 }
  0xac   :  { %v349_v27 = vpop.eup %348  ;;  %v168_v28 = vadd.f32 %v341_v7, %v167_v23  ;;  %358 = vpow2.f32 %v154_v32  ;;  %v266_v57 = vor.u32 1.1754944e-38, %v265_v44  ;;  %vm184_vm3 = vweird.f32 %v465_v24 }
  0xad   :  { %v198_v30 = vadd.f32 %v343_v10, %v197_v26  ;;  %v225_v31 = vmul.f32 %v349_v27, %v459_v6  ;;  %v351_v33 = vpop.eup %350  ;;  %vm230_vm10 = vweird.f32 %v349_v27  ;;  %v188_v63 = vand.u32 2147483647, %v465_v24 }
  0xae   :  { %v172_v34 = vsel %vm171_vm7, %v341_v7, %v168_v28  ;;  %v255_v40 = vmul.f32 %v351_v33, %v461_v8  ;;  %v353_v45 = vpop.eup %352  ;;  %vm260_vm14 = vweird.f32 %v351_v33  ;;  %vm231_vm15 = vmor %vm229_vm11, %vm230_vm10  ;;  %v190_v0 = vand.u32 2147483648, %v465_v24 }
  0xaf   :  { %v177_v37 = vsel %vm174_vm6, %v176_v29, %v172_v34  ;;  %v202_v38 = vsel %vm201_vm9, %v343_v10, %v198_v30  ;;  %v226_v39 = vsub.f32 1.0, %v225_v31  ;;  %v494_v50 = vadd.f32 1.0, %v353_v45  ;;  %vm261_vm1 = vmor %vm259_vm13, %vm260_vm14 }
  0xb0   :  { %285 = vst.msk [vmem:[%s552_s5] sm:$0xff] %vm284_vm2, %v177_v37  ;;  %v207_v41 = vsel %vm204_vm8, %v206_v35, %v202_v38  ;;  %v256_v47 = vsub.f32 1.0, %v255_v40  ;;  %v355_v48 = vpop.eup %354  ;;  %vm214_vm5 = vweird.f32 %v467_v25  ;;  %v220_v6 = vand.u32 2147483648, %v467_v25 }
  0xb1   :  { %287 = vst.msk [vmem:[%s552_s5 + $0x10] sm:$0xff] %vm284_vm2, %v207_v41  ;;  %v227_v46 = vmul.f32 %v349_v27, %v226_v39  ;;  %v180_v53 = vmul.f32 %v355_v48, %v465_v24  ;;  %v357_v54 = vpop.eup %356  ;;  %360 = vrcp.f32 %v494_v50  ;;  %vm185_vm4 = vweird.f32 %v355_v48 }
  0xb2   :  { %v257_v52 = vmul.f32 %v351_v33, %v256_v47  ;;  %v210_v61 = vmul.f32 %v357_v54, %v467_v25  ;;  %v359_v1 = vpop.eup %358  ;;  %vm215_vm6 = vweird.f32 %v357_v54  ;;  %v218_v10 = vand.u32 2147483647, %v467_v25  ;;  %vm186_vm7 = vmor %vm184_vm3, %vm185_vm4 }
  0xb3   :  { %v228_v51 = vadd.f32 %v349_v27, %v227_v46  ;;  %v181_v60 = vsub.f32 1.0, %v180_v53  ;;  %v163_v7 = vadd.f32 1.0, %v359_v1  ;;  %v191_v12 = vor.u32 1.1754944e-38, %v190_v0  ;;  %vm216_vm9 = vmor %vm214_vm5, %vm215_vm6 }
  0xb4   :  { %v258_v59 = vadd.f32 %v351_v33, %v257_v52  ;;  %v211_v4 = vsub.f32 1.0, %v210_v61  ;;  %vm189_vm8 = vcmp.eq.f32.partialorder %v188_v63, 8.507059e+37  ;;  %v221_v17 = vor.u32 1.1754944e-38, %v220_v6 }
  0xb5   :  { %v232_v58 = vsel %vm231_vm15, %v349_v27, %v228_v51  ;;  %v182_v3 = vmul.f32 %v355_v48, %v181_v60  ;;  %362 = vrcp.f32 %v163_v7  ;;  %vm219_vm10 = vcmp.eq.f32.partialorder %v218_v10, 8.507059e+37 }
  0xb6   :  { %v237_v62 = vsel %vm489_vm12, %v236_v55, %v232_v58  ;;  %v262_v2 = vsel %vm261_vm1, %v351_v33, %v258_v59  ;;  %v212_v9 = vmul.f32 %v357_v54, %v211_v4  ;;  %v250_v21 = vand.u32 2147483648, %v494_v50 }
  0xb7   :  { %289 = vst.msk [vmem:[%s552_s5 + $0x20] sm:$0xff] %vm284_vm2, %v237_v62  ;;  %v267_v5 = vsel %vm497_vm0, %v266_v57, %v262_v2  ;;  %v183_v8 = vadd.f32 %v355_v48, %v182_v3  ;;  %v361_v11 = vpop.eup %360  ;;  %v248_v23 = vand.u32 2147483647, %v494_v50  ;;  %vm244_vm12 = vweird.f32 %v494_v50 }
  0xb8   :  { %291 = vst.msk [vmem:[%s552_s5 + $0x30] sm:$0xff] %vm284_vm2, %v267_v5  ;;  %v213_v14 = vadd.f32 %v357_v54, %v212_v9  ;;  %v240_v15 = vmul.f32 %v361_v11, %v494_v50  ;;  %vm245_vm11 = vweird.f32 %v361_v11  ;;  %v251_v27 = vor.u32 1.1754944e-38, %v250_v21 }
  0xb9   :  { %v187_v13 = vsel %vm186_vm7, %v355_v48, %v183_v8  ;;  %vm246_vm13 = vmor %vm244_vm12, %vm245_vm11  ;;  %vm249_vm14 = vcmp.eq.f32.partialorder %v248_v23, 8.507059e+37  ;;  %v280_v31 = vand.u32 2147483648, %v163_v7  ;;  %v278_v33 = vand.u32 2147483647, %v163_v7 }
  0xba   :  { %v192_v16 = vsel %vm189_vm8, %v191_v12, %v187_v13  ;;  %v217_v18 = vsel %vm216_vm9, %v357_v54, %v213_v14  ;;  %v241_v19 = vsub.f32 1.0, %v240_v15  ;;  %vm274_vm0 = vweird.f32 %v163_v7 }
  0xbb   :  { %286 = vst.msk [vmem:[%s552_s5 + $0x8] sm:$0xff] %vm284_vm2, %v192_v16  ;;  %v222_v20 = vsel %vm219_vm10, %v221_v17, %v217_v18  ;;  %v363_v24 = vpop.eup %362  ;;  %v281_v35 = vor.u32 1.1754944e-38, %v280_v31  ;;  %vm279_vm3 = vcmp.eq.f32.partialorder %v278_v33, 8.507059e+37 }
  0xbc   :  { %288 = vst.msk [vmem:[%s552_s5 + $0x18] sm:$0xff] %vm284_vm2, %v222_v20  ;;  %v242_v22 = vmul.f32 %v361_v11, %v241_v19  ;;  %v270_v26 = vmul.f32 %v363_v24, %v163_v7  ;;  %vm275_vm15 = vweird.f32 %v363_v24 }
  0xbd   :  { %vm276_vm1 = vmor %vm274_vm0, %vm275_vm15 }
  0xbe   :  { %v243_v25 = vadd.f32 %v361_v11, %v242_v22  ;;  %v271_v29 = vsub.f32 1.0, %v270_v26 }
  0xc0   :  { %v247_v28 = vsel %vm246_vm13, %v361_v11, %v243_v25  ;;  %v272_v32 = vmul.f32 %v363_v24, %v271_v29 }
  0xc1   :  { %v252_v30 = vsel %vm249_vm14, %v251_v27, %v247_v28 }
  0xc2   :  { %290 = vst.msk [vmem:[%s552_s5 + $0x28] sm:$0xff] %vm284_vm2, %v252_v30  ;;  %v273_v34 = vadd.f32 %v363_v24, %v272_v32 }
  0xc4   :  { %v277_v36 = vsel %vm276_vm1, %v363_v24, %v273_v34 }
  0xc5   :  { %v282_v37 = vsel %vm279_vm3, %v281_v35, %v277_v36 }
  0xc6   :  { %292 = vst.msk [vmem:[%s552_s5 + $0x38] sm:$0xff] %vm284_vm2, %v282_v37 }

</bundles_post_ra>
